<compile_context>
chip_gen: v7x
topology: tpu7x:2x2x1
jax: 0.10.0
libtpu: 0.0.40
codegen_flags: <defaults>
</compile_context>

<pallas_src>
import functools

import jax
import jax.numpy as jnp
from jax.experimental import pallas as pl
from jax.experimental.pallas import tpu as pltpu

# ----------------------------- hparams ------------------------------------
VOCAB = 50
EMBED = 32   # hparams['embed_size']
ENC   = 32   # hparams['encoder_size']
NHEAD = 4    # hparams['nhead']
VSIZE = 16   # hparams['v_size']

# ------------------------- packed weight-slab layout -----------------------
# Everything the kernel needs lives in one [SLAB_ROWS, 128] f32 slab so the
# launch carries 2 input DMAs (ids + slab) instead of 12+.  All row offsets
# are multiples of 8 so the static ref slices stay sublane-aligned.
VOCAB_PAD = 56                        # 50 -> next multiple of 8 (extra rows zero)
SLAB_COLS = 128

EMB_R  = 0                            # [VOCAB_PAD, EMBED]  embedding table
DQKV_R = EMB_R + VOCAB_PAD            # [EMBED, 3*EMBED]    doc MHA in_proj  (pre-transposed)
DWO_R  = DQKV_R + EMBED               # [EMBED, EMBED]      doc MHA out_proj (pre-transposed)
DPW_R  = DWO_R + EMBED                # [EMBED, ENC]        doc Linear(embed->enc)
DAW1_R = DPW_R + EMBED                # [ENC, VSIZE]        doc additive-attn W1
UQKV_R = DAW1_R + ENC                 # [ENC, 3*ENC]        user MHA in_proj
UWO_R  = UQKV_R + ENC                 # [ENC, ENC]          user MHA out_proj
UAW1_R = UWO_R + ENC                  # [ENC, VSIZE]        user additive-attn W1
BIAS_R = UAW1_R + ENC                 # 16 bias rows (one bias vector per row)
SLAB_ROWS = BIAS_R + 16               # 296

# bias row indices (relative to BIAS_R)
B_DQKV, B_DO, B_DP, B_DA1, B_DA2W, B_DA2B = 0, 1, 2, 3, 4, 5
B_UQKV, B_UO, B_UA1, B_UA2W, B_UA2B = 6, 7, 8, 9, 10


# ----------------------------- kernel helpers ------------------------------
def _softmax_lastdim(s):
    s = s - jnp.max(s, axis=-1, keepdims=True)
    p = jnp.exp(s)
    return p * pl.reciprocal(jnp.sum(p, axis=-1, keepdims=True), approx=True)


def _mha(x_flat, wqkv, bqkv, wo, bo, *, batch, seq, nhead):
    """nn.MultiheadAttention forward (dropout = identity). x_flat: [batch*seq, D]."""
    D = x_flat.shape[1]
    qkv = jnp.dot(x_flat, wqkv, preferred_element_type=jnp.float32) + bqkv   # [B*S, 3D]
    q = qkv[:, 0 * D:1 * D].reshape(batch, seq, D)
    k = qkv[:, 1 * D:2 * D].reshape(batch, seq, D)
    v = qkv[:, 2 * D:3 * D].reshape(batch, seq, D)

    dh = D // nhead
    scale = 1.0 / (dh ** 0.5)
    heads = []
    for h in range(nhead):                        # static loop; each iter is doc-batched
        qh = q[..., h * dh:(h + 1) * dh] * scale  # [B, S, dh]
        kh = k[..., h * dh:(h + 1) * dh]
        vh = v[..., h * dh:(h + 1) * dh]
        s = jnp.einsum('bqd,bkd->bqk', qh, kh,
                       preferred_element_type=jnp.float32)                  # [B, S, S]
        p = _softmax_lastdim(s)
        heads.append(jnp.einsum('bqk,bkd->bqd', p, vh,
                                preferred_element_type=jnp.float32))
    attn = jnp.concatenate(heads, axis=-1).reshape(batch * seq, D)          # [B*S, D]
    return jnp.dot(attn, wo, preferred_element_type=jnp.float32) + bo


def _additive_attn(ctx_flat, w1, b1, v_row, b2, *, batch, seq):
    """AdditiveAttention over the seq axis. ctx_flat: [batch*seq, D] -> [batch, D]."""
    D = ctx_flat.shape[1]
    hidden = jnp.tanh(jnp.dot(ctx_flat, w1, preferred_element_type=jnp.float32) + b1)  # [B*S, V]
    # v^T h as an elementwise mul + lane reduction (avoids a Kx1 matmul)
    scores = jnp.sum(hidden * v_row, axis=-1, keepdims=True) + b2                      # [B*S, 1]
    scores = scores.reshape(batch, seq, 1)
    scores = scores - jnp.max(scores, axis=1, keepdims=True)
    w = jnp.exp(scores)
    w = w * pl.reciprocal(jnp.sum(w, axis=1, keepdims=True), approx=True)              # [B, S, 1]
    return jnp.sum(w * ctx_flat.reshape(batch, seq, D), axis=1)                        # [B, D]


# ------------------------------- fused kernel ------------------------------
def nrms_kernel(ids_ref, w_ref, o_ref, *, num_user, num_click, num_cand,
                seq_len, nhead):
    U, NC, NCAND, S = num_user, num_click, num_cand, seq_len
    NDOC = U * (NC + NCAND)
    NTOK = NDOC * S

    # ---- unpack the weight slab (static, sublane-aligned ref slices) ----
    emb    = w_ref[EMB_R:EMB_R + VOCAB_PAD, 0:EMBED]
    d_wqkv = w_ref[DQKV_R:DQKV_R + EMBED, 0:3 * EMBED]
    d_wo   = w_ref[DWO_R:DWO_R + EMBED, 0:EMBED]
    d_pw   = w_ref[DPW_R:DPW_R + EMBED, 0:ENC]
    d_aw1  = w_ref[DAW1_R:DAW1_R + ENC, 0:VSIZE]
    u_wqkv = w_ref[UQKV_R:UQKV_R + ENC, 0:3 * ENC]
    u_wo   = w_ref[UWO_R:UWO_R + ENC, 0:ENC]
    u_aw1  = w_ref[UAW1_R:UAW1_R + ENC, 0:VSIZE]
    bias   = w_ref[BIAS_R:BIAS_R + 16, :]                      # [16, 128] value
    d_bqkv = bias[B_DQKV:B_DQKV + 1, 0:3 * EMBED]
    d_bo   = bias[B_DO:B_DO + 1, 0:EMBED]
    d_pb   = bias[B_DP:B_DP + 1, 0:ENC]
    d_ab1  = bias[B_DA1:B_DA1 + 1, 0:VSIZE]
    d_aw2  = bias[B_DA2W:B_DA2W + 1, 0:VSIZE]
    d_ab2  = bias[B_DA2B:B_DA2B + 1, 0:1]
    u_bqkv = bias[B_UQKV:B_UQKV + 1, 0:3 * ENC]
    u_bo   = bias[B_UO:B_UO + 1, 0:ENC]
    u_ab1  = bias[B_UA1:B_UA1 + 1, 0:VSIZE]
    u_aw2  = bias[B_UA2W:B_UA2W + 1, 0:VSIZE]
    u_ab2  = bias[B_UA2B:B_UA2B + 1, 0:1]

    # ---- embedding lookup as a one-hot matmul against the VMEM table ----
    ids = ids_ref[...]                                                     # [NTOK, 1] int32
    vocab_iota = jax.lax.broadcasted_iota(jnp.int32, (NTOK, VOCAB_PAD), 1)
    onehot = (vocab_iota == ids).astype(jnp.float32)                       # [NTOK, VOCAB_PAD]
    x = jnp.dot(onehot, emb, preferred_element_type=jnp.float32)           # [NTOK, EMBED]

    # ---- doc-level multi-head self-attention over the tokens of each doc ----
    y = _mha(x, d_wqkv, d_bqkv, d_wo, d_bo, batch=NDOC, seq=S, nhead=nhead)

    # ---- Linear(embed_size -> encoder_size) ----
    ctx = jnp.dot(y, d_pw, preferred_element_type=jnp.float32) + d_pb      # [NTOK, ENC]

    # ---- doc additive attention -> one vector per doc ----
    doc_repr = _additive_attn(ctx, d_aw1, d_ab1, d_aw2, d_ab2,
                              batch=NDOC, seq=S)                            # [NDOC, ENC]

    # ---- split clicked / candidate docs (static in-register slices) ----
    click = doc_repr[0:U * NC, :]                                           # [U*NC, ENC]
    cand = doc_repr[U * NC:NDOC, :].reshape(U, NCAND, ENC)                  # [U, NCAND, ENC]

    # ---- user-level MHA over clicked docs + additive attention ----
    yu = _mha(click, u_wqkv, u_bqkv, u_wo, u_bo, batch=U, seq=NC, nhead=nhead)
    user_rep = _additive_attn(yu, u_aw1, u_ab1, u_aw2, u_ab2,
                              batch=U, seq=NC)                              # [U, ENC]

    # ---- dot-product scoring against candidates + sigmoid ----
    logits = jnp.sum(cand * user_rep.reshape(U, 1, ENC), axis=-1)           # [U, NCAND]
    o_ref[...] = (1.0 / (1.0 + jnp.exp(-logits))).astype(o_ref.dtype)


# --------------------------- pallas wrapper --------------------------------
def nrms_forward(clicks, cands, slab):
    """clicks: [U, NC, S] int32, cands: [U, C, S] int32 -> sigmoid scores [U, C]."""
    U, NC, S = clicks.shape
    _, NCAND, _ = cands.shape
    # Only XLA glue feeding the single launch: a trivial token-id concat.
    ids = jnp.concatenate([clicks.reshape(-1), cands.reshape(-1)]).reshape(-1, 1)  # [NTOK, 1]
    kern = functools.partial(nrms_kernel, num_user=U, num_click=NC,
                             num_cand=NCAND, seq_len=S, nhead=NHEAD)
    return pl.pallas_call(
        kern,
        out_shape=jax.ShapeDtypeStruct((U, NCAND), jnp.float32),
        in_specs=[pl.BlockSpec(memory_space=pltpu.MemorySpace.VMEM),   # token ids
                  pl.BlockSpec(memory_space=pltpu.MemorySpace.VMEM)],  # packed weight slab
        out_specs=pl.BlockSpec(memory_space=pltpu.MemorySpace.VMEM),
    )(ids, slab)


# ----------------------------- param packing -------------------------------
def init_params(key):
    """Random init of all NRMS weights, packed into one [SLAB_ROWS, 128] slab.

    All weight matrices are stored PRE-TRANSPOSED ([in, out]) so the kernel
    computes y = x @ W with no in-kernel transposes.
    """
    ks = jax.random.split(key, 19)
    s = 0.1

    def rnd(i, shape):
        return s * jax.random.normal(ks[i], shape, jnp.float32)

    rows = {
        EMB_R:             rnd(0, (VOCAB, EMBED)),        # embedding table
        DQKV_R:            rnd(1, (EMBED, 3 * EMBED)),    # doc MHA in_proj W
        DWO_R:             rnd(3, (EMBED, EMBED)),        # doc MHA out_proj W
        DPW_R:             rnd(5, (EMBED, ENC)),          # doc Linear W
        DAW1_R:            rnd(7, (ENC, VSIZE)),          # doc additive-attn W1
        UQKV_R:            rnd(11, (ENC, 3 * ENC)),       # user MHA in_proj W
        UWO_R:             rnd(13, (ENC, ENC)),           # user MHA out_proj W
        UAW1_R:            rnd(15, (ENC, VSIZE)),         # user additive-attn W1
        BIAS_R + B_DQKV:   rnd(2, (1, 3 * EMBED)),
        BIAS_R + B_DO:     rnd(4, (1, EMBED)),
        BIAS_R + B_DP:     rnd(6, (1, ENC)),
        BIAS_R + B_DA1:    rnd(8, (1, VSIZE)),
        BIAS_R + B_DA2W:   rnd(9, (1, VSIZE)),            # additive-attn v (doc)
        BIAS_R + B_DA2B:   rnd(10, (1, 1)),
        BIAS_R + B_UQKV:   rnd(12, (1, 3 * ENC)),
        BIAS_R + B_UO:     rnd(14, (1, ENC)),
        BIAS_R + B_UA1:    rnd(16, (1, VSIZE)),
        BIAS_R + B_UA2W:   rnd(17, (1, VSIZE)),           # additive-attn v (user)
        BIAS_R + B_UA2B:   rnd(18, (1, 1)),
    }
    slab = jnp.zeros((SLAB_ROWS, SLAB_COLS), jnp.float32)
    for r, w in rows.items():
        slab = slab.at[r:r + w.shape[0], 0:w.shape[1]].set(w)
    return slab


if __name__ == "__main__":
    key = jax.random.PRNGKey(0)
    pkey, ckey, dkey = jax.random.split(key, 3)
    slab = init_params(pkey)
    clicks = jax.random.randint(ckey, (2, 4, 8), 0, VOCAB, dtype=jnp.int32)  # [num_user, num_click_docs, seq_len]
    cands = jax.random.randint(dkey, (2, 3, 8), 0, VOCAB, dtype=jnp.int32)   # [num_user, num_cand_docs, seq_len]

    nrms = jax.jit(nrms_forward)
    scores = jax.block_until_ready(nrms(clicks, cands, slab))
    assert scores.shape == (2, 3), scores.shape
    assert bool(jnp.all(jnp.isfinite(scores)))
    assert bool(jnp.all((scores >= 0.0) & (scores <= 1.0)))
    print("KERNEL_OK")
</pallas_src>

<mosaic_0001>
module attributes {stable_mosaic.version = 11 : i64} {
  func.func @nrms_kernel(%arg0: memref<112x1xi32, #tpu.memory_space<vmem>>, %arg1: memref<296x128xf32, #tpu.memory_space<vmem>>, %arg2: memref<2x3xf32, #tpu.memory_space<vmem>>) attributes {dimension_semantics = [], scalar_prefetch = 0 : i64, scratch_operands = 0 : i64, tpu.core_type = #tpu.core_type<tc>} {
    %c0 = arith.constant 0 : index
    %c0_0 = arith.constant 0 : index
    %0 = vector.load %arg1[%c0, %c0_0] : memref<296x128xf32, #tpu.memory_space<vmem>>, vector<56x32xf32>
    %c56 = arith.constant 56 : index
    %c0_1 = arith.constant 0 : index
    %1 = vector.load %arg1[%c56, %c0_1] : memref<296x128xf32, #tpu.memory_space<vmem>>, vector<32x96xf32>
    %c88 = arith.constant 88 : index
    %c0_2 = arith.constant 0 : index
    %2 = vector.load %arg1[%c88, %c0_2] : memref<296x128xf32, #tpu.memory_space<vmem>>, vector<32x32xf32>
    %c120 = arith.constant 120 : index
    %c0_3 = arith.constant 0 : index
    %3 = vector.load %arg1[%c120, %c0_3] : memref<296x128xf32, #tpu.memory_space<vmem>>, vector<32x32xf32>
    %c152 = arith.constant 152 : index
    %c0_4 = arith.constant 0 : index
    %4 = vector.load %arg1[%c152, %c0_4] : memref<296x128xf32, #tpu.memory_space<vmem>>, vector<32x16xf32>
    %c184 = arith.constant 184 : index
    %c0_5 = arith.constant 0 : index
    %5 = vector.load %arg1[%c184, %c0_5] : memref<296x128xf32, #tpu.memory_space<vmem>>, vector<32x96xf32>
    %c216 = arith.constant 216 : index
    %c0_6 = arith.constant 0 : index
    %6 = vector.load %arg1[%c216, %c0_6] : memref<296x128xf32, #tpu.memory_space<vmem>>, vector<32x32xf32>
    %c248 = arith.constant 248 : index
    %c0_7 = arith.constant 0 : index
    %7 = vector.load %arg1[%c248, %c0_7] : memref<296x128xf32, #tpu.memory_space<vmem>>, vector<32x16xf32>
    %c280 = arith.constant 280 : index
    %c0_8 = arith.constant 0 : index
    %8 = vector.load %arg1[%c280, %c0_8] : memref<296x128xf32, #tpu.memory_space<vmem>>, vector<16x128xf32>
    %9 = vector.extract_strided_slice %8 {offsets = [0, 0], sizes = [1, 96], strides = [1, 1]} : vector<16x128xf32> to vector<1x96xf32>
    %10 = vector.extract_strided_slice %8 {offsets = [1, 0], sizes = [1, 32], strides = [1, 1]} : vector<16x128xf32> to vector<1x32xf32>
    %11 = vector.extract_strided_slice %8 {offsets = [2, 0], sizes = [1, 32], strides = [1, 1]} : vector<16x128xf32> to vector<1x32xf32>
    %12 = vector.extract_strided_slice %8 {offsets = [3, 0], sizes = [1, 16], strides = [1, 1]} : vector<16x128xf32> to vector<1x16xf32>
    %13 = vector.extract_strided_slice %8 {offsets = [4, 0], sizes = [1, 16], strides = [1, 1]} : vector<16x128xf32> to vector<1x16xf32>
    %14 = vector.extract_strided_slice %8 {offsets = [5, 0], sizes = [1, 1], strides = [1, 1]} : vector<16x128xf32> to vector<1x1xf32>
    %15 = vector.extract_strided_slice %8 {offsets = [6, 0], sizes = [1, 96], strides = [1, 1]} : vector<16x128xf32> to vector<1x96xf32>
    %16 = vector.extract_strided_slice %8 {offsets = [7, 0], sizes = [1, 32], strides = [1, 1]} : vector<16x128xf32> to vector<1x32xf32>
    %17 = vector.extract_strided_slice %8 {offsets = [8, 0], sizes = [1, 16], strides = [1, 1]} : vector<16x128xf32> to vector<1x16xf32>
    %18 = vector.extract_strided_slice %8 {offsets = [9, 0], sizes = [1, 16], strides = [1, 1]} : vector<16x128xf32> to vector<1x16xf32>
    %19 = vector.extract_strided_slice %8 {offsets = [10, 0], sizes = [1, 1], strides = [1, 1]} : vector<16x128xf32> to vector<1x1xf32>
    %c0_9 = arith.constant 0 : index
    %c0_10 = arith.constant 0 : index
    %20 = vector.load %arg0[%c0_9, %c0_10] : memref<112x1xi32, #tpu.memory_space<vmem>>, vector<112x1xi32>
    %21 = tpu.iota {dimensions = array<i32: 1>} : vector<112x56xi32>
    %22 = vector.broadcast %20 : vector<112x1xi32> to vector<112x56xi32>
    %23 = arith.cmpi eq, %21, %22 : vector<112x56xi32>
    %24 = arith.extui %23 : vector<112x56xi1> to vector<112x56xi32>
    %25 = arith.sitofp %24 : vector<112x56xi32> to vector<112x56xf32>
    %cst = arith.constant dense<0.000000e+00> : vector<112x32xf32>
    %26 = tpu.matmul %25, %0, %cst {dimension_numbers = #tpu.dot_dimension_numbers<[1], [0], [0], [1], [0, 0, 1, 1], [], []>} : vector<112x56xf32>, vector<56x32xf32>, vector<112x32xf32> -> vector<112x32xf32>
    %cst_11 = arith.constant dense<0.000000e+00> : vector<112x96xf32>
    %27 = tpu.matmul %26, %1, %cst_11 {dimension_numbers = #tpu.dot_dimension_numbers<[1], [0], [0], [1], [0, 0, 1, 1], [], []>} : vector<112x32xf32>, vector<32x96xf32>, vector<112x96xf32> -> vector<112x96xf32>
    %28 = vector.broadcast %9 : vector<1x96xf32> to vector<112x96xf32>
    %29 = arith.addf %27, %28 : vector<112x96xf32>
    %30 = vector.extract_strided_slice %29 {offsets = [0, 0], sizes = [112, 32], strides = [1, 1]} : vector<112x96xf32> to vector<112x32xf32>
    %31 = vector.shape_cast %30 : vector<112x32xf32> to vector<14x8x32xf32>
    %32 = vector.extract_strided_slice %29 {offsets = [0, 32], sizes = [112, 32], strides = [1, 1]} : vector<112x96xf32> to vector<112x32xf32>
    %33 = vector.shape_cast %32 : vector<112x32xf32> to vector<14x8x32xf32>
    %34 = vector.extract_strided_slice %29 {offsets = [0, 64], sizes = [112, 32], strides = [1, 1]} : vector<112x96xf32> to vector<112x32xf32>
    %35 = vector.shape_cast %34 : vector<112x32xf32> to vector<14x8x32xf32>
    %36 = vector.extract_strided_slice %31 {offsets = [0, 0, 0], sizes = [14, 8, 8], strides = [1, 1, 1]} : vector<14x8x32xf32> to vector<14x8x8xf32>
    %cst_12 = arith.constant 0.353553385 : f32
    %37 = vector.broadcast %cst_12 : f32 to vector<14x8x8xf32>
    %38 = arith.mulf %36, %37 : vector<14x8x8xf32>
    %39 = vector.extract_strided_slice %33 {offsets = [0, 0, 0], sizes = [14, 8, 8], strides = [1, 1, 1]} : vector<14x8x32xf32> to vector<14x8x8xf32>
    %40 = vector.extract_strided_slice %35 {offsets = [0, 0, 0], sizes = [14, 8, 8], strides = [1, 1, 1]} : vector<14x8x32xf32> to vector<14x8x8xf32>
    "tpu.trace_start"() <{level = 10 : i32, message = "bqd,bkd->bqk"}> : () -> ()
    %cst_13 = arith.constant dense<0.000000e+00> : vector<14x8x8xf32>
    %41 = tpu.matmul %38, %39, %cst_13 {dimension_numbers = #tpu.dot_dimension_numbers<[2], [2], [1], [1], [0, 0, 0, 1, 1, 1], [0], [0]>} : vector<14x8x8xf32>, vector<14x8x8xf32>, vector<14x8x8xf32> -> vector<14x8x8xf32>
    "tpu.trace_stop"() : () -> ()
    %cst_14 = arith.constant dense<0xFF800000> : vector<14x8xf32>
    %42 = vector.multi_reduction <maximumf>, %41, %cst_14 [2] : vector<14x8x8xf32> to vector<14x8xf32>
    %43 = vector.shape_cast %42 : vector<14x8xf32> to vector<14x8x1xf32>
    %44 = vector.broadcast %43 : vector<14x8x1xf32> to vector<14x8x8xf32>
    %45 = arith.subf %41, %44 : vector<14x8x8xf32>
    %46 = math.exp %45 : vector<14x8x8xf32>
    %cst_15 = arith.constant dense<0.000000e+00> : vector<14x8xf32>
    %47 = vector.multi_reduction <add>, %46, %cst_15 [2] : vector<14x8x8xf32> to vector<14x8xf32>
    %48 = vector.shape_cast %47 : vector<14x8xf32> to vector<14x8x1xf32>
    %49 = tpu.reciprocal %48 {approx = true} : vector<14x8x1xf32> -> vector<14x8x1xf32>
    %50 = vector.broadcast %49 : vector<14x8x1xf32> to vector<14x8x8xf32>
    %51 = arith.mulf %46, %50 : vector<14x8x8xf32>
    "tpu.trace_start"() <{level = 10 : i32, message = "bqk,bkd->bqd"}> : () -> ()
    %cst_16 = arith.constant dense<0.000000e+00> : vector<14x8x8xf32>
    %52 = tpu.matmul %51, %40, %cst_16 {dimension_numbers = #tpu.dot_dimension_numbers<[2], [1], [1], [2], [0, 0, 0, 1, 1, 2], [0], [0]>} : vector<14x8x8xf32>, vector<14x8x8xf32>, vector<14x8x8xf32> -> vector<14x8x8xf32>
    "tpu.trace_stop"() : () -> ()
    %53 = vector.extract_strided_slice %31 {offsets = [0, 0, 8], sizes = [14, 8, 8], strides = [1, 1, 1]} : vector<14x8x32xf32> to vector<14x8x8xf32>
    %cst_17 = arith.constant 0.353553385 : f32
    %54 = vector.broadcast %cst_17 : f32 to vector<14x8x8xf32>
    %55 = arith.mulf %53, %54 : vector<14x8x8xf32>
    %56 = vector.extract_strided_slice %33 {offsets = [0, 0, 8], sizes = [14, 8, 8], strides = [1, 1, 1]} : vector<14x8x32xf32> to vector<14x8x8xf32>
    %57 = vector.extract_strided_slice %35 {offsets = [0, 0, 8], sizes = [14, 8, 8], strides = [1, 1, 1]} : vector<14x8x32xf32> to vector<14x8x8xf32>
    "tpu.trace_start"() <{level = 10 : i32, message = "bqd,bkd->bqk"}> : () -> ()
    %cst_18 = arith.constant dense<0.000000e+00> : vector<14x8x8xf32>
    %58 = tpu.matmul %55, %56, %cst_18 {dimension_numbers = #tpu.dot_dimension_numbers<[2], [2], [1], [1], [0, 0, 0, 1, 1, 1], [0], [0]>} : vector<14x8x8xf32>, vector<14x8x8xf32>, vector<14x8x8xf32> -> vector<14x8x8xf32>
    "tpu.trace_stop"() : () -> ()
    %cst_19 = arith.constant dense<0xFF800000> : vector<14x8xf32>
    %59 = vector.multi_reduction <maximumf>, %58, %cst_19 [2] : vector<14x8x8xf32> to vector<14x8xf32>
    %60 = vector.shape_cast %59 : vector<14x8xf32> to vector<14x8x1xf32>
    %61 = vector.broadcast %60 : vector<14x8x1xf32> to vector<14x8x8xf32>
    %62 = arith.subf %58, %61 : vector<14x8x8xf32>
    %63 = math.exp %62 : vector<14x8x8xf32>
    %cst_20 = arith.constant dense<0.000000e+00> : vector<14x8xf32>
    %64 = vector.multi_reduction <add>, %63, %cst_20 [2] : vector<14x8x8xf32> to vector<14x8xf32>
    %65 = vector.shape_cast %64 : vector<14x8xf32> to vector<14x8x1xf32>
    %66 = tpu.reciprocal %65 {approx = true} : vector<14x8x1xf32> -> vector<14x8x1xf32>
    %67 = vector.broadcast %66 : vector<14x8x1xf32> to vector<14x8x8xf32>
    %68 = arith.mulf %63, %67 : vector<14x8x8xf32>
    "tpu.trace_start"() <{level = 10 : i32, message = "bqk,bkd->bqd"}> : () -> ()
    %cst_21 = arith.constant dense<0.000000e+00> : vector<14x8x8xf32>
    %69 = tpu.matmul %68, %57, %cst_21 {dimension_numbers = #tpu.dot_dimension_numbers<[2], [1], [1], [2], [0, 0, 0, 1, 1, 2], [0], [0]>} : vector<14x8x8xf32>, vector<14x8x8xf32>, vector<14x8x8xf32> -> vector<14x8x8xf32>
    "tpu.trace_stop"() : () -> ()
    %70 = vector.extract_strided_slice %31 {offsets = [0, 0, 16], sizes = [14, 8, 8], strides = [1, 1, 1]} : vector<14x8x32xf32> to vector<14x8x8xf32>
    %cst_22 = arith.constant 0.353553385 : f32
    %71 = vector.broadcast %cst_22 : f32 to vector<14x8x8xf32>
    %72 = arith.mulf %70, %71 : vector<14x8x8xf32>
    %73 = vector.extract_strided_slice %33 {offsets = [0, 0, 16], sizes = [14, 8, 8], strides = [1, 1, 1]} : vector<14x8x32xf32> to vector<14x8x8xf32>
    %74 = vector.extract_strided_slice %35 {offsets = [0, 0, 16], sizes = [14, 8, 8], strides = [1, 1, 1]} : vector<14x8x32xf32> to vector<14x8x8xf32>
    "tpu.trace_start"() <{level = 10 : i32, message = "bqd,bkd->bqk"}> : () -> ()
    %cst_23 = arith.constant dense<0.000000e+00> : vector<14x8x8xf32>
    %75 = tpu.matmul %72, %73, %cst_23 {dimension_numbers = #tpu.dot_dimension_numbers<[2], [2], [1], [1], [0, 0, 0, 1, 1, 1], [0], [0]>} : vector<14x8x8xf32>, vector<14x8x8xf32>, vector<14x8x8xf32> -> vector<14x8x8xf32>
    "tpu.trace_stop"() : () -> ()
    %cst_24 = arith.constant dense<0xFF800000> : vector<14x8xf32>
    %76 = vector.multi_reduction <maximumf>, %75, %cst_24 [2] : vector<14x8x8xf32> to vector<14x8xf32>
    %77 = vector.shape_cast %76 : vector<14x8xf32> to vector<14x8x1xf32>
    %78 = vector.broadcast %77 : vector<14x8x1xf32> to vector<14x8x8xf32>
    %79 = arith.subf %75, %78 : vector<14x8x8xf32>
    %80 = math.exp %79 : vector<14x8x8xf32>
    %cst_25 = arith.constant dense<0.000000e+00> : vector<14x8xf32>
    %81 = vector.multi_reduction <add>, %80, %cst_25 [2] : vector<14x8x8xf32> to vector<14x8xf32>
    %82 = vector.shape_cast %81 : vector<14x8xf32> to vector<14x8x1xf32>
    %83 = tpu.reciprocal %82 {approx = true} : vector<14x8x1xf32> -> vector<14x8x1xf32>
    %84 = vector.broadcast %83 : vector<14x8x1xf32> to vector<14x8x8xf32>
    %85 = arith.mulf %80, %84 : vector<14x8x8xf32>
    "tpu.trace_start"() <{level = 10 : i32, message = "bqk,bkd->bqd"}> : () -> ()
    %cst_26 = arith.constant dense<0.000000e+00> : vector<14x8x8xf32>
    %86 = tpu.matmul %85, %74, %cst_26 {dimension_numbers = #tpu.dot_dimension_numbers<[2], [1], [1], [2], [0, 0, 0, 1, 1, 2], [0], [0]>} : vector<14x8x8xf32>, vector<14x8x8xf32>, vector<14x8x8xf32> -> vector<14x8x8xf32>
    "tpu.trace_stop"() : () -> ()
    %87 = vector.extract_strided_slice %31 {offsets = [0, 0, 24], sizes = [14, 8, 8], strides = [1, 1, 1]} : vector<14x8x32xf32> to vector<14x8x8xf32>
    %cst_27 = arith.constant 0.353553385 : f32
    %88 = vector.broadcast %cst_27 : f32 to vector<14x8x8xf32>
    %89 = arith.mulf %87, %88 : vector<14x8x8xf32>
    %90 = vector.extract_strided_slice %33 {offsets = [0, 0, 24], sizes = [14, 8, 8], strides = [1, 1, 1]} : vector<14x8x32xf32> to vector<14x8x8xf32>
    %91 = vector.extract_strided_slice %35 {offsets = [0, 0, 24], sizes = [14, 8, 8], strides = [1, 1, 1]} : vector<14x8x32xf32> to vector<14x8x8xf32>
    "tpu.trace_start"() <{level = 10 : i32, message = "bqd,bkd->bqk"}> : () -> ()
    %cst_28 = arith.constant dense<0.000000e+00> : vector<14x8x8xf32>
    %92 = tpu.matmul %89, %90, %cst_28 {dimension_numbers = #tpu.dot_dimension_numbers<[2], [2], [1], [1], [0, 0, 0, 1, 1, 1], [0], [0]>} : vector<14x8x8xf32>, vector<14x8x8xf32>, vector<14x8x8xf32> -> vector<14x8x8xf32>
    "tpu.trace_stop"() : () -> ()
    %cst_29 = arith.constant dense<0xFF800000> : vector<14x8xf32>
    %93 = vector.multi_reduction <maximumf>, %92, %cst_29 [2] : vector<14x8x8xf32> to vector<14x8xf32>
    %94 = vector.shape_cast %93 : vector<14x8xf32> to vector<14x8x1xf32>
    %95 = vector.broadcast %94 : vector<14x8x1xf32> to vector<14x8x8xf32>
    %96 = arith.subf %92, %95 : vector<14x8x8xf32>
    %97 = math.exp %96 : vector<14x8x8xf32>
    %cst_30 = arith.constant dense<0.000000e+00> : vector<14x8xf32>
    %98 = vector.multi_reduction <add>, %97, %cst_30 [2] : vector<14x8x8xf32> to vector<14x8xf32>
    %99 = vector.shape_cast %98 : vector<14x8xf32> to vector<14x8x1xf32>
    %100 = tpu.reciprocal %99 {approx = true} : vector<14x8x1xf32> -> vector<14x8x1xf32>
    %101 = vector.broadcast %100 : vector<14x8x1xf32> to vector<14x8x8xf32>
    %102 = arith.mulf %97, %101 : vector<14x8x8xf32>
    "tpu.trace_start"() <{level = 10 : i32, message = "bqk,bkd->bqd"}> : () -> ()
    %cst_31 = arith.constant dense<0.000000e+00> : vector<14x8x8xf32>
    %103 = tpu.matmul %102, %91, %cst_31 {dimension_numbers = #tpu.dot_dimension_numbers<[2], [1], [1], [2], [0, 0, 0, 1, 1, 2], [0], [0]>} : vector<14x8x8xf32>, vector<14x8x8xf32>, vector<14x8x8xf32> -> vector<14x8x8xf32>
    "tpu.trace_stop"() : () -> ()
    %104 = tpu.concatenate %52, %69, %86, %103 in 2 : vector<14x8x8xf32>, vector<14x8x8xf32>, vector<14x8x8xf32>, vector<14x8x8xf32> -> vector<14x8x32xf32>
    %105 = vector.shape_cast %104 : vector<14x8x32xf32> to vector<112x32xf32>
    %cst_32 = arith.constant dense<0.000000e+00> : vector<112x32xf32>
    %106 = tpu.matmul %105, %2, %cst_32 {dimension_numbers = #tpu.dot_dimension_numbers<[1], [0], [0], [1], [0, 0, 1, 1], [], []>} : vector<112x32xf32>, vector<32x32xf32>, vector<112x32xf32> -> vector<112x32xf32>
    %107 = vector.broadcast %10 : vector<1x32xf32> to vector<112x32xf32>
    %108 = arith.addf %106, %107 : vector<112x32xf32>
    %cst_33 = arith.constant dense<0.000000e+00> : vector<112x32xf32>
    %109 = tpu.matmul %108, %3, %cst_33 {dimension_numbers = #tpu.dot_dimension_numbers<[1], [0], [0], [1], [0, 0, 1, 1], [], []>} : vector<112x32xf32>, vector<32x32xf32>, vector<112x32xf32> -> vector<112x32xf32>
    %110 = vector.broadcast %11 : vector<1x32xf32> to vector<112x32xf32>
    %111 = arith.addf %109, %110 : vector<112x32xf32>
    %cst_34 = arith.constant dense<0.000000e+00> : vector<112x16xf32>
    %112 = tpu.matmul %111, %4, %cst_34 {dimension_numbers = #tpu.dot_dimension_numbers<[1], [0], [0], [1], [0, 0, 1, 1], [], []>} : vector<112x32xf32>, vector<32x16xf32>, vector<112x16xf32> -> vector<112x16xf32>
    %113 = vector.broadcast %12 : vector<1x16xf32> to vector<112x16xf32>
    %114 = arith.addf %112, %113 : vector<112x16xf32>
    %115 = math.tanh %114 : vector<112x16xf32>
    %116 = vector.broadcast %13 : vector<1x16xf32> to vector<112x16xf32>
    %117 = arith.mulf %115, %116 : vector<112x16xf32>
    %cst_35 = arith.constant dense<0.000000e+00> : vector<112xf32>
    %118 = vector.multi_reduction <add>, %117, %cst_35 [1] : vector<112x16xf32> to vector<112xf32>
    %119 = vector.shape_cast %118 : vector<112xf32> to vector<112x1xf32>
    %120 = vector.broadcast %14 : vector<1x1xf32> to vector<112x1xf32>
    %121 = arith.addf %119, %120 : vector<112x1xf32>
    %122 = vector.shape_cast %121 : vector<112x1xf32> to vector<14x8x1xf32>
    %cst_36 = arith.constant dense<0xFF800000> : vector<14x1xf32>
    %123 = vector.multi_reduction <maximumf>, %122, %cst_36 [1] : vector<14x8x1xf32> to vector<14x1xf32>
    %124 = vector.shape_cast %123 : vector<14x1xf32> to vector<14x1x1xf32>
    %125 = vector.broadcast %124 : vector<14x1x1xf32> to vector<14x8x1xf32>
    %126 = arith.subf %122, %125 : vector<14x8x1xf32>
    %127 = math.exp %126 : vector<14x8x1xf32>
    %cst_37 = arith.constant dense<0.000000e+00> : vector<14x1xf32>
    %128 = vector.multi_reduction <add>, %127, %cst_37 [1] : vector<14x8x1xf32> to vector<14x1xf32>
    %129 = vector.shape_cast %128 : vector<14x1xf32> to vector<14x1x1xf32>
    %130 = tpu.reciprocal %129 {approx = true} : vector<14x1x1xf32> -> vector<14x1x1xf32>
    %131 = vector.broadcast %130 : vector<14x1x1xf32> to vector<14x8x1xf32>
    %132 = arith.mulf %127, %131 : vector<14x8x1xf32>
    %133 = vector.shape_cast %111 : vector<112x32xf32> to vector<14x8x32xf32>
    %134 = vector.broadcast %132 : vector<14x8x1xf32> to vector<14x8x32xf32>
    %135 = arith.mulf %134, %133 : vector<14x8x32xf32>
    %cst_38 = arith.constant dense<0.000000e+00> : vector<14x32xf32>
    %136 = vector.multi_reduction <add>, %135, %cst_38 [1] : vector<14x8x32xf32> to vector<14x32xf32>
    %137 = vector.extract_strided_slice %136 {offsets = [0, 0], sizes = [8, 32], strides = [1, 1]} : vector<14x32xf32> to vector<8x32xf32>
    %138 = vector.extract_strided_slice %136 {offsets = [8, 0], sizes = [6, 32], strides = [1, 1]} : vector<14x32xf32> to vector<6x32xf32>
    %139 = vector.shape_cast %138 : vector<6x32xf32> to vector<2x3x32xf32>
    %cst_39 = arith.constant dense<0.000000e+00> : vector<8x96xf32>
    %140 = tpu.matmul %137, %5, %cst_39 {dimension_numbers = #tpu.dot_dimension_numbers<[1], [0], [0], [1], [0, 0, 1, 1], [], []>} : vector<8x32xf32>, vector<32x96xf32>, vector<8x96xf32> -> vector<8x96xf32>
    %141 = vector.broadcast %15 : vector<1x96xf32> to vector<8x96xf32>
    %142 = arith.addf %140, %141 : vector<8x96xf32>
    %143 = vector.extract_strided_slice %142 {offsets = [0, 0], sizes = [8, 32], strides = [1, 1]} : vector<8x96xf32> to vector<8x32xf32>
    %144 = vector.shape_cast %143 : vector<8x32xf32> to vector<2x4x32xf32>
    %145 = vector.extract_strided_slice %142 {offsets = [0, 32], sizes = [8, 32], strides = [1, 1]} : vector<8x96xf32> to vector<8x32xf32>
    %146 = vector.shape_cast %145 : vector<8x32xf32> to vector<2x4x32xf32>
    %147 = vector.extract_strided_slice %142 {offsets = [0, 64], sizes = [8, 32], strides = [1, 1]} : vector<8x96xf32> to vector<8x32xf32>
    %148 = vector.shape_cast %147 : vector<8x32xf32> to vector<2x4x32xf32>
    %149 = vector.extract_strided_slice %144 {offsets = [0, 0, 0], sizes = [2, 4, 8], strides = [1, 1, 1]} : vector<2x4x32xf32> to vector<2x4x8xf32>
    %cst_40 = arith.constant 0.353553385 : f32
    %150 = vector.broadcast %cst_40 : f32 to vector<2x4x8xf32>
    %151 = arith.mulf %149, %150 : vector<2x4x8xf32>
    %152 = vector.extract_strided_slice %146 {offsets = [0, 0, 0], sizes = [2, 4, 8], strides = [1, 1, 1]} : vector<2x4x32xf32> to vector<2x4x8xf32>
    %153 = vector.extract_strided_slice %148 {offsets = [0, 0, 0], sizes = [2, 4, 8], strides = [1, 1, 1]} : vector<2x4x32xf32> to vector<2x4x8xf32>
    "tpu.trace_start"() <{level = 10 : i32, message = "bqd,bkd->bqk"}> : () -> ()
    %cst_41 = arith.constant dense<0.000000e+00> : vector<2x4x4xf32>
    %154 = tpu.matmul %151, %152, %cst_41 {dimension_numbers = #tpu.dot_dimension_numbers<[2], [2], [1], [1], [0, 0, 0, 1, 1, 1], [0], [0]>} : vector<2x4x8xf32>, vector<2x4x8xf32>, vector<2x4x4xf32> -> vector<2x4x4xf32>
    "tpu.trace_stop"() : () -> ()
    %cst_42 = arith.constant dense<0xFF800000> : vector<2x4xf32>
    %155 = vector.multi_reduction <maximumf>, %154, %cst_42 [2] : vector<2x4x4xf32> to vector<2x4xf32>
    %156 = vector.shape_cast %155 : vector<2x4xf32> to vector<2x4x1xf32>
    %157 = vector.broadcast %156 : vector<2x4x1xf32> to vector<2x4x4xf32>
    %158 = arith.subf %154, %157 : vector<2x4x4xf32>
    %159 = math.exp %158 : vector<2x4x4xf32>
    %cst_43 = arith.constant dense<0.000000e+00> : vector<2x4xf32>
    %160 = vector.multi_reduction <add>, %159, %cst_43 [2] : vector<2x4x4xf32> to vector<2x4xf32>
    %161 = vector.shape_cast %160 : vector<2x4xf32> to vector<2x4x1xf32>
    %162 = tpu.reciprocal %161 {approx = true} : vector<2x4x1xf32> -> vector<2x4x1xf32>
    %163 = vector.broadcast %162 : vector<2x4x1xf32> to vector<2x4x4xf32>
    %164 = arith.mulf %159, %163 : vector<2x4x4xf32>
    "tpu.trace_start"() <{level = 10 : i32, message = "bqk,bkd->bqd"}> : () -> ()
    %cst_44 = arith.constant dense<0.000000e+00> : vector<2x4x8xf32>
    %165 = tpu.matmul %164, %153, %cst_44 {dimension_numbers = #tpu.dot_dimension_numbers<[2], [1], [1], [2], [0, 0, 0, 1, 1, 2], [0], [0]>} : vector<2x4x4xf32>, vector<2x4x8xf32>, vector<2x4x8xf32> -> vector<2x4x8xf32>
    "tpu.trace_stop"() : () -> ()
    %166 = vector.extract_strided_slice %144 {offsets = [0, 0, 8], sizes = [2, 4, 8], strides = [1, 1, 1]} : vector<2x4x32xf32> to vector<2x4x8xf32>
    %cst_45 = arith.constant 0.353553385 : f32
    %167 = vector.broadcast %cst_45 : f32 to vector<2x4x8xf32>
    %168 = arith.mulf %166, %167 : vector<2x4x8xf32>
    %169 = vector.extract_strided_slice %146 {offsets = [0, 0, 8], sizes = [2, 4, 8], strides = [1, 1, 1]} : vector<2x4x32xf32> to vector<2x4x8xf32>
    %170 = vector.extract_strided_slice %148 {offsets = [0, 0, 8], sizes = [2, 4, 8], strides = [1, 1, 1]} : vector<2x4x32xf32> to vector<2x4x8xf32>
    "tpu.trace_start"() <{level = 10 : i32, message = "bqd,bkd->bqk"}> : () -> ()
    %cst_46 = arith.constant dense<0.000000e+00> : vector<2x4x4xf32>
    %171 = tpu.matmul %168, %169, %cst_46 {dimension_numbers = #tpu.dot_dimension_numbers<[2], [2], [1], [1], [0, 0, 0, 1, 1, 1], [0], [0]>} : vector<2x4x8xf32>, vector<2x4x8xf32>, vector<2x4x4xf32> -> vector<2x4x4xf32>
    "tpu.trace_stop"() : () -> ()
    %cst_47 = arith.constant dense<0xFF800000> : vector<2x4xf32>
    %172 = vector.multi_reduction <maximumf>, %171, %cst_47 [2] : vector<2x4x4xf32> to vector<2x4xf32>
    %173 = vector.shape_cast %172 : vector<2x4xf32> to vector<2x4x1xf32>
    %174 = vector.broadcast %173 : vector<2x4x1xf32> to vector<2x4x4xf32>
    %175 = arith.subf %171, %174 : vector<2x4x4xf32>
    %176 = math.exp %175 : vector<2x4x4xf32>
    %cst_48 = arith.constant dense<0.000000e+00> : vector<2x4xf32>
    %177 = vector.multi_reduction <add>, %176, %cst_48 [2] : vector<2x4x4xf32> to vector<2x4xf32>
    %178 = vector.shape_cast %177 : vector<2x4xf32> to vector<2x4x1xf32>
    %179 = tpu.reciprocal %178 {approx = true} : vector<2x4x1xf32> -> vector<2x4x1xf32>
    %180 = vector.broadcast %179 : vector<2x4x1xf32> to vector<2x4x4xf32>
    %181 = arith.mulf %176, %180 : vector<2x4x4xf32>
    "tpu.trace_start"() <{level = 10 : i32, message = "bqk,bkd->bqd"}> : () -> ()
    %cst_49 = arith.constant dense<0.000000e+00> : vector<2x4x8xf32>
    %182 = tpu.matmul %181, %170, %cst_49 {dimension_numbers = #tpu.dot_dimension_numbers<[2], [1], [1], [2], [0, 0, 0, 1, 1, 2], [0], [0]>} : vector<2x4x4xf32>, vector<2x4x8xf32>, vector<2x4x8xf32> -> vector<2x4x8xf32>
    "tpu.trace_stop"() : () -> ()
    %183 = vector.extract_strided_slice %144 {offsets = [0, 0, 16], sizes = [2, 4, 8], strides = [1, 1, 1]} : vector<2x4x32xf32> to vector<2x4x8xf32>
    %cst_50 = arith.constant 0.353553385 : f32
    %184 = vector.broadcast %cst_50 : f32 to vector<2x4x8xf32>
    %185 = arith.mulf %183, %184 : vector<2x4x8xf32>
    %186 = vector.extract_strided_slice %146 {offsets = [0, 0, 16], sizes = [2, 4, 8], strides = [1, 1, 1]} : vector<2x4x32xf32> to vector<2x4x8xf32>
    %187 = vector.extract_strided_slice %148 {offsets = [0, 0, 16], sizes = [2, 4, 8], strides = [1, 1, 1]} : vector<2x4x32xf32> to vector<2x4x8xf32>
    "tpu.trace_start"() <{level = 10 : i32, message = "bqd,bkd->bqk"}> : () -> ()
    %cst_51 = arith.constant dense<0.000000e+00> : vector<2x4x4xf32>
    %188 = tpu.matmul %185, %186, %cst_51 {dimension_numbers = #tpu.dot_dimension_numbers<[2], [2], [1], [1], [0, 0, 0, 1, 1, 1], [0], [0]>} : vector<2x4x8xf32>, vector<2x4x8xf32>, vector<2x4x4xf32> -> vector<2x4x4xf32>
    "tpu.trace_stop"() : () -> ()
    %cst_52 = arith.constant dense<0xFF800000> : vector<2x4xf32>
    %189 = vector.multi_reduction <maximumf>, %188, %cst_52 [2] : vector<2x4x4xf32> to vector<2x4xf32>
    %190 = vector.shape_cast %189 : vector<2x4xf32> to vector<2x4x1xf32>
    %191 = vector.broadcast %190 : vector<2x4x1xf32> to vector<2x4x4xf32>
    %192 = arith.subf %188, %191 : vector<2x4x4xf32>
    %193 = math.exp %192 : vector<2x4x4xf32>
    %cst_53 = arith.constant dense<0.000000e+00> : vector<2x4xf32>
    %194 = vector.multi_reduction <add>, %193, %cst_53 [2] : vector<2x4x4xf32> to vector<2x4xf32>
    %195 = vector.shape_cast %194 : vector<2x4xf32> to vector<2x4x1xf32>
    %196 = tpu.reciprocal %195 {approx = true} : vector<2x4x1xf32> -> vector<2x4x1xf32>
    %197 = vector.broadcast %196 : vector<2x4x1xf32> to vector<2x4x4xf32>
    %198 = arith.mulf %193, %197 : vector<2x4x4xf32>
    "tpu.trace_start"() <{level = 10 : i32, message = "bqk,bkd->bqd"}> : () -> ()
    %cst_54 = arith.constant dense<0.000000e+00> : vector<2x4x8xf32>
    %199 = tpu.matmul %198, %187, %cst_54 {dimension_numbers = #tpu.dot_dimension_numbers<[2], [1], [1], [2], [0, 0, 0, 1, 1, 2], [0], [0]>} : vector<2x4x4xf32>, vector<2x4x8xf32>, vector<2x4x8xf32> -> vector<2x4x8xf32>
    "tpu.trace_stop"() : () -> ()
    %200 = vector.extract_strided_slice %144 {offsets = [0, 0, 24], sizes = [2, 4, 8], strides = [1, 1, 1]} : vector<2x4x32xf32> to vector<2x4x8xf32>
    %cst_55 = arith.constant 0.353553385 : f32
    %201 = vector.broadcast %cst_55 : f32 to vector<2x4x8xf32>
    %202 = arith.mulf %200, %201 : vector<2x4x8xf32>
    %203 = vector.extract_strided_slice %146 {offsets = [0, 0, 24], sizes = [2, 4, 8], strides = [1, 1, 1]} : vector<2x4x32xf32> to vector<2x4x8xf32>
    %204 = vector.extract_strided_slice %148 {offsets = [0, 0, 24], sizes = [2, 4, 8], strides = [1, 1, 1]} : vector<2x4x32xf32> to vector<2x4x8xf32>
    "tpu.trace_start"() <{level = 10 : i32, message = "bqd,bkd->bqk"}> : () -> ()
    %cst_56 = arith.constant dense<0.000000e+00> : vector<2x4x4xf32>
    %205 = tpu.matmul %202, %203, %cst_56 {dimension_numbers = #tpu.dot_dimension_numbers<[2], [2], [1], [1], [0, 0, 0, 1, 1, 1], [0], [0]>} : vector<2x4x8xf32>, vector<2x4x8xf32>, vector<2x4x4xf32> -> vector<2x4x4xf32>
    "tpu.trace_stop"() : () -> ()
    %cst_57 = arith.constant dense<0xFF800000> : vector<2x4xf32>
    %206 = vector.multi_reduction <maximumf>, %205, %cst_57 [2] : vector<2x4x4xf32> to vector<2x4xf32>
    %207 = vector.shape_cast %206 : vector<2x4xf32> to vector<2x4x1xf32>
    %208 = vector.broadcast %207 : vector<2x4x1xf32> to vector<2x4x4xf32>
    %209 = arith.subf %205, %208 : vector<2x4x4xf32>
    %210 = math.exp %209 : vector<2x4x4xf32>
    %cst_58 = arith.constant dense<0.000000e+00> : vector<2x4xf32>
    %211 = vector.multi_reduction <add>, %210, %cst_58 [2] : vector<2x4x4xf32> to vector<2x4xf32>
    %212 = vector.shape_cast %211 : vector<2x4xf32> to vector<2x4x1xf32>
    %213 = tpu.reciprocal %212 {approx = true} : vector<2x4x1xf32> -> vector<2x4x1xf32>
    %214 = vector.broadcast %213 : vector<2x4x1xf32> to vector<2x4x4xf32>
    %215 = arith.mulf %210, %214 : vector<2x4x4xf32>
    "tpu.trace_start"() <{level = 10 : i32, message = "bqk,bkd->bqd"}> : () -> ()
    %cst_59 = arith.constant dense<0.000000e+00> : vector<2x4x8xf32>
    %216 = tpu.matmul %215, %204, %cst_59 {dimension_numbers = #tpu.dot_dimension_numbers<[2], [1], [1], [2], [0, 0, 0, 1, 1, 2], [0], [0]>} : vector<2x4x4xf32>, vector<2x4x8xf32>, vector<2x4x8xf32> -> vector<2x4x8xf32>
    "tpu.trace_stop"() : () -> ()
    %217 = tpu.concatenate %165, %182, %199, %216 in 2 : vector<2x4x8xf32>, vector<2x4x8xf32>, vector<2x4x8xf32>, vector<2x4x8xf32> -> vector<2x4x32xf32>
    %218 = vector.shape_cast %217 : vector<2x4x32xf32> to vector<8x32xf32>
    %cst_60 = arith.constant dense<0.000000e+00> : vector<8x32xf32>
    %219 = tpu.matmul %218, %6, %cst_60 {dimension_numbers = #tpu.dot_dimension_numbers<[1], [0], [0], [1], [0, 0, 1, 1], [], []>} : vector<8x32xf32>, vector<32x32xf32>, vector<8x32xf32> -> vector<8x32xf32>
    %220 = vector.broadcast %16 : vector<1x32xf32> to vector<8x32xf32>
    %221 = arith.addf %219, %220 : vector<8x32xf32>
    %cst_61 = arith.constant dense<0.000000e+00> : vector<8x16xf32>
    %222 = tpu.matmul %221, %7, %cst_61 {dimension_numbers = #tpu.dot_dimension_numbers<[1], [0], [0], [1], [0, 0, 1, 1], [], []>} : vector<8x32xf32>, vector<32x16xf32>, vector<8x16xf32> -> vector<8x16xf32>
    %223 = vector.broadcast %17 : vector<1x16xf32> to vector<8x16xf32>
    %224 = arith.addf %222, %223 : vector<8x16xf32>
    %225 = math.tanh %224 : vector<8x16xf32>
    %226 = vector.broadcast %18 : vector<1x16xf32> to vector<8x16xf32>
    %227 = arith.mulf %225, %226 : vector<8x16xf32>
    %cst_62 = arith.constant dense<0.000000e+00> : vector<8xf32>
    %228 = vector.multi_reduction <add>, %227, %cst_62 [1] : vector<8x16xf32> to vector<8xf32>
    %229 = vector.shape_cast %228 : vector<8xf32> to vector<8x1xf32>
    %230 = vector.broadcast %19 : vector<1x1xf32> to vector<8x1xf32>
    %231 = arith.addf %229, %230 : vector<8x1xf32>
    %232 = vector.shape_cast %231 : vector<8x1xf32> to vector<2x4x1xf32>
    %cst_63 = arith.constant dense<0xFF800000> : vector<2x1xf32>
    %233 = vector.multi_reduction <maximumf>, %232, %cst_63 [1] : vector<2x4x1xf32> to vector<2x1xf32>
    %234 = vector.shape_cast %233 : vector<2x1xf32> to vector<2x1x1xf32>
    %235 = vector.broadcast %234 : vector<2x1x1xf32> to vector<2x4x1xf32>
    %236 = arith.subf %232, %235 : vector<2x4x1xf32>
    %237 = math.exp %236 : vector<2x4x1xf32>
    %cst_64 = arith.constant dense<0.000000e+00> : vector<2x1xf32>
    %238 = vector.multi_reduction <add>, %237, %cst_64 [1] : vector<2x4x1xf32> to vector<2x1xf32>
    %239 = vector.shape_cast %238 : vector<2x1xf32> to vector<2x1x1xf32>
    %240 = tpu.reciprocal %239 {approx = true} : vector<2x1x1xf32> -> vector<2x1x1xf32>
    %241 = vector.broadcast %240 : vector<2x1x1xf32> to vector<2x4x1xf32>
    %242 = arith.mulf %237, %241 : vector<2x4x1xf32>
    %243 = vector.shape_cast %221 : vector<8x32xf32> to vector<2x4x32xf32>
    %244 = vector.broadcast %242 : vector<2x4x1xf32> to vector<2x4x32xf32>
    %245 = arith.mulf %244, %243 : vector<2x4x32xf32>
    %cst_65 = arith.constant dense<0.000000e+00> : vector<2x32xf32>
    %246 = vector.multi_reduction <add>, %245, %cst_65 [1] : vector<2x4x32xf32> to vector<2x32xf32>
    %247 = vector.shape_cast %246 : vector<2x32xf32> to vector<2x1x32xf32>
    %248 = vector.broadcast %247 : vector<2x1x32xf32> to vector<2x3x32xf32>
    %249 = arith.mulf %139, %248 : vector<2x3x32xf32>
    %cst_66 = arith.constant dense<0.000000e+00> : vector<2x3xf32>
    %250 = vector.multi_reduction <add>, %249, %cst_66 [2] : vector<2x3x32xf32> to vector<2x3xf32>
    %cst_67 = arith.constant 0.000000e+00 : f32
    %251 = vector.broadcast %cst_67 : f32 to vector<2x3xf32>
    %252 = arith.subf %251, %250 : vector<2x3xf32>
    %253 = math.exp %252 : vector<2x3xf32>
    %cst_68 = arith.constant 1.000000e+00 : f32
    %254 = vector.broadcast %cst_68 : f32 to vector<2x3xf32>
    %255 = arith.addf %254, %253 : vector<2x3xf32>
    %cst_69 = arith.constant 1.000000e+00 : f32
    %256 = vector.broadcast %cst_69 : f32 to vector<2x3xf32>
    %257 = arith.divf %256, %255 : vector<2x3xf32>
    %c0_70 = arith.constant 0 : index
    %c0_71 = arith.constant 0 : index
    %258 = vector.load %arg2[%c0_70, %c0_71] : memref<2x3xf32, #tpu.memory_space<vmem>>, vector<2x3xf32>
    tpu.vector_store %arg2[%c0_70, %c0_71], %257 {strides = array<i32>} : memref<2x3xf32, #tpu.memory_space<vmem>>, vector<2x3xf32>,
    return
  }
}

</mosaic_0001>

<bundles_post_ra>
// kernel: nrms_forward.1
= control target key start
LH: loop header
LB: loop body
LE: loop exit
PB: predicated region body
PF: predicated region fallthrough
CT: control target
= control target key end

     0   :  { %7 = vsyncpa [#allocation3], 0  ;;  %s17400_s0 = inlined_call_operand.vmem [shape: s32[112,1], index: 0, kind: input, shape index: {}]   ;;  %s17401_s1 = inlined_call_operand.hbm [shape: f32[296,128], index: 1, kind: input, shape index: {}]   ;;  %s17402_s2 = inlined_call_operand.hbm [shape: f32[2,3], index: 2, kind: output, shape index: {}]  }
   0x1   :  { %8 = vsyncpa [#allocation4], 0  ;;  %s14830_s9 = smov [#allocation2]   ;;  %s14782_s13 = scalar_lea.hbm %s17401_s1, 4736 }
   0x2   :  { %s16_s10 = sshll.u32 %s14830_s9, 4  ;;  %p14783_p0 = scmp.ne.s32.totalorder %s17401_s1, %s14782_s13  ;;  %s17_s10 = int_to_ptr.vmem [resolvable:$true] %s16_s10 }
   0x3   :  { %p14786_p1 = scmp.lt.u32.totalorder %s14782_s13, %s17401_s1 }
   0x5   :  { %p14788_p2 = pnand %p14786_p1, %p14783_p0 }
   0x7   :  { %14791 = shalt.err (!%p14788_p2)
}
   0x8   :  { %s14792_s18 = scalar_lea.vmem %s17_s10, 4736  ;;  %p14797_p4 = scmp.lt.s32.totalorder %s17_s10, %s17_s10 }
   0x9   :  { %p14793_p3 = scmp.ne.s32.totalorder %s17_s10, %s14792_s18  ;;  %p14798_p5 = scmp.lt.s32.totalorder %s14792_s18, %s14792_s18 }
   0xb   :  { %p14799_p6 = por %p14798_p5, %p14797_p4 }
   0xd   :  { %p14800_p7 = pnand %p14799_p6, %p14793_p3 }
   0xf   :  { %14803 = shalt.err (!%p14800_p7)
}
  0x10   :  { %s14831_s19 = smov 128   ;;  %s14832_s20 = smov 8  }
  0x11   :  { %22 = dma.hbm_to_vmem [thread:$0]  %s17401_s1, 4736, %s17_s10, [#allocation3], %s14831_s19, %s14831_s19, %s14832_s20  }
  0x12   :  { %14826 = dma.done.wait [#allocation3], 4736  }
  0x13   :  { %14827 = vsyncadd [#allocation3], 4294962560  ;;  %v14833_v0 = vmov 0   ;;  %v65_v1 = vld [vmem:[%s17400_s0 + $0x10] sm:$0xff]  ;;  %v63_v2 = vld [vmem:[%s17400_s0] sm:$0xff]  ;;  %v17404_v25 = vmov 0.0   ;;  %v77_v32 = vlaneseq }
  0x14   :  { %14421 = vset.pattern.permute.xlu1 %v14833_v0  ;;  %14420 = vset.pattern.permute.xlu0 %v14833_v0  ;;  %v66_v3 = vld [vmem:[%s17400_s0 + $0x18] sm:$0xff]  ;;  %v64_v4 = vld [vmem:[%s17400_s0 + $0x8] sm:$0xff]  ;;  %v26_v5 = vld [vmem:[#allocation2] sm:$0xff]  ;;  %vm163_vm0 = vcmask 457728   ;;  %vm345_vm15 = vcmask 261120   ;;  %s14837_s23 = smov 64  }
  0x15   :  { %86 = vperm.xlu1 %14421, %v65_v1   ;;  %80 = vperm.xlu0 %14420, %v63_v2   ;;  %v27_v6 = vld [vmem:[#allocation2 + $0x8] sm:$0xff]  ;;  %v28_v7 = vld [vmem:[#allocation2 + $0x10] sm:$0xff]  ;;  %v29_v8 = vld [vmem:[#allocation2 + $0x18] sm:$0xff]  ;;  %v14925_v33 = vand.u32 127, %v77_v32  ;;  %s14838_s24 = smov 88   ;;  %s14839_s25 = smov 120  }
  0x16   :  { %v68_v9 = vld [vmem:[%s17400_s0 + $0x28] sm:$0xff]  ;;  %v67_v10 = vld [vmem:[%s17400_s0 + $0x20] sm:$0xff]  ;;  %v14336_v11 = vpack.c.bf16 %v27_v6, %v26_v5  ;;  %v14340_v12 = vpack.c.bf16 %v29_v8, %v28_v7  ;;  %v70_v15 = vld [vmem:[%s17400_s0 + $0x38] sm:$0xff]  ;;  %s14840_s26 = smov 56   ;;  %s14841_s27 = smov 80  }
  0x17   :  { %v30_v13 = vld [vmem:[#allocation2 + $0x20] sm:$0xff]  ;;  %v31_v14 = vld [vmem:[#allocation2 + $0x28] sm:$0xff]  ;;  %v69_v16 = vld [vmem:[%s17400_s0 + $0x30] sm:$0xff]  ;;  %17425 = vst [vmem:[#allocation8_spill] sm:$0xff] %v14925_v33  ;;  %s14842_s28 = smov 112   ;;  %s14843_s1 = smov 48  }
  0x18   :  { %14337 = vmatprep.subr.bf16.mxu0 %v14336_v11  ;;  %v14344_v17 = vpack.c.bf16 %v31_v14, %v30_v13  ;;  %v72_v18 = vld [vmem:[%s17400_s0 + $0x48] sm:$0xff]  ;;  %v71_v19 = vld [vmem:[%s17400_s0 + $0x40] sm:$0xff]  ;;  %v32_v20 = vld [vmem:[#allocation2 + $0x30] sm:$0xff]  ;;  %s14844_s29 = smov 72   ;;  %s14845_s30 = smov 104  }
  0x19   :  { %89 = vperm.xlu1 %14421, %v66_v3   ;;  %83 = vperm.xlu0 %14420, %v64_v4   ;;  %v74_v21 = vld [vmem:[%s17400_s0 + $0x58] sm:$0xff]  ;;  %v73_v22 = vld [vmem:[%s17400_s0 + $0x50] sm:$0xff]  ;;  %v76_v23 = vld [vmem:[%s17400_s0 + $0x68] sm:$0xff]  ;;  %s14846_s3 = smov 40   ;;  %s14847_s4 = smov 16  }
  0x1a   :  { %14339 = vmatpush3.bf16.msra.mxu0 %v14336_v11  ;;  %v75_v24 = vld [vmem:[%s17400_s0 + $0x60] sm:$0xff]  ;;  %v33_v26 = vld [vmem:[#allocation2 + $0x38] sm:$0xff]  ;;  %v35_v28 = vld [vmem:[#allocation2 + $0x48] sm:$0xff]  ;;  %s14836_s0 = smov 96   ;;  %s14848_s5 = smov 24  }
  0x1b   :  { %14341 = vmatprep.subr.bf16.mxu0 %v14340_v12  ;;  %v34_v27 = vld [vmem:[#allocation2 + $0x40] sm:$0xff]  ;;  %v36_v30 = vld [vmem:[#allocation2 + $0x50] sm:$0xff]  ;;  %v61_v14 = vld [vmem:[#allocation2 + $0x118] sm:$0xff] }
  0x1c   :  { %v14348_v29 = vpack.c.bf16 %v34_v27, %v33_v26  ;;  %v14352_v31 = vpack.c.bf16 %v36_v30, %v35_v28 }
  0x1d   :  { %95 = vperm.xlu1 %14421, %v68_v9   ;;  %92 = vperm.xlu0 %14420, %v67_v10  }
  0x1e   :  { %14343 = vmatpush3.bf16.msra.mxu0 %v14340_v12  ;;  %14349 = vmatprep.subr.bf16.mxu1 %v14348_v29  ;;  %v14984_v12 = vshrl.u32 %v77_v32, 7 }
  0x1f   :  { %14345 = vmatprep.subr.bf16.mxu0 %v14344_v17  ;;  %14351 = vmatpush3.bf16.msra.mxu1 %v14348_v29 }
  0x20   :  { %14353 = vmatprep.subr.bf16.mxu1 %v14352_v31  ;;  %17426 = vst [vmem:[#allocation9_spill] sm:$0xff] %v14984_v12  ;;  %v17403_v13 = vsub.s32 0, %v14984_v12 }
  0x21   :  { %101 = vperm.xlu1 %14421, %v70_v15   ;;  %98 = vperm.xlu0 %14420, %v69_v16  }
  0x22   :  { %14347 = vmatpush3.bf16.msra.mxu0 %v14344_v17  ;;  %v344_v15 = vrot.slane %v61_v14, %v17403_v13 }
  0x23   :  { %13524 = vmatprep.subr.mxu0 %v32_v20  ;;  %14355 = vmatpush3.bf16.msra.mxu1 %v14352_v31 }
  0x24   :  { %13576 = vmatprep.subr.mxu1 %v17404_v25 }
  0x25   :  { %107 = vperm.xlu1 %14421, %v72_v18   ;;  %104 = vperm.xlu0 %14420, %v71_v19  }
  0x26   :  { %13525 = vmatpush3.msra.mxu0 %v32_v20 }
  0x27   :  { %13586 = vmatprep.subr.mxu0 %v17404_v25 }
  0x29   :  { %113 = vperm.xlu1 %14421, %v74_v21   ;;  %110 = vperm.xlu0 %14420, %v73_v22  }
  0x2d   :  { %119 = vperm.xlu1 %14421, %v76_v23   ;;  %116 = vperm.xlu0 %14420, %v75_v24  }
  0x94   :  { %v87_v34 = vpop.permute.xlu1 %86  ;;  %v81_v35 = vpop.permute.xlu0 %80 }
  0x95   :  { %vm121_vm1 = vcmp.eq.s32.totalorder %v14925_v33, %v81_v35  ;;  %vm123_vm2 = vcmp.eq.s32.totalorder %v14925_v33, %v87_v34 }
  0x96   :  { %v12861_v36 = vsel %vm121_vm1, 1.0, %v17404_v25  ;;  %v12863_v39 = vsel %vm123_vm2, 1.0, %v17404_v25  ;;  %vm540_vm1 = vcmask 64512   ;;  %vm9975_vm2 = vcmask 195584  }
  0x97   :  { %13526 = vmatprep.mubr.msk.f32.mxu0 %vm163_vm0, %v12861_v36 }
  0x98   :  { %v90_v37 = vpop.permute.xlu1 %89  ;;  %v84_v38 = vpop.permute.xlu0 %83 }
  0x99   :  { %vm122_vm3 = vcmp.eq.s32.totalorder %v14925_v33, %v84_v38  ;;  %vm124_vm4 = vcmp.eq.s32.totalorder %v14925_v33, %v90_v37 }
  0x9a   :  { %v12862_v40 = vsel %vm122_vm3, 1.0, %v17404_v25  ;;  %v12864_v43 = vsel %vm124_vm4, 1.0, %v17404_v25  ;;  %vm9960_vm3 = vcmask 130048   ;;  %vm10625_vm4 = vcmask 7168  }
  0x9b   :  { %13527 = vmatmul.mubr.msk.f32.vlgmr.msra.gmra.mrb[0].mxu0 %vm163_vm0, %v12862_v40 }
  0x9c   :  { %v96_v41 = vpop.permute.xlu1 %95  ;;  %v93_v42 = vpop.permute.xlu0 %92  ;;  %13529 = vmatprep.mubr.msk.f32.mxu0 %vm163_vm0, %v12863_v39 }
  0x9d   :  { %vm125_vm5 = vcmp.eq.s32.totalorder %v14925_v33, %v93_v42  ;;  %vm126_vm6 = vcmp.eq.s32.totalorder %v14925_v33, %v96_v41 }
  0x9e   :  { %v12865_v44 = vsel %vm125_vm5, 1.0, %v17404_v25  ;;  %v12866_v47 = vsel %vm126_vm6, 1.0, %v17404_v25  ;;  %vm11086_vm5 = vcmask 1041409   ;;  %vm11088_vm6 = vcmask 1042434  }
  0x9f   :  { %13530 = vmatmul.mubr.msk.f32.gmra.mrb[2].mxu0 %vm163_vm0, %v12864_v43 }
  0xa0   :  { %v102_v45 = vpop.permute.xlu1 %101  ;;  %v99_v46 = vpop.permute.xlu0 %98  ;;  %13532 = vmatprep.mubr.msk.f32.mxu0 %vm163_vm0, %v12865_v44 }
  0xa1   :  { %vm127_vm7 = vcmp.eq.s32.totalorder %v14925_v33, %v99_v46  ;;  %vm128_vm8 = vcmp.eq.s32.totalorder %v14925_v33, %v102_v45 }
  0xa2   :  { %v12867_v48 = vsel %vm127_vm7, 1.0, %v17404_v25  ;;  %v12868_v51 = vsel %vm128_vm8, 1.0, %v17404_v25  ;;  %vm11090_vm7 = vcmask 1043459   ;;  %vm11092_vm8 = vcmask 1044484  }
  0xa3   :  { %13533 = vmatmul.mubr.msk.f32.gmra.mrb[4].mxu0 %vm163_vm0, %v12866_v47 }
  0xa4   :  { %v108_v49 = vpop.permute.xlu1 %107  ;;  %v105_v50 = vpop.permute.xlu0 %104  ;;  %13535 = vmatprep.mubr.msk.f32.mxu0 %vm163_vm0, %v12867_v48 }
  0xa5   :  { %vm129_vm9 = vcmp.eq.s32.totalorder %v14925_v33, %v105_v50  ;;  %vm130_vm10 = vcmp.eq.s32.totalorder %v14925_v33, %v108_v49 }
  0xa6   :  { %v12869_v52 = vsel %vm129_vm9, 1.0, %v17404_v25  ;;  %v12870_v55 = vsel %vm130_vm10, 1.0, %v17404_v25  ;;  %vm11094_vm9 = vcmask 1045509   ;;  %vm11096_vm10 = vcmask 1046534  }
  0xa7   :  { %13536 = vmatmul.mubr.msk.f32.gmra.mrb[6].mxu0 %vm163_vm0, %v12868_v51 }
  0xa8   :  { %v114_v53 = vpop.permute.xlu1 %113  ;;  %v111_v54 = vpop.permute.xlu0 %110  ;;  %13538 = vmatprep.mubr.msk.f32.mxu0 %vm163_vm0, %v12869_v52 }
  0xa9   :  { %vm131_vm11 = vcmp.eq.s32.totalorder %v14925_v33, %v111_v54  ;;  %vm132_vm12 = vcmp.eq.s32.totalorder %v14925_v33, %v114_v53 }
  0xaa   :  { %v12871_v56 = vsel %vm131_vm11, 1.0, %v17404_v25  ;;  %v12872_v59 = vsel %vm132_vm12, 1.0, %v17404_v25  ;;  %vm11098_vm11 = vcmask 1047559   ;;  %vm11331_vm12 = vcmask 27648  }
  0xab   :  { %13539 = vmatmul.mubr.msk.f32.gmra.mrb[8].mxu0 %vm163_vm0, %v12870_v55 }
  0xac   :  { %v120_v57 = vpop.permute.xlu1 %119  ;;  %v117_v58 = vpop.permute.xlu0 %116  ;;  %13541 = vmatprep.mubr.msk.f32.mxu0 %vm163_vm0, %v12871_v56 }
  0xad   :  { %vm133_vm13 = vcmp.eq.s32.totalorder %v14925_v33, %v117_v58  ;;  %vm134_vm14 = vcmp.eq.s32.totalorder %v14925_v33, %v120_v57 }
  0xae   :  { %v12873_v60 = vsel %vm133_vm13, 1.0, %v17404_v25  ;;  %v12874_v61 = vsel %vm134_vm14, 1.0, %v17404_v25  ;;  %vm11360_vm13 = vcmask 1043456   ;;  %vm11356_vm14 = vcmask 31744  }
  0xaf   :  { %13542 = vmatmul.mubr.msk.f32.gmra.mrb[10].mxu0 %vm163_vm0, %v12872_v59 }
  0xb0   :  { %13544 = vmatprep.mubr.msk.f32.mxu0 %vm163_vm0, %v12873_v60 }
  0xb3   :  { %13545 = vmatmul.mubr.msk.f32.gmra.mrb[12].mxu0 %vm163_vm0, %v12874_v61  ;;  %vm14835_vm0 = vmmov 0  }
  0xb4   :  { %13588 = vmatprep.mubr.msk.f32.mxu0 %vm14835_vm0, %v17404_v25 }
 0x16e   :  { %v13528_v62 = vpop.f32.mrb[0].mxu0 }
 0x16f   :  { %v272_v63 = vpop.f32.mrb[1].mxu0 }
 0x170   :  { %13555 = vmatprep.mubr.msk.f32.mxu1 %vm345_vm15, %v272_v63 }
 0x171   :  { %13556 = vmatmul.mubr.msk.f32.vlgmr.msra.gmra.mrb[0].mxu1 %vm345_vm15, %v13528_v62 }
 0x172   :  { %v13531_v0 = vpop.f32.mrb[2].mxu0 }
 0x173   :  { %v282_v1 = vpop.f32.mrb[3].mxu0 }
 0x174   :  { %13558 = vmatprep.mubr.msk.f32.mxu1 %vm345_vm15, %v282_v1 }
 0x175   :  { %13559 = vmatmul.mubr.msk.f32.gmra.mrb[2].mxu1 %vm345_vm15, %v13531_v0 }
 0x176   :  { %v13534_v2 = vpop.f32.mrb[4].mxu0 }
 0x177   :  { %v292_v3 = vpop.f32.mrb[5].mxu0 }
 0x178   :  { %13561 = vmatprep.mubr.msk.f32.mxu1 %vm345_vm15, %v292_v3 }
 0x179   :  { %13562 = vmatmul.mubr.msk.f32.gmra.mrb[4].mxu1 %vm345_vm15, %v13534_v2 }
 0x17a   :  { %v13537_v4 = vpop.f32.mrb[6].mxu0 }
 0x17b   :  { %v302_v5 = vpop.f32.mrb[7].mxu0 }
 0x17c   :  { %13564 = vmatprep.mubr.msk.f32.mxu1 %vm345_vm15, %v302_v5 }
 0x17d   :  { %13565 = vmatmul.mubr.msk.f32.gmra.mrb[6].mxu1 %vm345_vm15, %v13537_v4 }
 0x17e   :  { %v13540_v6 = vpop.f32.mrb[8].mxu0 }
 0x17f   :  { %v312_v7 = vpop.f32.mrb[9].mxu0 }
 0x180   :  { %13567 = vmatprep.mubr.msk.f32.mxu1 %vm345_vm15, %v312_v7 }
 0x181   :  { %13568 = vmatmul.mubr.msk.f32.gmra.mrb[8].mxu1 %vm345_vm15, %v13540_v6 }
 0x182   :  { %v13543_v8 = vpop.f32.mrb[10].mxu0 }
 0x183   :  { %v322_v9 = vpop.f32.mrb[11].mxu0 }
 0x184   :  { %13570 = vmatprep.mubr.msk.f32.mxu1 %vm345_vm15, %v322_v9 }
 0x185   :  { %13571 = vmatmul.mubr.msk.f32.gmra.mrb[10].mxu1 %vm345_vm15, %v13543_v8 }
 0x186   :  { %v13546_v10 = vpop.f32.mrb[12].mxu0 }
 0x187   :  { %v332_v11 = vpop.f32.mrb[13].mxu0 }
 0x188   :  { %13573 = vmatprep.mubr.msk.f32.mxu1 %vm345_vm15, %v332_v11 }
 0x189   :  { %13574 = vmatmul.mubr.msk.f32.gmra.mrb[12].mxu1 %vm345_vm15, %v13546_v10 }
 0x18a   :  { %13578 = vmatprep.mubr.msk.f32.mxu1 %vm14835_vm0, %v17404_v25 }
 0x244   :  { %v13557_v16 = vpop.f32.mrb[0].mxu1 }
 0x245   :  { %v14993_v17 = vadd.f32 %v13557_v16, %v344_v15  ;;  %v454_v18 = vpop.f32.mrb[1].mxu1 }
 0x246   :  { %v14995_v19 = vadd.f32 %v454_v18, %v344_v15 }
 0x247   :  { %617 = vrot.lane.b32.xlu1 %v14993_v17, %s14836_s0  ;;  %v15097_v52 = vmul.f32 0.35355338, %v14993_v17 }
 0x248   :  { %538 = vrot.lane.b32.xlu0 %v14995_v19, %s14836_s0  ;;  %v13560_v20 = vpop.f32.mrb[2].mxu1  ;;  %v15084_v48 = vmul.f32 0.35355338, %v14995_v19 }
 0x249   :  { %v15001_v21 = vadd.f32 %v13560_v20, %v344_v15  ;;  %v464_v22 = vpop.f32.mrb[3].mxu1  ;;  %17430 = vst [vmem:[#allocation13_spill] sm:$0xff] %v15097_v52 }
 0x24a   :  { %v15003_v23 = vadd.f32 %v464_v22, %v344_v15  ;;  %17428 = vst [vmem:[#allocation11_spill] sm:$0xff] %v15084_v48 }
 0x24b   :  { %773 = vrot.lane.b32.xlu1 %v15001_v21, %s14836_s0  ;;  %v15114_v56 = vmul.f32 0.35355338, %v15001_v21 }
 0x24c   :  { %695 = vrot.lane.b32.xlu0 %v15003_v23, %s14836_s0  ;;  %v13563_v24 = vpop.f32.mrb[4].mxu1  ;;  %v15093_v51 = vmul.f32 0.35355338, %v15003_v23 }
 0x24d   :  { %v15009_v26 = vadd.f32 %v13563_v24, %v344_v15  ;;  %v474_v27 = vpop.f32.mrb[5].mxu1  ;;  %17431 = vst [vmem:[#allocation14_spill] sm:$0xff] %v15114_v56 }
 0x24e   :  { %v15011_v28 = vadd.f32 %v474_v27, %v344_v15  ;;  %17429 = vst [vmem:[#allocation12_spill] sm:$0xff] %v15093_v51 }
 0x24f   :  { %929 = vrot.lane.b32.xlu1 %v15009_v26, %s14836_s0  ;;  %v15132_v60 = vmul.f32 0.35355338, %v15009_v26 }
 0x250   :  { %851 = vrot.lane.b32.xlu0 %v15011_v28, %s14836_s0  ;;  %v13566_v29 = vpop.f32.mrb[6].mxu1  ;;  %v15111_v55 = vmul.f32 0.35355338, %v15011_v28 }
 0x251   :  { %v15017_v30 = vadd.f32 %v13566_v29, %v344_v15  ;;  %v484_v31 = vpop.f32.mrb[7].mxu1 }
 0x252   :  { %v15019_v32 = vadd.f32 %v484_v31, %v344_v15 }
 0x253   :  { %1085 = vrot.lane.b32.xlu1 %v15017_v30, %s14836_s0  ;;  %v15150_v0 = vmul.f32 0.35355338, %v15017_v30 }
 0x254   :  { %1007 = vrot.lane.b32.xlu0 %v15019_v32, %s14836_s0  ;;  %v13569_v34 = vpop.f32.mrb[8].mxu1  ;;  %v15129_v59 = vmul.f32 0.35355338, %v15019_v32 }
 0x255   :  { %v15025_v35 = vadd.f32 %v13569_v34, %v344_v15  ;;  %v494_v36 = vpop.f32.mrb[9].mxu1 }
 0x256   :  { %v15027_v37 = vadd.f32 %v494_v36, %v344_v15 }
 0x257   :  { %17427 = vst [vmem:[#allocation10_spill] sm:$0xff] %v15025_v35  ;;  %1241 = vrot.lane.b32.xlu1 %v15025_v35, %s14836_s0  ;;  %v15165_v3 = vmul.f32 0.35355338, %v15025_v35 }
 0x258   :  { %1163 = vrot.lane.b32.xlu0 %v15027_v37, %s14836_s0  ;;  %v13572_v38 = vpop.f32.mrb[10].mxu1  ;;  %v15147_v63 = vmul.f32 0.35355338, %v15027_v37 }
 0x259   :  { %v15033_v39 = vadd.f32 %v13572_v38, %v344_v15  ;;  %v504_v40 = vpop.f32.mrb[11].mxu1  ;;  %17432 = vst [vmem:[#allocation15_spill] sm:$0xff] %v15165_v3 }
 0x25a   :  { %v15035_v41 = vadd.f32 %v504_v40, %v344_v15 }
 0x25b   :  { %1397 = vrot.lane.b32.xlu1 %v15033_v39, %s14836_s0  ;;  %v15183_v7 = vmul.f32 0.35355338, %v15033_v39 }
 0x25c   :  { %1319 = vrot.lane.b32.xlu0 %v15035_v41, %s14836_s0  ;;  %v13575_v42 = vpop.f32.mrb[12].mxu1  ;;  %v15168_v4 = vmul.f32 0.35355338, %v15035_v41 }
 0x25d   :  { %v15041_v43 = vadd.f32 %v13575_v42, %v344_v15  ;;  %v514_v44 = vpop.f32.mrb[13].mxu1  ;;  %17433 = vst [vmem:[#allocation16_spill] sm:$0xff] %v15183_v7 }
 0x25e   :  { %v15043_v45 = vadd.f32 %v514_v44, %v344_v15 }
 0x25f   :  { %1553 = vrot.lane.b32.xlu1 %v15041_v43, %s14836_s0  ;;  %v15198_v10 = vmul.f32 0.35355338, %v15041_v43 }
 0x260   :  { %1475 = vrot.lane.b32.xlu0 %v15043_v45, %s14836_s0  ;;  %v15186_v8 = vmul.f32 0.35355338, %v15043_v45 }
 0x261   :  { %17435 = vst [vmem:[#allocation18_spill] sm:$0xff] %v15198_v10 }
 0x262   :  { %17434 = vst [vmem:[#allocation17_spill] sm:$0xff] %v15186_v8 }
 0x263   :  { %1860 = vrot.lane.b32.xlu1 %v14993_v17, %s14837_s23 }
 0x264   :  { %1784 = vrot.lane.b32.xlu0 %v14995_v19, %s14837_s23 }
 0x267   :  { %2012 = vrot.lane.b32.xlu1 %v15001_v21, %s14837_s23 }
 0x268   :  { %1936 = vrot.lane.b32.xlu0 %v15003_v23, %s14837_s23 }
 0x26b   :  { %2164 = vrot.lane.b32.xlu1 %v15009_v26, %s14837_s23 }
 0x26c   :  { %2088 = vrot.lane.b32.xlu0 %v15011_v28, %s14837_s23 }
 0x26f   :  { %2316 = vrot.lane.b32.xlu1 %v15017_v30, %s14837_s23 }
 0x270   :  { %2240 = vrot.lane.b32.xlu0 %v15019_v32, %s14837_s23 }
 0x273   :  { %2468 = vrot.lane.b32.xlu1 %v15025_v35, %s14837_s23 }
 0x274   :  { %2392 = vrot.lane.b32.xlu0 %v15027_v37, %s14837_s23 }
 0x277   :  { %2620 = vrot.lane.b32.xlu1 %v15033_v39, %s14837_s23 }
 0x278   :  { %2544 = vrot.lane.b32.xlu0 %v15035_v41, %s14837_s23 }
 0x27b   :  { %2772 = vrot.lane.b32.xlu1 %v15041_v43, %s14837_s23 }
 0x27c   :  { %2850 = vrot.lane.b32.xlu0 %v14995_v19, %s14838_s24 }
 0x27f   :  { %2928 = vrot.lane.b32.xlu1 %v14993_v17, %s14838_s24 }
 0x280   :  { %2696 = vrot.lane.b32.xlu0 %v15043_v45, %s14837_s23 }
 0x2b9   :  { %v618_v46 = vpop.permute.xlu1 %617 }
 0x2ba   :  { %v539_v47 = vpop.permute.xlu0 %538 }
 0x2bb   :  { %13577 = vmatpush3.xpose.msk.msra.mxu1 %vm540_vm1, %v539_v47 }
 0x2bc   :  { %13581 = vmatprep.subr.mxu1 %v17404_v25 }
 0x2bd   :  { %v774_v49 = vpop.permute.xlu1 %773 }
 0x2be   :  { %v696_v50 = vpop.permute.xlu0 %695  ;;  %13579 = vmatmul.mubr.msk.f32.vlgmr.msra.gmra.mrb[14].mxu1 %vm540_vm1, %v15084_v48 }
 0x2bf   :  { %13582 = vmatpush3.xpose.msk.msra.mxu1 %vm540_vm1, %v618_v46  ;;  %13587 = vmatpush3.xpose.msk.msra.mxu0 %vm540_vm1, %v696_v50 }
 0x2c0   :  { %13583 = vmatprep.mubr.msk.f32.mxu1 %vm14835_vm0, %v17404_v25  ;;  %13596 = vmatprep.subr.mxu0 %v17404_v25 }
 0x2c1   :  { %v930_v53 = vpop.permute.xlu1 %929  ;;  %13591 = vmatprep.subr.mxu1 %v17404_v25 }
 0x2c2   :  { %13589 = vmatmul.mubr.msk.f32.vlgmr.msra.gmra.mrb[14].mxu0 %vm540_vm1, %v15093_v51  ;;  %v852_v54 = vpop.permute.xlu0 %851  ;;  %13584 = vmatmul.mubr.msk.f32.vlgmr.msra.gmra.mrb[16].mxu1 %vm540_vm1, %v15097_v52 }
 0x2c3   :  { %13592 = vmatpush3.xpose.msk.msra.mxu1 %vm540_vm1, %v774_v49  ;;  %13597 = vmatpush3.xpose.msk.msra.mxu0 %vm540_vm1, %v852_v54 }
 0x2c4   :  { %13598 = vmatprep.mubr.msk.f32.mxu0 %vm14835_vm0, %v17404_v25  ;;  %13593 = vmatprep.mubr.msk.f32.mxu1 %vm14835_vm0, %v17404_v25 }
 0x2c5   :  { %v1086_v57 = vpop.permute.xlu1 %1085  ;;  %13606 = vmatprep.subr.mxu0 %v17404_v25  ;;  %13601 = vmatprep.subr.mxu1 %v17404_v25 }
 0x2c6   :  { %13599 = vmatmul.mubr.msk.f32.vlgmr.msra.gmra.mrb[16].mxu0 %vm540_vm1, %v15111_v55  ;;  %v1008_v58 = vpop.permute.xlu0 %1007  ;;  %13594 = vmatmul.mubr.msk.f32.vlgmr.msra.gmra.mrb[18].mxu1 %vm540_vm1, %v15114_v56 }
 0x2c7   :  { %13602 = vmatpush3.xpose.msk.msra.mxu1 %vm540_vm1, %v930_v53  ;;  %13607 = vmatpush3.xpose.msk.msra.mxu0 %vm540_vm1, %v1008_v58 }
 0x2c8   :  { %13608 = vmatprep.mubr.msk.f32.mxu0 %vm14835_vm0, %v17404_v25  ;;  %13603 = vmatprep.mubr.msk.f32.mxu1 %vm14835_vm0, %v17404_v25 }
 0x2c9   :  { %v1242_v61 = vpop.permute.xlu1 %1241  ;;  %13616 = vmatprep.subr.mxu0 %v17404_v25  ;;  %13611 = vmatprep.subr.mxu1 %v17404_v25 }
 0x2ca   :  { %13609 = vmatmul.mubr.msk.f32.vlgmr.msra.gmra.mrb[18].mxu0 %vm540_vm1, %v15129_v59  ;;  %v1164_v62 = vpop.permute.xlu0 %1163  ;;  %13604 = vmatmul.mubr.msk.f32.vlgmr.msra.gmra.mrb[20].mxu1 %vm540_vm1, %v15132_v60 }
 0x2cb   :  { %13612 = vmatpush3.xpose.msk.msra.mxu1 %vm540_vm1, %v1086_v57  ;;  %13617 = vmatpush3.xpose.msk.msra.mxu0 %vm540_vm1, %v1164_v62 }
 0x2cc   :  { %13618 = vmatprep.mubr.msk.f32.mxu0 %vm14835_vm0, %v17404_v25  ;;  %13613 = vmatprep.mubr.msk.f32.mxu1 %vm14835_vm0, %v17404_v25 }
 0x2cd   :  { %13626 = vmatprep.subr.mxu0 %v17404_v25  ;;  %13621 = vmatprep.subr.mxu1 %v17404_v25  ;;  %v1398_v1 = vpop.permute.xlu1 %1397 }
 0x2ce   :  { %13619 = vmatmul.mubr.msk.f32.vlgmr.msra.gmra.mrb[20].mxu0 %vm540_vm1, %v15147_v63  ;;  %v1320_v2 = vpop.permute.xlu0 %1319  ;;  %13614 = vmatmul.mubr.msk.f32.vlgmr.msra.gmra.mrb[22].mxu1 %vm540_vm1, %v15150_v0 }
 0x2cf   :  { %13622 = vmatpush3.xpose.msk.msra.mxu1 %vm540_vm1, %v1242_v61  ;;  %13627 = vmatpush3.xpose.msk.msra.mxu0 %vm540_vm1, %v1320_v2 }
 0x2d0   :  { %13623 = vmatprep.mubr.msk.f32.mxu1 %vm14835_vm0, %v17404_v25  ;;  %13628 = vmatprep.mubr.msk.f32.mxu0 %vm14835_vm0, %v17404_v25 }
 0x2d1   :  { %13631 = vmatprep.subr.mxu1 %v17404_v25  ;;  %13636 = vmatprep.subr.mxu0 %v17404_v25  ;;  %v1554_v6 = vpop.permute.xlu1 %1553 }
 0x2d2   :  { %13624 = vmatmul.mubr.msk.f32.vlgmr.msra.gmra.mrb[24].mxu1 %vm540_vm1, %v15165_v3  ;;  %13629 = vmatmul.mubr.msk.f32.vlgmr.msra.gmra.mrb[22].mxu0 %vm540_vm1, %v15168_v4  ;;  %v1476_v5 = vpop.permute.xlu0 %1475 }
 0x2d3   :  { %13632 = vmatpush3.xpose.msk.msra.mxu1 %vm540_vm1, %v1398_v1  ;;  %13637 = vmatpush3.xpose.msk.msra.mxu0 %vm540_vm1, %v1476_v5 }
 0x2d4   :  { %13633 = vmatprep.mubr.msk.f32.mxu1 %vm14835_vm0, %v17404_v25  ;;  %13638 = vmatprep.mubr.msk.f32.mxu0 %vm14835_vm0, %v17404_v25 }
 0x2d5   :  { %13641 = vmatprep.subr.mxu1 %v17404_v25  ;;  %13646 = vmatprep.subr.mxu0 %v17404_v25  ;;  %v1861_v11 = vpop.permute.xlu1 %1860 }
 0x2d6   :  { %13634 = vmatmul.mubr.msk.f32.vlgmr.msra.gmra.mrb[26].mxu1 %vm540_vm1, %v15183_v7  ;;  %v1785_v9 = vpop.permute.xlu0 %1784  ;;  %13639 = vmatmul.mubr.msk.f32.vlgmr.msra.gmra.mrb[24].mxu0 %vm540_vm1, %v15186_v8 }
 0x2d7   :  { %13642 = vmatpush3.xpose.msk.msra.mxu1 %vm540_vm1, %v1554_v6  ;;  %13647 = vmatpush3.msra.mxu0 %v1785_v9 }
 0x2d8   :  { %13643 = vmatprep.mubr.msk.f32.mxu1 %vm14835_vm0, %v17404_v25  ;;  %13651 = vmatprep.subr.mxu1 %v17404_v25 }
 0x2d9   :  { %13648 = vmatprep.mubr.msk.f32.mxu0 %vm14835_vm0, %v17404_v25  ;;  %13656 = vmatprep.subr.mxu0 %v17404_v25 }
 0x2da   :  { %13644 = vmatmul.mubr.msk.f32.vlgmr.msra.gmra.mrb[28].mxu1 %vm540_vm1, %v15198_v10 }
 0x2db   :  { %13652 = vmatpush3.msra.mxu1 %v1861_v11  ;;  %13653 = vmatprep.mubr.msk.f32.mxu1 %vm14835_vm0, %v17404_v25 }
 0x2dc   :  { %13661 = vmatprep.subr.mxu1 %v17404_v25 }
 0x391   :  { %v15209_v14 = vpop.f32.mrb[14].mxu1 }
 0x392   :  { %v13580_v15 = vpop.f32.mrb[15].mxu1  ;;  %v1630_v16 = vsel %vm540_vm1, %v15209_v14, -inf }
 0x393   :  { %1631 = vmax.xlane.f32.xlu0 %v1630_v16 }
 0x395   :  { %v15213_v18 = vpop.f32.mrb[16].mxu1  ;;  %v15215_v20 = vpop.f32.mrb[14].mxu0 }
 0x396   :  { %v13585_v22 = vpop.f32.mrb[17].mxu1  ;;  %v13590_v24 = vpop.f32.mrb[15].mxu0  ;;  %v1633_v27 = vsel %vm540_vm1, %v15213_v18, -inf  ;;  %v1636_v29 = vsel %vm540_vm1, %v15215_v20, -inf }
 0x397   :  { %1634 = vmax.xlane.f32.xlu1 %v1633_v27  ;;  %1637 = vmax.xlane.f32.xlu0 %v1636_v29 }
 0x399   :  { %v15221_v31 = vpop.f32.mrb[18].mxu1  ;;  %v15223_v34 = vpop.f32.mrb[16].mxu0 }
 0x39a   :  { %v13595_v36 = vpop.f32.mrb[19].mxu1  ;;  %v13600_v38 = vpop.f32.mrb[17].mxu0  ;;  %v1642_v40 = vsel %vm540_vm1, %v15223_v34, -inf  ;;  %v1639_v42 = vsel %vm540_vm1, %v15221_v31, -inf }
 0x39b   :  { %1643 = vmax.xlane.f32.xlu1 %v1642_v40  ;;  %1640 = vmax.xlane.f32.xlu0 %v1639_v42 }
 0x39d   :  { %v15229_v44 = vpop.f32.mrb[20].mxu1  ;;  %v15231_v46 = vpop.f32.mrb[18].mxu0 }
 0x39e   :  { %v13605_v47 = vpop.f32.mrb[21].mxu1  ;;  %v13610_v49 = vpop.f32.mrb[19].mxu0  ;;  %v1648_v50 = vsel %vm540_vm1, %v15231_v46, -inf  ;;  %v1645_v53 = vsel %vm540_vm1, %v15229_v44, -inf }
 0x39f   :  { %1649 = vmax.xlane.f32.xlu1 %v1648_v50  ;;  %1646 = vmax.xlane.f32.xlu0 %v1645_v53  ;;  %v15277_v47 = vpop.permute.xlu0 %1936  ;;  %v15281_v49 = vpop.permute.xlu1 %2012 }
 0x3a1   :  { %v15237_v54 = vpop.f32.mrb[22].mxu1  ;;  %v15239_v57 = vpop.f32.mrb[20].mxu0 }
 0x3a2   :  { %v13615_v58 = vpop.f32.mrb[23].mxu1  ;;  %v13620_v61 = vpop.f32.mrb[21].mxu0  ;;  %v1654_v62 = vsel %vm540_vm1, %v15239_v57, -inf  ;;  %v1651_v1 = vsel %vm540_vm1, %v15237_v54, -inf }
 0x3a3   :  { %1655 = vmax.xlane.f32.xlu1 %v1654_v62  ;;  %1652 = vmax.xlane.f32.xlu0 %v1651_v1  ;;  %v15283_v50 = vpop.permute.xlu0 %2088  ;;  %v15287_v53 = vpop.permute.xlu1 %2164 }
 0x3a5   :  { %v15245_v2 = vpop.f32.mrb[24].mxu1  ;;  %v15247_v5 = vpop.f32.mrb[22].mxu0 }
 0x3a6   :  { %v13625_v6 = vpop.f32.mrb[25].mxu1  ;;  %v13630_v9 = vpop.f32.mrb[23].mxu0  ;;  %v1660_v11 = vsel %vm540_vm1, %v15247_v5, -inf  ;;  %v1657_v15 = vsel %vm540_vm1, %v15245_v2, -inf }
 0x3a7   :  { %1661 = vmax.xlane.f32.xlu1 %v1660_v11  ;;  %1658 = vmax.xlane.f32.xlu0 %v1657_v15  ;;  %v15289_v58 = vpop.permute.xlu0 %2240  ;;  %v15291_v61 = vpop.permute.xlu1 %2316 }
 0x3a9   :  { %v15253_v16 = vpop.f32.mrb[26].mxu1  ;;  %v15255_v22 = vpop.f32.mrb[24].mxu0 }
 0x3aa   :  { %v13635_v24 = vpop.f32.mrb[27].mxu1  ;;  %v13640_v27 = vpop.f32.mrb[25].mxu0  ;;  %v1663_v29 = vsel %vm540_vm1, %v15253_v16, -inf  ;;  %v1666_v40 = vsel %vm540_vm1, %v15255_v22, -inf }
 0x3ab   :  { %1664 = vmax.xlane.f32.xlu0 %v1663_v29  ;;  %v15293_v62 = vpop.permute.xlu0 %2392  ;;  %v15295_v1 = vpop.permute.xlu1 %2468 }
 0x3ad   :  { %v15259_v36 = vpop.f32.mrb[28].mxu1 }
 0x3ae   :  { %v13645_v38 = vpop.f32.mrb[29].mxu1  ;;  %v1669_v42 = vsel %vm540_vm1, %v15259_v36, -inf }
 0x3af   :  { %v15297_v6 = vpop.permute.xlu0 %2544  ;;  %v15299_v9 = vpop.permute.xlu1 %2620 }
 0x3b3   :  { %v15301_v11 = vpop.permute.xlu0 %2850  ;;  %v15303_v15 = vpop.permute.xlu1 %2772 }
 0x3b4   :  { %17436 = vst [vmem:[#allocation19_spill] sm:$0xff] %v15301_v11 }
 0x3b7   :  { %v15305_v24 = vpop.permute.xlu0 %2696  ;;  %v15307_v27 = vpop.permute.xlu1 %2928 }
 0x3b8   :  { %2926 = vrot.lane.b32.xlu1 %v15097_v52, %s14839_s25  ;;  %17437 = vst [vmem:[#allocation20_spill] sm:$0xff] %v15307_v27 }
 0x3c1   :  { %2848 = vrot.lane.b32.xlu0 %v15084_v48, %s14839_s25 }
 0x3dc   :  { %1667 = vmax.xlane.f32.xlu1 %v1666_v40 }
 0x3e0   :  { %1670 = vmax.xlane.f32.xlu0 %v1669_v42 }
 0x3ed   :  { %3084 = vrot.lane.b32.xlu1 %v15001_v21, %s14838_s24 }
 0x3f1   :  { %3082 = vrot.lane.b32.xlu1 %v15114_v56, %s14839_s25 }
 0x3f5   :  { %3240 = vrot.lane.b32.xlu1 %v15009_v26, %s14838_s24 }
 0x3f6   :  { %3006 = vrot.lane.b32.xlu0 %v15003_v23, %s14838_s24 }
 0x3fa   :  { %3004 = vrot.lane.b32.xlu0 %v15093_v51, %s14839_s25 }
 0x3fe   :  { %3162 = vrot.lane.b32.xlu0 %v15011_v28, %s14838_s24 }
 0x420   :  { %v1632_v29 = vpop.xlane.xlu0 %1631 }
 0x421   :  { %v1672_v38 = vsub.f32 %v15209_v14, %v1632_v29 }
 0x423   :  { %v1686_v40 = vmul.f32 1.442695, %v1672_v38 }
 0x424   :  { %v1635_v42 = vpop.xlane.xlu1 %1634  ;;  %v1638_v13 = vpop.xlane.xlu0 %1637 }
 0x425   :  { %14422 = vpow2.f32 %v1686_v40  ;;  %v1673_v25 = vsub.f32 %v15213_v18, %v1635_v42  ;;  %v1674_v33 = vsub.f32 %v15215_v20, %v1638_v13 }
 0x427   :  { %v1688_v12 = vmul.f32 1.442695, %v1673_v25  ;;  %v1690_v51 = vmul.f32 1.442695, %v1674_v33 }
 0x428   :  { %v1644_v56 = vpop.xlane.xlu1 %1643  ;;  %v1641_v48 = vpop.xlane.xlu0 %1640 }
 0x429   :  { %14424 = vpow2.f32 %v1688_v12  ;;  %v1676_v52 = vsub.f32 %v15223_v34, %v1644_v56  ;;  %v1675_v27 = vsub.f32 %v15221_v31, %v1641_v48 }
 0x42a   :  { %14426 = vpow2.f32 %v1690_v51 }
 0x42b   :  { %v1694_v11 = vmul.f32 1.442695, %v1676_v52  ;;  %v1692_v14 = vmul.f32 1.442695, %v1675_v27 }
 0x42c   :  { %v1650_v29 = vpop.xlane.xlu1 %1649  ;;  %v1647_v38 = vpop.xlane.xlu0 %1646 }
 0x42d   :  { %14428 = vpow2.f32 %v1694_v11  ;;  %v1678_v40 = vsub.f32 %v15231_v46, %v1650_v29  ;;  %v1677_v18 = vsub.f32 %v15229_v44, %v1647_v38 }
 0x42e   :  { %14430 = vpow2.f32 %v1692_v14 }
 0x42f   :  { %v15316_v25 = vpop.eup %14422  ;;  %v1698_v33 = vmul.f32 1.442695, %v1678_v40  ;;  %v1696_v13 = vmul.f32 1.442695, %v1677_v18 }
 0x430   :  { %v1656_v12 = vpop.xlane.xlu1 %1655  ;;  %v1653_v20 = vpop.xlane.xlu0 %1652  ;;  %v1714_v48 = vsel %vm540_vm1, %v15316_v25, 0.0 }
 0x431   :  { %14432 = vpow2.f32 %v1698_v33  ;;  %v1680_v51 = vsub.f32 %v15239_v57, %v1656_v12  ;;  %v1679_v52 = vsub.f32 %v15237_v54, %v1653_v20  ;;  %1715 = vadd.xlane.f32.xlu1 %v1714_v48 }
 0x432   :  { %14434 = vpow2.f32 %v1696_v13 }
 0x433   :  { %v15322_v56 = vpop.eup %14424  ;;  %v1702_v31 = vmul.f32 1.442695, %v1680_v51  ;;  %v1700_v34 = vmul.f32 1.442695, %v1679_v52 }
 0x434   :  { %v15324_v44 = vpop.eup %14426  ;;  %v1662_v46 = vpop.xlane.xlu1 %1661  ;;  %v1717_v27 = vsel %vm540_vm1, %v15322_v56, 0.0 }
 0x435   :  { %v1659_v11 = vpop.xlane.xlu0 %1658  ;;  %14436 = vpow2.f32 %v1702_v31  ;;  %v1682_v42 = vsub.f32 %v15247_v5, %v1662_v46  ;;  %1718 = vadd.xlane.f32.xlu0 %v1717_v27  ;;  %v1720_v54 = vsel %vm540_vm1, %v15324_v44, 0.0 }
 0x436   :  { %v1681_v57 = vsub.f32 %v15245_v2, %v1659_v11  ;;  %14438 = vpow2.f32 %v1700_v34  ;;  %1721 = vadd.xlane.f32.xlu1 %v1720_v54 }
 0x437   :  { %v15332_v14 = vpop.eup %14428  ;;  %v1706_v29 = vmul.f32 1.442695, %v1682_v42 }
 0x438   :  { %v1704_v38 = vmul.f32 1.442695, %v1681_v57  ;;  %v15334_v40 = vpop.eup %14430  ;;  %v1726_v33 = vsel %vm540_vm1, %v15332_v14, 0.0 }
 0x439   :  { %v1665_v18 = vpop.xlane.xlu0 %1664  ;;  %14440 = vpow2.f32 %v1706_v29  ;;  %v1723_v2 = vsel %vm540_vm1, %v15334_v40, 0.0  ;;  %v15377_v29 = vpop.permute.xlu1 %2926 }
 0x43a   :  { %v1683_v5 = vsub.f32 %v15253_v16, %v1665_v18  ;;  %14442 = vpow2.f32 %v1704_v38  ;;  %1724 = vadd.xlane.f32.xlu0 %v1723_v2  ;;  %1727 = vadd.xlane.f32.xlu1 %v1726_v33 }
 0x43b   :  { %v15341_v13 = vpop.eup %14432 }
 0x43c   :  { %v1708_v12 = vmul.f32 1.442695, %v1683_v5  ;;  %v15343_v20 = vpop.eup %14434  ;;  %v1732_v48 = vsel %vm540_vm1, %v15341_v13, 0.0 }
 0x43d   :  { %v1729_v51 = vsel %vm540_vm1, %v15343_v20, 0.0  ;;  %v15381_v38 = vpop.permute.xlu0 %2848 }
 0x43e   :  { %14444 = vpow2.f32 %v1708_v12  ;;  %1730 = vadd.xlane.f32.xlu0 %v1729_v51  ;;  %1733 = vadd.xlane.f32.xlu1 %v1732_v48 }
 0x43f   :  { %v15349_v16 = vpop.eup %14436 }
 0x440   :  { %v15351_v52 = vpop.eup %14438  ;;  %v1738_v31 = vsel %vm540_vm1, %v15349_v16, 0.0 }
 0x441   :  { %v1735_v34 = vsel %vm540_vm1, %v15351_v52, 0.0 }
 0x442   :  { %1736 = vadd.xlane.f32.xlu0 %v1735_v34  ;;  %1739 = vadd.xlane.f32.xlu1 %v1738_v31 }
 0x443   :  { %v15357_v46 = vpop.eup %14440 }
 0x444   :  { %v15359_v11 = vpop.eup %14442  ;;  %v1744_v27 = vsel %vm540_vm1, %v15357_v46, 0.0 }
 0x445   :  { %v1741_v42 = vsel %vm540_vm1, %v15359_v11, 0.0 }
 0x446   :  { %1742 = vadd.xlane.f32.xlu0 %v1741_v42  ;;  %1745 = vadd.xlane.f32.xlu1 %v1744_v27 }
 0x448   :  { %v15365_v57 = vpop.eup %14444 }
 0x449   :  { %v1747_v54 = vsel %vm540_vm1, %v15365_v57, 0.0 }
 0x44a   :  { %1748 = vadd.xlane.f32.xlu0 %v1747_v54 }
 0x457   :  { %3238 = vrot.lane.b32.xlu1 %v15132_v60, %s14839_s25 }
 0x45b   :  { %3396 = vrot.lane.b32.xlu1 %v15017_v30, %s14838_s24 }
 0x460   :  { %3160 = vrot.lane.b32.xlu0 %v15111_v55, %s14839_s25 }
 0x464   :  { %3318 = vrot.lane.b32.xlu0 %v15019_v32, %s14838_s24 }
 0x468   :  { %3316 = vrot.lane.b32.xlu0 %v15129_v59, %s14839_s25 }
 0x469   :  { %v1668_v18 = vpop.xlane.xlu1 %1667 }
 0x46a   :  { %v1684_v33 = vsub.f32 %v15255_v22, %v1668_v18 }
 0x46c   :  { %3474 = vrot.lane.b32.xlu0 %v15027_v37, %s14838_s24  ;;  %v1710_v5 = vmul.f32 1.442695, %v1684_v33 }
 0x46d   :  { %v1671_v2 = vpop.xlane.xlu0 %1670  ;;  %v15435_v34 = vpop.permute.xlu1 %3084 }
 0x46e   :  { %v1685_v12 = vsub.f32 %v15259_v36, %v1671_v2  ;;  %14446 = vpow2.f32 %v1710_v5 }
 0x470   :  { %3472 = vrot.lane.b32.xlu0 %v15147_v63, %s14839_s25  ;;  %v1712_v48 = vmul.f32 1.442695, %v1685_v12 }
 0x471   :  { %v15439_v27 = vpop.permute.xlu0 %3006  ;;  %v15441_v42 = vpop.permute.xlu1 %3082 }
 0x472   :  { %14448 = vpow2.f32 %v1712_v48 }
 0x474   :  { %3630 = vrot.lane.b32.xlu0 %v15035_v41, %s14838_s24 }
 0x475   :  { %v15445_v54 = vpop.permute.xlu0 %3004  ;;  %v15449_v18 = vpop.permute.xlu1 %3240 }
 0x478   :  { %3628 = vrot.lane.b32.xlu0 %v15168_v4, %s14839_s25  ;;  %v15393_v22 = vpop.eup %14446 }
 0x479   :  { %v1750_v36 = vsel %vm540_vm1, %v15393_v22, 0.0  ;;  %v15453_v33 = vpop.permute.xlu0 %3162 }
 0x47c   :  { %3786 = vrot.lane.b32.xlu0 %v15043_v45, %s14838_s24  ;;  %v15399_v51 = vpop.eup %14448 }
 0x47d   :  { %v1753_v31 = vsel %vm540_vm1, %v15399_v51, 0.0 }
 0x47f   :  { %1751 = vadd.xlane.f32.xlu1 %v1750_v36 }
 0x480   :  { %3784 = vrot.lane.b32.xlu0 %v15186_v8, %s14839_s25 }
 0x483   :  { %1754 = vadd.xlane.f32.xlu1 %v1753_v31 }
 0x484   :  { %4094 = vrot.lane.b32.xlu0 %v14995_v19, %s14840_s26 }
 0x488   :  { %4246 = vrot.lane.b32.xlu0 %v15003_v23, %s14840_s26 }
 0x48c   :  { %4398 = vrot.lane.b32.xlu0 %v15011_v28, %s14840_s26 }
 0x490   :  { %4550 = vrot.lane.b32.xlu0 %v15019_v32, %s14840_s26 }
 0x494   :  { %4702 = vrot.lane.b32.xlu0 %v15027_v37, %s14840_s26  ;;  %3394 = vrot.lane.b32.xlu1 %v15150_v0, %s14839_s25 }
 0x498   :  { %4854 = vrot.lane.b32.xlu0 %v15035_v41, %s14840_s26  ;;  %3552 = vrot.lane.b32.xlu1 %v15025_v35, %s14838_s24 }
 0x49c   :  { %5006 = vrot.lane.b32.xlu0 %v15043_v45, %s14840_s26  ;;  %3550 = vrot.lane.b32.xlu1 %v15165_v3, %s14839_s25 }
 0x4a0   :  { %5160 = vrot.lane.b32.xlu0 %v14995_v19, %s14841_s27  ;;  %3708 = vrot.lane.b32.xlu1 %v15033_v39, %s14838_s24 }
 0x4a4   :  { %3706 = vrot.lane.b32.xlu1 %v15183_v7, %s14839_s25 }
 0x4a8   :  { %3864 = vrot.lane.b32.xlu1 %v15041_v43, %s14838_s24 }
 0x4ac   :  { %3862 = vrot.lane.b32.xlu1 %v15198_v10, %s14839_s25 }
 0x4b0   :  { %4170 = vrot.lane.b32.xlu1 %v14993_v17, %s14840_s26 }
 0x4b4   :  { %4322 = vrot.lane.b32.xlu1 %v15001_v21, %s14840_s26 }
 0x4b8   :  { %4474 = vrot.lane.b32.xlu1 %v15009_v26, %s14840_s26 }
 0x4bc   :  { %4626 = vrot.lane.b32.xlu1 %v15017_v30, %s14840_s26 }
 0x4be   :  { %v1716_v5 = vpop.xlane.xlu1 %1715 }
 0x4bf   :  { %14450 = vrcp.f32 %v1716_v5 }
 0x4c0   :  { %4778 = vrot.lane.b32.xlu1 %v15025_v35, %s14840_s26 }
 0x4c2   :  { %v1719_v2 = vpop.xlane.xlu0 %1718 }
 0x4c3   :  { %14452 = vrcp.f32 %v1719_v2  ;;  %v1722_v12 = vpop.xlane.xlu1 %1721 }
 0x4c4   :  { %14454 = vrcp.f32 %v1722_v12  ;;  %4930 = vrot.lane.b32.xlu1 %v15033_v39, %s14840_s26  ;;  %v17438_v12 = vmov 0.0  }
 0x4c7   :  { %v1725_v48 = vpop.xlane.xlu0 %1724  ;;  %v1728_v36 = vpop.xlane.xlu1 %1727 }
 0x4c8   :  { %14456 = vrcp.f32 %v1725_v48  ;;  %5082 = vrot.lane.b32.xlu1 %v15041_v43, %s14840_s26 }
 0x4c9   :  { %v14451_v31 = vpop.eup %14450  ;;  %14458 = vrcp.f32 %v1728_v36 }
 0x4ca   :  { %v1770_v5 = vmul.f32 %v14451_v31, %v15316_v25 }
 0x4cb   :  { %v1731_v10 = vpop.xlane.xlu0 %1730  ;;  %v1734_v7 = vpop.xlane.xlu1 %1733 }
 0x4cc   :  { %14460 = vrcp.f32 %v1731_v10  ;;  %5238 = vrot.lane.b32.xlu1 %v14993_v17, %s14841_s27  ;;  %13649 = vmatmul.mubr.msk.f32.vlgmr.msra.gmra.mrb[26].mxu0 %vm540_vm1, %v1770_v5 }
 0x4cd   :  { %v14453_v2 = vpop.eup %14452  ;;  %14462 = vrcp.f32 %v1734_v7  ;;  %13657 = vmatpush3.msra.mxu0 %v15277_v47  ;;  %13658 = vmatprep.mubr.msk.f32.mxu0 %vm14835_vm0, %v17438_v12 }
 0x4ce   :  { %v14455_v48 = vpop.eup %14454  ;;  %13666 = vmatprep.subr.mxu0 %v17438_v12  ;;  %v1771_v25 = vmul.f32 %v14453_v2, %v15322_v56 }
 0x4cf   :  { %v1737_v36 = vpop.xlane.xlu0 %1736  ;;  %v1740_v31 = vpop.xlane.xlu1 %1739  ;;  %v1772_v10 = vmul.f32 %v14455_v48, %v15324_v44 }
 0x4d0   :  { %14464 = vrcp.f32 %v1737_v36  ;;  %13654 = vmatmul.mubr.msk.f32.vlgmr.msra.gmra.mrb[30].mxu1 %vm540_vm1, %v1771_v25 }
 0x4d1   :  { %14466 = vrcp.f32 %v1740_v31  ;;  %13659 = vmatmul.mubr.msk.f32.vlgmr.msra.gmra.mrb[28].mxu0 %vm540_vm1, %v1772_v10  ;;  %13662 = vmatpush3.msra.mxu1 %v15281_v49 }
 0x4d2   :  { %v14457_v7 = vpop.eup %14456  ;;  %13667 = vmatpush3.msra.mxu0 %v15283_v50  ;;  %13663 = vmatprep.mubr.msk.f32.mxu1 %vm14835_vm0, %v17438_v12 }
 0x4d3   :  { %v14459_v47 = vpop.eup %14458  ;;  %v1743_v56 = vpop.xlane.xlu0 %1742  ;;  %13668 = vmatprep.mubr.msk.f32.mxu0 %vm14835_vm0, %v17438_v12  ;;  %13671 = vmatprep.subr.mxu1 %v17438_v12  ;;  %v1773_v44 = vmul.f32 %v14457_v7, %v15334_v40 }
 0x4d4   :  { %v1746_v5 = vpop.xlane.xlu1 %1745  ;;  %14468 = vrcp.f32 %v1743_v56  ;;  %13676 = vmatprep.subr.mxu0 %v17438_v12  ;;  %v1774_v49 = vmul.f32 %v14459_v47, %v15332_v14 }
 0x4d5   :  { %14470 = vrcp.f32 %v1746_v5  ;;  %13664 = vmatmul.mubr.msk.f32.vlgmr.msra.gmra.mrb[32].mxu1 %vm540_vm1, %v1773_v44  ;;  %v17439_v44 = vld [vmem:[#allocation19_spill] sm:$0xff] }
 0x4d6   :  { %v14461_v50 = vpop.eup %14460  ;;  %13669 = vmatmul.mubr.msk.f32.vlgmr.msra.gmra.mrb[30].mxu0 %vm540_vm1, %v1774_v49  ;;  %13672 = vmatpush3.msra.mxu1 %v15287_v53 }
 0x4d7   :  { %v14463_v2 = vpop.eup %14462  ;;  %13677 = vmatpush3.msra.mxu0 %v15289_v58  ;;  %v1749_v48 = vpop.xlane.xlu0 %1748  ;;  %13673 = vmatprep.mubr.msk.f32.mxu1 %vm14835_vm0, %v17438_v12  ;;  %v1775_v40 = vmul.f32 %v14461_v50, %v15343_v20 }
 0x4d8   :  { %14472 = vrcp.f32 %v1749_v48  ;;  %13678 = vmatprep.mubr.msk.f32.mxu0 %vm14835_vm0, %v17438_v12  ;;  %13681 = vmatprep.subr.mxu1 %v17438_v12  ;;  %v1776_v14 = vmul.f32 %v14463_v2, %v15341_v13 }
 0x4d9   :  { %13686 = vmatprep.subr.mxu0 %v17438_v12  ;;  %13674 = vmatmul.mubr.msk.f32.vlgmr.msra.gmra.mrb[34].mxu1 %vm540_vm1, %v1775_v40 }
 0x4da   :  { %v14465_v53 = vpop.eup %14464  ;;  %13679 = vmatmul.mubr.msk.f32.vlgmr.msra.gmra.mrb[32].mxu0 %vm540_vm1, %v1776_v14  ;;  %13682 = vmatpush3.msra.mxu1 %v15291_v61 }
 0x4db   :  { %v14467_v58 = vpop.eup %14466  ;;  %13687 = vmatpush3.msra.mxu0 %v15293_v62  ;;  %13683 = vmatprep.mubr.msk.f32.mxu1 %vm14835_vm0, %v17438_v12  ;;  %v1777_v20 = vmul.f32 %v14465_v53, %v15351_v52 }
 0x4dc   :  { %13688 = vmatprep.mubr.msk.f32.mxu0 %vm14835_vm0, %v17438_v12  ;;  %13691 = vmatprep.subr.mxu1 %v17438_v12  ;;  %v1778_v13 = vmul.f32 %v14467_v58, %v15349_v16 }
 0x4dd   :  { %13696 = vmatprep.subr.mxu0 %v17438_v12  ;;  %13684 = vmatmul.mubr.msk.f32.vlgmr.msra.gmra.mrb[36].mxu1 %vm540_vm1, %v1777_v20 }
 0x4de   :  { %v14469_v61 = vpop.eup %14468  ;;  %13689 = vmatmul.mubr.msk.f32.vlgmr.msra.gmra.mrb[34].mxu0 %vm540_vm1, %v1778_v13  ;;  %13692 = vmatpush3.msra.mxu1 %v15295_v1 }
 0x4df   :  { %v14471_v62 = vpop.eup %14470  ;;  %13697 = vmatpush3.msra.mxu0 %v15297_v6  ;;  %13693 = vmatprep.mubr.msk.f32.mxu1 %vm14835_vm0, %v17438_v12  ;;  %v1779_v52 = vmul.f32 %v14469_v61, %v15359_v11 }
 0x4e0   :  { %13698 = vmatprep.mubr.msk.f32.mxu0 %vm14835_vm0, %v17438_v12  ;;  %13701 = vmatprep.subr.mxu1 %v17438_v12  ;;  %v1780_v16 = vmul.f32 %v14471_v62, %v15357_v46 }
 0x4e1   :  { %13706 = vmatprep.subr.mxu0 %v17438_v12  ;;  %13694 = vmatmul.mubr.msk.f32.vlgmr.msra.gmra.mrb[38].mxu1 %vm540_vm1, %v1779_v52 }
 0x4e2   :  { %v14473_v1 = vpop.eup %14472  ;;  %13699 = vmatmul.mubr.msk.f32.vlgmr.msra.gmra.mrb[36].mxu0 %vm540_vm1, %v1780_v16  ;;  %13702 = vmatpush3.msra.mxu1 %v15299_v9  ;;  %v3161_v9 = vpop.permute.xlu0 %3160 }
 0x4e3   :  { %13707 = vmatpush3.msra.mxu0 %v15305_v24  ;;  %13703 = vmatprep.mubr.msk.f32.mxu1 %vm14835_vm0, %v17438_v12  ;;  %v1781_v6 = vmul.f32 %v14473_v1, %v15365_v57  ;;  %v3239_v24 = vpop.permute.xlu1 %3238 }
 0x4e4   :  { %13711 = vmatprep.subr.mxu1 %v17438_v12  ;;  %13708 = vmatprep.mubr.msk.f32.mxu0 %vm14835_vm0, %v17438_v12 }
 0x4e5   :  { %13704 = vmatmul.mubr.msk.f32.vlgmr.msra.gmra.mrb[40].mxu1 %vm540_vm1, %v1781_v6  ;;  %13716 = vmatprep.subr.mxu0 %v17438_v12 }
 0x4e6   :  { %13712 = vmatpush3.msra.mxu1 %v15303_v15  ;;  %13713 = vmatprep.mubr.msk.f32.mxu1 %vm14835_vm0, %v17438_v12  ;;  %v3319_v46 = vpop.permute.xlu0 %3318 }
 0x4e7   :  { %13721 = vmatprep.subr.mxu1 %v17438_v12  ;;  %v3397_v11 = vpop.permute.xlu1 %3396 }
 0x4ea   :  { %v3317_v57 = vpop.permute.xlu0 %3316 }
 0x4ee   :  { %v3475_v31 = vpop.permute.xlu0 %3474 }
 0x4f2   :  { %v3473_v47 = vpop.permute.xlu0 %3472 }
 0x4f6   :  { %v3631_v2 = vpop.permute.xlu0 %3630 }
 0x50c   :  { %v1752_v25 = vpop.xlane.xlu1 %1751 }
 0x50d   :  { %14474 = vrcp.f32 %v1752_v25 }
 0x510   :  { %v1755_v36 = vpop.xlane.xlu1 %1754 }
 0x511   :  { %14476 = vrcp.f32 %v1755_v36 }
 0x514   :  { %v3395_v10 = vpop.permute.xlu1 %3394 }
 0x517   :  { %v14475_v7 = vpop.eup %14474 }
 0x518   :  { %v3553_v56 = vpop.permute.xlu1 %3552  ;;  %v1782_v15 = vmul.f32 %v14475_v7, %v15393_v22  ;;  %v17440_v22 = vld [vmem:[#allocation20_spill] sm:$0xff] }
 0x51a   :  { %13709 = vmatmul.mubr.msk.f32.vlgmr.msra.gmra.mrb[38].mxu0 %vm540_vm1, %v1782_v15 }
 0x51b   :  { %v14477_v5 = vpop.eup %14476  ;;  %13717 = vmatpush3.xpose.msk.msra.mxu0 %vm540_vm1, %v17439_v44  ;;  %13718 = vmatprep.mubr.msk.f32.mxu0 %vm14835_vm0, %v17438_v12 }
 0x51c   :  { %v3551_v49 = vpop.permute.xlu1 %3550  ;;  %13726 = vmatprep.subr.mxu0 %v17438_v12  ;;  %v1783_v50 = vmul.f32 %v14477_v5, %v15399_v51 }
 0x51e   :  { %13714 = vmatmul.mubr.msk.f32.vlgmr.msra.gmra.mrb[42].mxu1 %vm540_vm1, %v1783_v50  ;;  %13719 = vmatmul.mubr.msk.f32.vlgmr.msra.gmra.mrb[40].mxu0 %vm540_vm1, %v15381_v38  ;;  %v3629_v38 = vpop.permute.xlu0 %3628 }
 0x51f   :  { %13722 = vmatpush3.xpose.msk.msra.mxu1 %vm540_vm1, %v17440_v22  ;;  %13727 = vmatpush3.xpose.msk.msra.mxu0 %vm540_vm1, %v15439_v27 }
 0x520   :  { %13723 = vmatprep.mubr.msk.f32.mxu1 %vm14835_vm0, %v17438_v12  ;;  %13728 = vmatprep.mubr.msk.f32.mxu0 %vm14835_vm0, %v17438_v12  ;;  %v3709_v51 = vpop.permute.xlu1 %3708 }
 0x521   :  { %13731 = vmatprep.subr.mxu1 %v17438_v12  ;;  %13736 = vmatprep.subr.mxu0 %v17438_v12 }
 0x522   :  { %13724 = vmatmul.mubr.msk.f32.vlgmr.msra.gmra.mrb[44].mxu1 %vm540_vm1, %v15377_v29  ;;  %13729 = vmatmul.mubr.msk.f32.vlgmr.msra.gmra.mrb[42].mxu0 %vm540_vm1, %v15445_v54 }
 0x523   :  { %13732 = vmatpush3.xpose.msk.msra.mxu1 %vm540_vm1, %v15435_v34  ;;  %13737 = vmatpush3.xpose.msk.msra.mxu0 %vm540_vm1, %v15453_v33  ;;  %v3787_v34 = vpop.permute.xlu0 %3786 }
 0x524   :  { %13733 = vmatprep.mubr.msk.f32.mxu1 %vm14835_vm0, %v17438_v12  ;;  %13738 = vmatprep.mubr.msk.f32.mxu0 %vm14835_vm0, %v17438_v12  ;;  %v3707_v29 = vpop.permute.xlu1 %3706 }
 0x525   :  { %13741 = vmatprep.subr.mxu1 %v17438_v12  ;;  %13746 = vmatprep.subr.mxu0 %v17438_v12 }
 0x526   :  { %13734 = vmatmul.mubr.msk.f32.vlgmr.msra.gmra.mrb[46].mxu1 %vm540_vm1, %v15441_v42  ;;  %13739 = vmatmul.mubr.msk.f32.vlgmr.msra.gmra.mrb[44].mxu0 %vm540_vm1, %v3161_v9 }
 0x527   :  { %13742 = vmatpush3.xpose.msk.msra.mxu1 %vm540_vm1, %v15449_v18  ;;  %13747 = vmatpush3.xpose.msk.msra.mxu0 %vm540_vm1, %v3319_v46  ;;  %v3785_v42 = vpop.permute.xlu0 %3784 }
 0x528   :  { %13743 = vmatprep.mubr.msk.f32.mxu1 %vm14835_vm0, %v17438_v12  ;;  %13748 = vmatprep.mubr.msk.f32.mxu0 %vm14835_vm0, %v17438_v12  ;;  %v3865_v27 = vpop.permute.xlu1 %3864 }
 0x529   :  { %13751 = vmatprep.subr.mxu1 %v17438_v12  ;;  %13756 = vmatprep.subr.mxu0 %v17438_v12 }
 0x52a   :  { %13744 = vmatmul.mubr.msk.f32.vlgmr.msra.gmra.mrb[48].mxu1 %vm540_vm1, %v3239_v24  ;;  %13749 = vmatmul.mubr.msk.f32.vlgmr.msra.gmra.mrb[46].mxu0 %vm540_vm1, %v3317_v57 }
 0x52b   :  { %13752 = vmatpush3.xpose.msk.msra.mxu1 %vm540_vm1, %v3397_v11  ;;  %13757 = vmatpush3.xpose.msk.msra.mxu0 %vm540_vm1, %v3475_v31  ;;  %v4095_v18 = vpop.permute.xlu0 %4094 }
 0x52c   :  { %13753 = vmatprep.mubr.msk.f32.mxu1 %vm14835_vm0, %v17438_v12  ;;  %13758 = vmatprep.mubr.msk.f32.mxu0 %vm14835_vm0, %v17438_v12  ;;  %v3863_v54 = vpop.permute.xlu1 %3862 }
 0x52d   :  { %13761 = vmatprep.subr.mxu1 %v17438_v12  ;;  %13766 = vmatprep.subr.mxu0 %v17438_v12 }
 0x52e   :  { %13754 = vmatmul.mubr.msk.f32.vlgmr.msra.gmra.mrb[50].mxu1 %vm540_vm1, %v3395_v10  ;;  %13759 = vmatmul.mubr.msk.f32.vlgmr.msra.gmra.mrb[48].mxu0 %vm540_vm1, %v3473_v47 }
 0x52f   :  { %13762 = vmatpush3.xpose.msk.msra.mxu1 %vm540_vm1, %v3553_v56  ;;  %13767 = vmatpush3.xpose.msk.msra.mxu0 %vm540_vm1, %v3631_v2 }
 0x530   :  { %13763 = vmatprep.mubr.msk.f32.mxu1 %vm14835_vm0, %v17438_v12  ;;  %13768 = vmatprep.mubr.msk.f32.mxu0 %vm14835_vm0, %v17438_v12  ;;  %v4171_v33 = vpop.permute.xlu1 %4170 }
 0x531   :  { %13771 = vmatprep.subr.mxu1 %v17438_v12  ;;  %13776 = vmatprep.subr.mxu0 %v17438_v12 }
 0x532   :  { %13764 = vmatmul.mubr.msk.f32.vlgmr.msra.gmra.mrb[52].mxu1 %vm540_vm1, %v3551_v49  ;;  %13769 = vmatmul.mubr.msk.f32.vlgmr.msra.gmra.mrb[50].mxu0 %vm540_vm1, %v3629_v38 }
 0x533   :  { %13772 = vmatpush3.xpose.msk.msra.mxu1 %vm540_vm1, %v3709_v51  ;;  %13777 = vmatpush3.xpose.msk.msra.mxu0 %vm540_vm1, %v3787_v34 }
 0x534   :  { %13773 = vmatprep.mubr.msk.f32.mxu1 %vm14835_vm0, %v17438_v12  ;;  %13778 = vmatprep.mubr.msk.f32.mxu0 %vm14835_vm0, %v17438_v12 }
 0x535   :  { %13781 = vmatprep.subr.mxu1 %v17438_v12  ;;  %13786 = vmatprep.subr.mxu0 %v17438_v12 }
 0x536   :  { %13774 = vmatmul.mubr.msk.f32.vlgmr.msra.gmra.mrb[54].mxu1 %vm540_vm1, %v3707_v29  ;;  %13779 = vmatmul.mubr.msk.f32.vlgmr.msra.gmra.mrb[52].mxu0 %vm540_vm1, %v3785_v42 }
 0x537   :  { %13782 = vmatpush3.xpose.msk.msra.mxu1 %vm540_vm1, %v3865_v27  ;;  %13787 = vmatpush3.msra.mxu0 %v4095_v18 }
 0x538   :  { %13783 = vmatprep.mubr.msk.f32.mxu1 %vm14835_vm0, %v17438_v12  ;;  %13791 = vmatprep.subr.mxu1 %v17438_v12 }
 0x539   :  { %13788 = vmatprep.mubr.msk.f32.mxu0 %vm14835_vm0, %v17438_v12  ;;  %13796 = vmatprep.subr.mxu0 %v17438_v12 }
 0x53a   :  { %13784 = vmatmul.mubr.msk.f32.vlgmr.msra.gmra.mrb[56].mxu1 %vm540_vm1, %v3863_v54 }
 0x53b   :  { %13792 = vmatpush3.msra.mxu1 %v4171_v33  ;;  %13793 = vmatprep.mubr.msk.f32.mxu1 %vm14835_vm0, %v17438_v12 }
 0x53c   :  { %13801 = vmatprep.subr.mxu1 %v17438_v12 }
 0x59f   :  { %v15625_v48 = vpop.f32.mrb[26].mxu0 }
 0x5a0   :  { %17441 = vst [vmem:[#allocation19_spill] sm:$0xff] %v15625_v48  ;;  %v13650_v40 = vpop.f32.mrb[27].mxu0 }
 0x5a3   :  { %v15627_v14 = vpop.f32.mrb[30].mxu1 }
 0x5a4   :  { %17442 = vst [vmem:[#allocation20_spill] sm:$0xff] %v15627_v14  ;;  %v15629_v53 = vpop.f32.mrb[28].mxu0  ;;  %v13655_v58 = vpop.f32.mrb[31].mxu1 }
 0x5a5   :  { %17443 = vst [vmem:[#allocation21_spill] sm:$0xff] %v15629_v53  ;;  %v13660_v20 = vpop.f32.mrb[29].mxu0 }
 0x5a8   :  { %v15631_v13 = vpop.f32.mrb[32].mxu1 }
 0x5a9   :  { %17444 = vst [vmem:[#allocation22_spill] sm:$0xff] %v15631_v13  ;;  %v15633_v61 = vpop.f32.mrb[30].mxu0  ;;  %v13665_v62 = vpop.f32.mrb[33].mxu1 }
 0x5aa   :  { %17445 = vst [vmem:[#allocation23_spill] sm:$0xff] %v15633_v61  ;;  %v13670_v52 = vpop.f32.mrb[31].mxu0 }
 0x5ac   :  { %v15635_v16 = vpop.f32.mrb[34].mxu1 }
 0x5ad   :  { %17446 = vst [vmem:[#allocation24_spill] sm:$0xff] %v15635_v16  ;;  %v15637_v1 = vpop.f32.mrb[32].mxu0  ;;  %v13675_v6 = vpop.f32.mrb[35].mxu1 }
 0x5ae   :  { %17447 = vst [vmem:[#allocation25_spill] sm:$0xff] %v15637_v1  ;;  %v13680_v9 = vpop.f32.mrb[33].mxu0 }
 0x5b0   :  { %v15639_v24 = vpop.f32.mrb[36].mxu1 }
 0x5b1   :  { %17448 = vst [vmem:[#allocation26_spill] sm:$0xff] %v15639_v24  ;;  %v15641_v46 = vpop.f32.mrb[34].mxu0  ;;  %v13685_v11 = vpop.f32.mrb[37].mxu1 }
 0x5b2   :  { %17449 = vst [vmem:[#allocation27_spill] sm:$0xff] %v15641_v46  ;;  %v13690_v57 = vpop.f32.mrb[35].mxu0 }
 0x5b4   :  { %v15643_v25 = vpop.f32.mrb[38].mxu1 }
 0x5b5   :  { %17450 = vst [vmem:[#allocation28_spill] sm:$0xff] %v15643_v25  ;;  %v15645_v36 = vpop.f32.mrb[36].mxu0  ;;  %v13695_v31 = vpop.f32.mrb[39].mxu1 }
 0x5b6   :  { %17451 = vst [vmem:[#allocation29_spill] sm:$0xff] %v15645_v36  ;;  %v13700_v10 = vpop.f32.mrb[37].mxu0 }
 0x5b8   :  { %v15647_v7 = vpop.f32.mrb[40].mxu1 }
 0x5b9   :  { %17452 = vst [vmem:[#allocation30_spill] sm:$0xff] %v15647_v7  ;;  %v13705_v47 = vpop.f32.mrb[41].mxu1 }
 0x5ed   :  { %v15649_v56 = vpop.f32.mrb[38].mxu0 }
 0x5ee   :  { %17453 = vst [vmem:[#allocation31_spill] sm:$0xff] %v15649_v56  ;;  %v13710_v15 = vpop.f32.mrb[39].mxu0 }
 0x5f1   :  { %v15651_v5 = vpop.f32.mrb[42].mxu1  ;;  %v15653_v44 = vpop.f32.mrb[40].mxu0 }
 0x5f2   :  { %17454 = vst [vmem:[#allocation32_spill] sm:$0xff] %v15651_v5  ;;  %v13715_v49 = vpop.f32.mrb[43].mxu1  ;;  %v13720_v50 = vpop.f32.mrb[41].mxu0  ;;  %v3940_v2 = vsel %vm540_vm1, %v15653_v44, -inf }
 0x5f3   :  { %3941 = vmax.xlane.f32.xlu0 %v3940_v2 }
 0x5f5   :  { %v15657_v22 = vpop.f32.mrb[44].mxu1  ;;  %v15659_v51 = vpop.f32.mrb[42].mxu0 }
 0x5f6   :  { %v13725_v38 = vpop.f32.mrb[45].mxu1  ;;  %v13730_v29 = vpop.f32.mrb[43].mxu0  ;;  %v3943_v34 = vsel %vm540_vm1, %v15657_v22, -inf  ;;  %v3946_v27 = vsel %vm540_vm1, %v15659_v51, -inf }
 0x5f7   :  { %3944 = vmax.xlane.f32.xlu1 %v3943_v34  ;;  %3947 = vmax.xlane.f32.xlu0 %v3946_v27 }
 0x5f9   :  { %v15665_v42 = vpop.f32.mrb[46].mxu1  ;;  %v15667_v54 = vpop.f32.mrb[44].mxu0 }
 0x5fa   :  { %v13735_v18 = vpop.f32.mrb[47].mxu1  ;;  %v13740_v33 = vpop.f32.mrb[45].mxu0  ;;  %v3949_v40 = vsel %vm540_vm1, %v15665_v42, -inf  ;;  %v3952_v58 = vsel %vm540_vm1, %v15667_v54, -inf }
 0x5fb   :  { %3950 = vmax.xlane.f32.xlu0 %v3949_v40  ;;  %3953 = vmax.xlane.f32.xlu1 %v3952_v58 }
 0x5fd   :  { %v15673_v20 = vpop.f32.mrb[48].mxu1  ;;  %v15675_v62 = vpop.f32.mrb[46].mxu0 }
 0x5fe   :  { %v13745_v52 = vpop.f32.mrb[49].mxu1  ;;  %v13750_v6 = vpop.f32.mrb[47].mxu0  ;;  %v3955_v9 = vsel %vm540_vm1, %v15673_v20, -inf  ;;  %v3958_v11 = vsel %vm540_vm1, %v15675_v62, -inf }
 0x5ff   :  { %3956 = vmax.xlane.f32.xlu0 %v3955_v9  ;;  %3959 = vmax.xlane.f32.xlu1 %v3958_v11  ;;  %v17455_v11 = vld [vmem:[#allocation13_spill] sm:$0xff] }
 0x601   :  { %v15681_v57 = vpop.f32.mrb[50].mxu1  ;;  %v15683_v31 = vpop.f32.mrb[48].mxu0 }
 0x602   :  { %v13755_v10 = vpop.f32.mrb[51].mxu1  ;;  %v13760_v47 = vpop.f32.mrb[49].mxu0  ;;  %v3961_v15 = vsel %vm540_vm1, %v15681_v57, -inf  ;;  %v3964_v49 = vsel %vm540_vm1, %v15683_v31, -inf }
 0x603   :  { %3962 = vmax.xlane.f32.xlu0 %v3961_v15  ;;  %3965 = vmax.xlane.f32.xlu1 %v3964_v49  ;;  %v17456_v10 = vld [vmem:[#allocation11_spill] sm:$0xff]  ;;  %v17457_v49 = vld [vmem:[#allocation14_spill] sm:$0xff] }
 0x605   :  { %v15689_v50 = vpop.f32.mrb[52].mxu1  ;;  %v15691_v2 = vpop.f32.mrb[50].mxu0 }
 0x606   :  { %v13765_v38 = vpop.f32.mrb[53].mxu1  ;;  %v13770_v29 = vpop.f32.mrb[51].mxu0  ;;  %v3967_v34 = vsel %vm540_vm1, %v15689_v50, -inf  ;;  %v3970_v27 = vsel %vm540_vm1, %v15691_v2, -inf }
 0x607   :  { %3968 = vmax.xlane.f32.xlu0 %v3967_v34  ;;  %3971 = vmax.xlane.f32.xlu1 %v3970_v27  ;;  %v15721_v38 = vpop.permute.xlu0 %4246  ;;  %v17458_v29 = vld [vmem:[#allocation12_spill] sm:$0xff]  ;;  %v15725_v34 = vpop.permute.xlu1 %4322 }
 0x609   :  { %v15697_v18 = vpop.f32.mrb[54].mxu1  ;;  %v15699_v33 = vpop.f32.mrb[52].mxu0 }
 0x60a   :  { %v13775_v40 = vpop.f32.mrb[55].mxu1  ;;  %v13780_v58 = vpop.f32.mrb[53].mxu0  ;;  %v3973_v52 = vsel %vm540_vm1, %v15697_v18, -inf  ;;  %v3976_v47 = vsel %vm540_vm1, %v15699_v33, -inf }
 0x60b   :  { %3974 = vmax.xlane.f32.xlu0 %v3973_v52  ;;  %v15727_v27 = vpop.permute.xlu0 %4398  ;;  %v15731_v40 = vpop.permute.xlu1 %4474 }
 0x60d   :  { %v15703_v6 = vpop.f32.mrb[56].mxu1 }
 0x60e   :  { %v13785_v9 = vpop.f32.mrb[57].mxu1  ;;  %v3979_v15 = vsel %vm540_vm1, %v15703_v6, -inf }
 0x60f   :  { %v15733_v58 = vpop.permute.xlu0 %4550  ;;  %v15735_v52 = vpop.permute.xlu1 %4626 }
 0x613   :  { %v15737_v9 = vpop.permute.xlu0 %4702 }
 0x618   :  { %5236 = vrot.lane.b32.xlu1 %v17455_v11, %s14842_s28 }
 0x621   :  { %5158 = vrot.lane.b32.xlu0 %v17456_v10, %s14842_s28 }
 0x63c   :  { %3977 = vmax.xlane.f32.xlu1 %v3976_v47  ;;  %v15739_v47 = vpop.permute.xlu1 %4778 }
 0x640   :  { %3980 = vmax.xlane.f32.xlu0 %v3979_v15  ;;  %v15741_v15 = vpop.permute.xlu0 %4854  ;;  %v15743_v5 = vpop.permute.xlu1 %4930 }
 0x644   :  { %v15745_v7 = vpop.permute.xlu0 %5006  ;;  %v15747_v25 = vpop.permute.xlu1 %5082 }
 0x648   :  { %v15749_v46 = vpop.permute.xlu0 %5160  ;;  %v15751_v56 = vpop.permute.xlu1 %5238 }
 0x649   :  { %17459 = vst [vmem:[#allocation33_spill] sm:$0xff] %v15751_v56 }
 0x64d   :  { %5394 = vrot.lane.b32.xlu1 %v15001_v21, %s14841_s27 }
 0x651   :  { %5392 = vrot.lane.b32.xlu1 %v17457_v49, %s14842_s28 }
 0x655   :  { %5550 = vrot.lane.b32.xlu1 %v15009_v26, %s14841_s27 }
 0x656   :  { %5316 = vrot.lane.b32.xlu0 %v15003_v23, %s14841_s27 }
 0x65a   :  { %5314 = vrot.lane.b32.xlu0 %v17458_v29, %s14842_s28 }
 0x65e   :  { %5472 = vrot.lane.b32.xlu0 %v15011_v28, %s14841_s27 }
 0x680   :  { %v3942_v36 = vpop.xlane.xlu0 %3941 }
 0x681   :  { %v3982_v24 = vsub.f32 %v15653_v44, %v3942_v36 }
 0x683   :  { %v3996_v1 = vmul.f32 1.442695, %v3982_v24 }
 0x684   :  { %v3945_v16 = vpop.xlane.xlu1 %3944  ;;  %v3948_v61 = vpop.xlane.xlu0 %3947 }
 0x685   :  { %14478 = vpow2.f32 %v3996_v1  ;;  %v3983_v13 = vsub.f32 %v15657_v22, %v3945_v16  ;;  %v3984_v53 = vsub.f32 %v15659_v51, %v3948_v61 }
 0x687   :  { %v3998_v14 = vmul.f32 1.442695, %v3983_v13  ;;  %v4000_v48 = vmul.f32 1.442695, %v3984_v53 }
 0x688   :  { %v3951_v29 = vpop.xlane.xlu0 %3950  ;;  %v3954_v49 = vpop.xlane.xlu1 %3953 }
 0x689   :  { %14480 = vpow2.f32 %v3998_v14  ;;  %v3985_v10 = vsub.f32 %v15665_v42, %v3951_v29  ;;  %v3986_v11 = vsub.f32 %v15667_v54, %v3954_v49 }
 0x68a   :  { %14482 = vpow2.f32 %v4000_v48 }
 0x68b   :  { %v4002_v56 = vmul.f32 1.442695, %v3985_v10  ;;  %v4004_v36 = vmul.f32 1.442695, %v3986_v11 }
 0x68c   :  { %v3957_v24 = vpop.xlane.xlu0 %3956  ;;  %v3960_v44 = vpop.xlane.xlu1 %3959 }
 0x68d   :  { %14484 = vpow2.f32 %v4002_v56  ;;  %v3987_v1 = vsub.f32 %v15673_v20, %v3957_v24  ;;  %v3988_v16 = vsub.f32 %v15675_v62, %v3960_v44 }
 0x68e   :  { %14486 = vpow2.f32 %v4004_v36 }
 0x68f   :  { %v15760_v13 = vpop.eup %14478  ;;  %v4006_v53 = vmul.f32 1.442695, %v3987_v1  ;;  %v4008_v61 = vmul.f32 1.442695, %v3988_v16 }
 0x690   :  { %v3963_v14 = vpop.xlane.xlu0 %3962  ;;  %v3966_v22 = vpop.xlane.xlu1 %3965  ;;  %v4024_v51 = vsel %vm540_vm1, %v15760_v13, 0.0 }
 0x691   :  { %14488 = vpow2.f32 %v4006_v53  ;;  %v3989_v48 = vsub.f32 %v15681_v57, %v3963_v14  ;;  %v3990_v42 = vsub.f32 %v15683_v31, %v3966_v22  ;;  %4025 = vadd.xlane.f32.xlu1 %v4024_v51 }
 0x692   :  { %14490 = vpow2.f32 %v4008_v61 }
 0x693   :  { %v15766_v56 = vpop.eup %14480  ;;  %v4010_v54 = vmul.f32 1.442695, %v3989_v48  ;;  %v4012_v20 = vmul.f32 1.442695, %v3990_v42 }
 0x694   :  { %v15768_v62 = vpop.eup %14482  ;;  %v3969_v11 = vpop.xlane.xlu0 %3968  ;;  %v4027_v49 = vsel %vm540_vm1, %v15766_v56, 0.0 }
 0x695   :  { %v3972_v10 = vpop.xlane.xlu1 %3971  ;;  %14492 = vpow2.f32 %v4010_v54  ;;  %v3991_v29 = vsub.f32 %v15689_v50, %v3969_v11  ;;  %4028 = vadd.xlane.f32.xlu0 %v4027_v49  ;;  %v4030_v31 = vsel %vm540_vm1, %v15768_v62, 0.0 }
 0x696   :  { %v3992_v57 = vsub.f32 %v15691_v2, %v3972_v10  ;;  %14494 = vpow2.f32 %v4012_v20  ;;  %4031 = vadd.xlane.f32.xlu1 %v4030_v31 }
 0x697   :  { %v15776_v36 = vpop.eup %14484  ;;  %v4014_v24 = vmul.f32 1.442695, %v3991_v29 }
 0x698   :  { %v4016_v44 = vmul.f32 1.442695, %v3992_v57  ;;  %v15778_v1 = vpop.eup %14486  ;;  %v3975_v16 = vpop.xlane.xlu0 %3974  ;;  %v4033_v53 = vsel %vm540_vm1, %v15776_v36, 0.0 }
 0x699   :  { %14496 = vpow2.f32 %v4014_v24  ;;  %v3993_v50 = vsub.f32 %v15697_v18, %v3975_v16  ;;  %4034 = vadd.xlane.f32.xlu0 %v4033_v53  ;;  %v4036_v2 = vsel %vm540_vm1, %v15778_v1, 0.0  ;;  %v15821_v24 = vpop.permute.xlu1 %5236 }
 0x69a   :  { %14498 = vpow2.f32 %v4016_v44  ;;  %4037 = vadd.xlane.f32.xlu1 %v4036_v2 }
 0x69b   :  { %v15785_v61 = vpop.eup %14488  ;;  %v4018_v14 = vmul.f32 1.442695, %v3993_v50 }
 0x69c   :  { %v15787_v22 = vpop.eup %14490  ;;  %v4039_v51 = vsel %vm540_vm1, %v15785_v61, 0.0  ;;  %v15825_v44 = vpop.permute.xlu0 %5158 }
 0x69d   :  { %14500 = vpow2.f32 %v4018_v14  ;;  %4040 = vadd.xlane.f32.xlu0 %v4039_v51  ;;  %v4042_v48 = vsel %vm540_vm1, %v15787_v22, 0.0 }
 0x69e   :  { %4043 = vadd.xlane.f32.xlu1 %v4042_v48 }
 0x69f   :  { %v15793_v18 = vpop.eup %14492 }
 0x6a0   :  { %v15795_v42 = vpop.eup %14494  ;;  %v4045_v54 = vsel %vm540_vm1, %v15793_v18, 0.0 }
 0x6a1   :  { %4046 = vadd.xlane.f32.xlu0 %v4045_v54  ;;  %v4048_v20 = vsel %vm540_vm1, %v15795_v42, 0.0 }
 0x6a2   :  { %4049 = vadd.xlane.f32.xlu1 %v4048_v20  ;;  %v17460_v20 = vld [vmem:[#allocation16_spill] sm:$0xff] }
 0x6a3   :  { %v15801_v11 = vpop.eup %14496 }
 0x6a4   :  { %v15803_v10 = vpop.eup %14498  ;;  %v4051_v49 = vsel %vm540_vm1, %v15801_v11, 0.0 }
 0x6a5   :  { %4052 = vadd.xlane.f32.xlu0 %v4051_v49  ;;  %v4054_v29 = vsel %vm540_vm1, %v15803_v10, 0.0  ;;  %v17461_v49 = vld [vmem:[#allocation18_spill] sm:$0xff] }
 0x6a6   :  { %4055 = vadd.xlane.f32.xlu1 %v4054_v29 }
 0x6a7   :  { %v15809_v57 = vpop.eup %14500 }
 0x6a8   :  { %v4057_v31 = vsel %vm540_vm1, %v15809_v57, 0.0 }
 0x6a9   :  { %4058 = vadd.xlane.f32.xlu0 %v4057_v31 }
 0x6b7   :  { %5548 = vrot.lane.b32.xlu1 %v15132_v60, %s14842_s28 }
 0x6bb   :  { %5706 = vrot.lane.b32.xlu1 %v15017_v30, %s14841_s27 }
 0x6bf   :  { %5470 = vrot.lane.b32.xlu0 %v15111_v55, %s14842_s28 }
 0x6c3   :  { %5628 = vrot.lane.b32.xlu0 %v15019_v32, %s14841_s27 }
 0x6c7   :  { %5626 = vrot.lane.b32.xlu0 %v15129_v59, %s14842_s28 }
 0x6c9   :  { %v3978_v16 = vpop.xlane.xlu1 %3977 }
 0x6ca   :  { %v3994_v53 = vsub.f32 %v15699_v33, %v3978_v16 }
 0x6cb   :  { %5784 = vrot.lane.b32.xlu0 %v15027_v37, %s14841_s27 }
 0x6cc   :  { %v4020_v50 = vmul.f32 1.442695, %v3994_v53 }
 0x6cd   :  { %v3981_v2 = vpop.xlane.xlu0 %3980  ;;  %v15875_v29 = vpop.permute.xlu1 %5394 }
 0x6ce   :  { %v3995_v14 = vsub.f32 %v15703_v6, %v3981_v2  ;;  %14502 = vpow2.f32 %v4020_v50 }
 0x6cf   :  { %5782 = vrot.lane.b32.xlu0 %v15147_v63, %s14842_s28 }
 0x6d0   :  { %v4022_v51 = vmul.f32 1.442695, %v3995_v14 }
 0x6d1   :  { %v15879_v31 = vpop.permute.xlu0 %5316  ;;  %v15881_v16 = vpop.permute.xlu1 %5392 }
 0x6d2   :  { %14504 = vpow2.f32 %v4022_v51 }
 0x6d3   :  { %5940 = vrot.lane.b32.xlu0 %v15035_v41, %s14841_s27 }
 0x6d5   :  { %v15885_v53 = vpop.permute.xlu0 %5314  ;;  %v15889_v50 = vpop.permute.xlu1 %5550 }
 0x6d7   :  { %5938 = vrot.lane.b32.xlu0 %v15168_v4, %s14842_s28 }
 0x6d8   :  { %v15837_v33 = vpop.eup %14502 }
 0x6d9   :  { %v4060_v6 = vsel %vm540_vm1, %v15837_v33, 0.0  ;;  %v15893_v2 = vpop.permute.xlu0 %5472 }
 0x6db   :  { %6096 = vrot.lane.b32.xlu0 %v15043_v45, %s14841_s27 }
 0x6dc   :  { %v15843_v48 = vpop.eup %14504 }
 0x6dd   :  { %v4063_v54 = vsel %vm540_vm1, %v15843_v48, 0.0 }
 0x6df   :  { %4061 = vadd.xlane.f32.xlu1 %v4060_v6  ;;  %6094 = vrot.lane.b32.xlu0 %v15186_v8, %s14842_s28 }
 0x6e3   :  { %4064 = vadd.xlane.f32.xlu1 %v4063_v54  ;;  %6404 = vrot.lane.b32.xlu0 %v14995_v19, %s14843_s1 }
 0x6e7   :  { %6556 = vrot.lane.b32.xlu0 %v15003_v23, %s14843_s1 }
 0x6eb   :  { %6708 = vrot.lane.b32.xlu0 %v15011_v28, %s14843_s1 }
 0x6ef   :  { %6860 = vrot.lane.b32.xlu0 %v15019_v32, %s14843_s1 }
 0x6f3   :  { %7012 = vrot.lane.b32.xlu0 %v15027_v37, %s14843_s1 }
 0x6f4   :  { %5704 = vrot.lane.b32.xlu1 %v15150_v0, %s14842_s28 }
 0x6f7   :  { %7164 = vrot.lane.b32.xlu0 %v15035_v41, %s14843_s1 }
 0x6f8   :  { %5862 = vrot.lane.b32.xlu1 %v15025_v35, %s14841_s27 }
 0x6fc   :  { %5860 = vrot.lane.b32.xlu1 %v15165_v3, %s14842_s28 }
 0x700   :  { %6018 = vrot.lane.b32.xlu1 %v15033_v39, %s14841_s27 }
 0x704   :  { %6016 = vrot.lane.b32.xlu1 %v17460_v20, %s14842_s28 }
 0x708   :  { %6174 = vrot.lane.b32.xlu1 %v15041_v43, %s14841_s27 }
 0x70c   :  { %6172 = vrot.lane.b32.xlu1 %v17461_v49, %s14842_s28 }
 0x710   :  { %6480 = vrot.lane.b32.xlu1 %v14993_v17, %s14843_s1 }
 0x714   :  { %6632 = vrot.lane.b32.xlu1 %v15001_v21, %s14843_s1 }
 0x718   :  { %6784 = vrot.lane.b32.xlu1 %v15009_v26, %s14843_s1 }
 0x71c   :  { %6936 = vrot.lane.b32.xlu1 %v15017_v30, %s14843_s1 }
 0x71e   :  { %v4026_v14 = vpop.xlane.xlu1 %4025 }
 0x71f   :  { %14506 = vrcp.f32 %v4026_v14 }
 0x720   :  { %7088 = vrot.lane.b32.xlu1 %v15025_v35, %s14843_s1 }
 0x722   :  { %v4029_v51 = vpop.xlane.xlu0 %4028 }
 0x723   :  { %14508 = vrcp.f32 %v4029_v51  ;;  %v4032_v6 = vpop.xlane.xlu1 %4031 }
 0x724   :  { %14510 = vrcp.f32 %v4032_v6  ;;  %7240 = vrot.lane.b32.xlu1 %v15033_v39, %s14843_s1 }
 0x726   :  { %v4035_v54 = vpop.xlane.xlu0 %4034 }
 0x727   :  { %14512 = vrcp.f32 %v4035_v54  ;;  %v4038_v49 = vpop.xlane.xlu1 %4037 }
 0x728   :  { %14514 = vrcp.f32 %v4038_v49 }
 0x729   :  { %v14507_v20 = vpop.eup %14506 }
 0x72a   :  { %v4041_v3 = vpop.xlane.xlu0 %4040  ;;  %v4080_v8 = vmul.f32 %v14507_v20, %v15760_v13 }
 0x72b   :  { %14516 = vrcp.f32 %v4041_v3  ;;  %v4044_v14 = vpop.xlane.xlu1 %4043 }
 0x72c   :  { %14518 = vrcp.f32 %v4044_v14  ;;  %13789 = vmatmul.mubr.msk.f32.vlgmr.msra.gmra.mrb[54].mxu0 %vm540_vm1, %v4080_v8 }
 0x72d   :  { %v14509_v35 = vpop.eup %14508  ;;  %13797 = vmatpush3.msra.mxu0 %v15721_v38  ;;  %13798 = vmatprep.mubr.msk.f32.mxu0 %vm14835_vm0, %v17438_v12 }
 0x72e   :  { %v14511_v51 = vpop.eup %14510  ;;  %v4047_v6 = vpop.xlane.xlu0 %4046  ;;  %13806 = vmatprep.subr.mxu0 %v17438_v12  ;;  %v4081_v49 = vmul.f32 %v14509_v35, %v15766_v56 }
 0x72f   :  { %14520 = vrcp.f32 %v4047_v6  ;;  %v4050_v54 = vpop.xlane.xlu1 %4049  ;;  %v4082_v3 = vmul.f32 %v14511_v51, %v15768_v62 }
 0x730   :  { %14522 = vrcp.f32 %v4050_v54  ;;  %13794 = vmatmul.mubr.msk.f32.vlgmr.msra.gmra.mrb[58].mxu1 %vm540_vm1, %v4081_v49 }
 0x731   :  { %v14513_v8 = vpop.eup %14512  ;;  %13799 = vmatmul.mubr.msk.f32.vlgmr.msra.gmra.mrb[56].mxu0 %vm540_vm1, %v4082_v3  ;;  %13802 = vmatpush3.msra.mxu1 %v15725_v34 }
 0x732   :  { %v14515_v38 = vpop.eup %14514  ;;  %13807 = vmatpush3.msra.mxu0 %v15727_v27  ;;  %v4053_v13 = vpop.xlane.xlu0 %4052  ;;  %13803 = vmatprep.mubr.msk.f32.mxu1 %vm14835_vm0, %v17438_v12  ;;  %v4083_v35 = vmul.f32 %v14513_v8, %v15776_v36 }
 0x733   :  { %14524 = vrcp.f32 %v4053_v13  ;;  %v4056_v56 = vpop.xlane.xlu1 %4055  ;;  %13808 = vmatprep.mubr.msk.f32.mxu0 %vm14835_vm0, %v17438_v12  ;;  %13811 = vmatprep.subr.mxu1 %v17438_v12  ;;  %v4084_v62 = vmul.f32 %v14515_v38, %v15778_v1 }
 0x734   :  { %14526 = vrcp.f32 %v4056_v56  ;;  %13816 = vmatprep.subr.mxu0 %v17438_v12  ;;  %13804 = vmatmul.mubr.msk.f32.vlgmr.msra.gmra.mrb[60].mxu1 %vm540_vm1, %v4083_v35 }
 0x735   :  { %v14517_v34 = vpop.eup %14516  ;;  %13809 = vmatmul.mubr.msk.f32.vlgmr.msra.gmra.mrb[58].mxu0 %vm540_vm1, %v4084_v62  ;;  %13812 = vmatpush3.msra.mxu1 %v15731_v40 }
 0x736   :  { %v14519_v27 = vpop.eup %14518  ;;  %13817 = vmatpush3.msra.mxu0 %v15733_v58  ;;  %v4059_v36 = vpop.xlane.xlu0 %4058  ;;  %13813 = vmatprep.mubr.msk.f32.mxu1 %vm14835_vm0, %v17438_v12  ;;  %v4085_v20 = vmul.f32 %v14517_v34, %v15785_v61 }
 0x737   :  { %14528 = vrcp.f32 %v4059_v36  ;;  %13818 = vmatprep.mubr.msk.f32.mxu0 %vm14835_vm0, %v17438_v12  ;;  %13821 = vmatprep.subr.mxu1 %v17438_v12  ;;  %v4086_v1 = vmul.f32 %v14519_v27, %v15787_v22 }
 0x738   :  { %13826 = vmatprep.subr.mxu0 %v17438_v12  ;;  %13814 = vmatmul.mubr.msk.f32.vlgmr.msra.gmra.mrb[62].mxu1 %vm540_vm1, %v4085_v20 }
 0x739   :  { %v14521_v40 = vpop.eup %14520  ;;  %13819 = vmatmul.mubr.msk.f32.vlgmr.msra.gmra.mrb[60].mxu0 %vm540_vm1, %v4086_v1  ;;  %13822 = vmatpush3.msra.mxu1 %v15735_v52 }
 0x73a   :  { %v14523_v58 = vpop.eup %14522  ;;  %13827 = vmatpush3.msra.mxu0 %v15737_v9  ;;  %13823 = vmatprep.mubr.msk.f32.mxu1 %vm14835_vm0, %v17438_v12  ;;  %v4087_v61 = vmul.f32 %v14521_v40, %v15793_v18 }
 0x73b   :  { %13828 = vmatprep.mubr.msk.f32.mxu0 %vm14835_vm0, %v17438_v12  ;;  %13831 = vmatprep.subr.mxu1 %v17438_v12  ;;  %v4088_v22 = vmul.f32 %v14523_v58, %v15795_v42 }
 0x73c   :  { %13836 = vmatprep.subr.mxu0 %v17438_v12  ;;  %13824 = vmatmul.mubr.msk.f32.vlgmr.msra.gmra.mrb[64].mxu1 %vm540_vm1, %v4087_v61 }
 0x73d   :  { %v14525_v52 = vpop.eup %14524  ;;  %13829 = vmatmul.mubr.msk.f32.vlgmr.msra.gmra.mrb[62].mxu0 %vm540_vm1, %v4088_v22  ;;  %13832 = vmatpush3.msra.mxu1 %v15739_v47 }
 0x73e   :  { %v14527_v9 = vpop.eup %14526  ;;  %13837 = vmatpush3.msra.mxu0 %v15741_v15  ;;  %13833 = vmatprep.mubr.msk.f32.mxu1 %vm14835_vm0, %v17438_v12  ;;  %v4089_v18 = vmul.f32 %v14525_v52, %v15801_v11 }
 0x73f   :  { %13838 = vmatprep.mubr.msk.f32.mxu0 %vm14835_vm0, %v17438_v12  ;;  %13841 = vmatprep.subr.mxu1 %v17438_v12  ;;  %v4090_v42 = vmul.f32 %v14527_v9, %v15803_v10 }
 0x740   :  { %13846 = vmatprep.subr.mxu0 %v17438_v12  ;;  %13834 = vmatmul.mubr.msk.f32.vlgmr.msra.gmra.mrb[66].mxu1 %vm540_vm1, %v4089_v18 }
 0x741   :  { %v14529_v47 = vpop.eup %14528  ;;  %13839 = vmatmul.mubr.msk.f32.vlgmr.msra.gmra.mrb[64].mxu0 %vm540_vm1, %v4090_v42  ;;  %13842 = vmatpush3.msra.mxu1 %v15743_v5  ;;  %v5549_v5 = vpop.permute.xlu1 %5548 }
 0x742   :  { %13847 = vmatpush3.msra.mxu0 %v15745_v7  ;;  %13843 = vmatprep.mubr.msk.f32.mxu1 %vm14835_vm0, %v17438_v12  ;;  %v4091_v15 = vmul.f32 %v14529_v47, %v15809_v57  ;;  %v5471_v7 = vpop.permute.xlu0 %5470 }
 0x743   :  { %13851 = vmatprep.subr.mxu1 %v17438_v12  ;;  %13848 = vmatprep.mubr.msk.f32.mxu0 %vm14835_vm0, %v17438_v12 }
 0x744   :  { %13844 = vmatmul.mubr.msk.f32.vlgmr.msra.gmra.mrb[68].mxu1 %vm540_vm1, %v4091_v15  ;;  %13856 = vmatprep.subr.mxu0 %v17438_v12 }
 0x745   :  { %13852 = vmatpush3.msra.mxu1 %v15747_v25  ;;  %13853 = vmatprep.mubr.msk.f32.mxu1 %vm14835_vm0, %v17438_v12  ;;  %v5707_v10 = vpop.permute.xlu1 %5706 }
 0x746   :  { %13861 = vmatprep.subr.mxu1 %v17438_v12  ;;  %v5629_v11 = vpop.permute.xlu0 %5628 }
 0x74a   :  { %v5627_v57 = vpop.permute.xlu0 %5626 }
 0x74e   :  { %v5785_v6 = vpop.permute.xlu0 %5784 }
 0x752   :  { %v5783_v3 = vpop.permute.xlu0 %5782 }
 0x756   :  { %v5941_v56 = vpop.permute.xlu0 %5940 }
 0x76c   :  { %v4062_v14 = vpop.xlane.xlu1 %4061 }
 0x76d   :  { %14530 = vrcp.f32 %v4062_v14 }
 0x770   :  { %v4065_v51 = vpop.xlane.xlu1 %4064 }
 0x771   :  { %14532 = vrcp.f32 %v4065_v51 }
 0x774   :  { %v5705_v49 = vpop.permute.xlu1 %5704 }
 0x777   :  { %v14531_v54 = vpop.eup %14530 }
 0x778   :  { %v5863_v8 = vpop.permute.xlu1 %5862  ;;  %v4092_v25 = vmul.f32 %v14531_v54, %v15837_v33  ;;  %v17462_v33 = vld [vmem:[#allocation33_spill] sm:$0xff] }
 0x77a   :  { %13849 = vmatmul.mubr.msk.f32.vlgmr.msra.gmra.mrb[66].mxu0 %vm540_vm1, %v4092_v25 }
 0x77b   :  { %v14533_v38 = vpop.eup %14532  ;;  %13857 = vmatpush3.xpose.msk.msra.mxu0 %vm540_vm1, %v15749_v46  ;;  %13858 = vmatprep.mubr.msk.f32.mxu0 %vm14835_vm0, %v17438_v12 }
 0x77c   :  { %v5861_v13 = vpop.permute.xlu1 %5860  ;;  %13866 = vmatprep.subr.mxu0 %v17438_v12  ;;  %v4093_v35 = vmul.f32 %v14533_v38, %v15843_v48 }
 0x77e   :  { %13854 = vmatmul.mubr.msk.f32.vlgmr.msra.gmra.mrb[70].mxu1 %vm540_vm1, %v4093_v35  ;;  %13859 = vmatmul.mubr.msk.f32.vlgmr.msra.gmra.mrb[68].mxu0 %vm540_vm1, %v15825_v44  ;;  %v5939_v44 = vpop.permute.xlu0 %5938 }
 0x77f   :  { %13862 = vmatpush3.xpose.msk.msra.mxu1 %vm540_vm1, %v17462_v33  ;;  %13867 = vmatpush3.xpose.msk.msra.mxu0 %vm540_vm1, %v15879_v31 }
 0x780   :  { %13863 = vmatprep.mubr.msk.f32.mxu1 %vm14835_vm0, %v17438_v12  ;;  %13868 = vmatprep.mubr.msk.f32.mxu0 %vm14835_vm0, %v17438_v12  ;;  %v6019_v46 = vpop.permute.xlu1 %6018 }
 0x781   :  { %13871 = vmatprep.subr.mxu1 %v17438_v12  ;;  %13876 = vmatprep.subr.mxu0 %v17438_v12 }
 0x782   :  { %13864 = vmatmul.mubr.msk.f32.vlgmr.msra.gmra.mrb[72].mxu1 %vm540_vm1, %v15821_v24  ;;  %13869 = vmatmul.mubr.msk.f32.vlgmr.msra.gmra.mrb[70].mxu0 %vm540_vm1, %v15885_v53  ;;  %v6097_v48 = vpop.permute.xlu0 %6096 }
 0x783   :  { %13872 = vmatpush3.xpose.msk.msra.mxu1 %vm540_vm1, %v15875_v29  ;;  %13877 = vmatpush3.xpose.msk.msra.mxu0 %vm540_vm1, %v15893_v2 }
 0x784   :  { %13873 = vmatprep.mubr.msk.f32.mxu1 %vm14835_vm0, %v17438_v12  ;;  %13878 = vmatprep.mubr.msk.f32.mxu0 %vm14835_vm0, %v17438_v12  ;;  %v6017_v24 = vpop.permute.xlu1 %6016 }
 0x785   :  { %13881 = vmatprep.subr.mxu1 %v17438_v12  ;;  %13886 = vmatprep.subr.mxu0 %v17438_v12 }
 0x786   :  { %13874 = vmatmul.mubr.msk.f32.vlgmr.msra.gmra.mrb[74].mxu1 %vm540_vm1, %v15881_v16  ;;  %13879 = vmatmul.mubr.msk.f32.vlgmr.msra.gmra.mrb[72].mxu0 %vm540_vm1, %v5471_v7  ;;  %v6095_v31 = vpop.permute.xlu0 %6094 }
 0x787   :  { %13882 = vmatpush3.xpose.msk.msra.mxu1 %vm540_vm1, %v15889_v50  ;;  %13887 = vmatpush3.xpose.msk.msra.mxu0 %vm540_vm1, %v5629_v11 }
 0x788   :  { %13883 = vmatprep.mubr.msk.f32.mxu1 %vm14835_vm0, %v17438_v12  ;;  %13888 = vmatprep.mubr.msk.f32.mxu0 %vm14835_vm0, %v17438_v12  ;;  %v6175_v29 = vpop.permute.xlu1 %6174 }
 0x789   :  { %13891 = vmatprep.subr.mxu1 %v17438_v12  ;;  %13896 = vmatprep.subr.mxu0 %v17438_v12 }
 0x78a   :  { %13884 = vmatmul.mubr.msk.f32.vlgmr.msra.gmra.mrb[76].mxu1 %vm540_vm1, %v5549_v5  ;;  %13889 = vmatmul.mubr.msk.f32.vlgmr.msra.gmra.mrb[74].mxu0 %vm540_vm1, %v5627_v57  ;;  %v6405_v53 = vpop.permute.xlu0 %6404 }
 0x78b   :  { %13892 = vmatpush3.xpose.msk.msra.mxu1 %vm540_vm1, %v5707_v10  ;;  %13897 = vmatpush3.xpose.msk.msra.mxu0 %vm540_vm1, %v5785_v6 }
 0x78c   :  { %13893 = vmatprep.mubr.msk.f32.mxu1 %vm14835_vm0, %v17438_v12  ;;  %13898 = vmatprep.mubr.msk.f32.mxu0 %vm14835_vm0, %v17438_v12  ;;  %v6173_v16 = vpop.permute.xlu1 %6172 }
 0x78d   :  { %13901 = vmatprep.subr.mxu1 %v17438_v12  ;;  %13906 = vmatprep.subr.mxu0 %v17438_v12 }
 0x78e   :  { %13894 = vmatmul.mubr.msk.f32.vlgmr.msra.gmra.mrb[78].mxu1 %vm540_vm1, %v5705_v49  ;;  %13899 = vmatmul.mubr.msk.f32.vlgmr.msra.gmra.mrb[76].mxu0 %vm540_vm1, %v5783_v3 }
 0x78f   :  { %13902 = vmatpush3.xpose.msk.msra.mxu1 %vm540_vm1, %v5863_v8  ;;  %13907 = vmatpush3.xpose.msk.msra.mxu0 %vm540_vm1, %v5941_v56 }
 0x790   :  { %13903 = vmatprep.mubr.msk.f32.mxu1 %vm14835_vm0, %v17438_v12  ;;  %13908 = vmatprep.mubr.msk.f32.mxu0 %vm14835_vm0, %v17438_v12  ;;  %v6481_v50 = vpop.permute.xlu1 %6480 }
 0x791   :  { %13911 = vmatprep.subr.mxu1 %v17438_v12  ;;  %13916 = vmatprep.subr.mxu0 %v17438_v12 }
 0x792   :  { %13904 = vmatmul.mubr.msk.f32.vlgmr.msra.gmra.mrb[80].mxu1 %vm540_vm1, %v5861_v13  ;;  %13909 = vmatmul.mubr.msk.f32.vlgmr.msra.gmra.mrb[78].mxu0 %vm540_vm1, %v5939_v44 }
 0x793   :  { %13912 = vmatpush3.xpose.msk.msra.mxu1 %vm540_vm1, %v6019_v46  ;;  %13917 = vmatpush3.xpose.msk.msra.mxu0 %vm540_vm1, %v6097_v48 }
 0x794   :  { %13913 = vmatprep.mubr.msk.f32.mxu1 %vm14835_vm0, %v17438_v12  ;;  %13918 = vmatprep.mubr.msk.f32.mxu0 %vm14835_vm0, %v17438_v12 }
 0x795   :  { %13921 = vmatprep.subr.mxu1 %v17438_v12  ;;  %13926 = vmatprep.subr.mxu0 %v17438_v12 }
 0x796   :  { %13914 = vmatmul.mubr.msk.f32.vlgmr.msra.gmra.mrb[82].mxu1 %vm540_vm1, %v6017_v24  ;;  %13919 = vmatmul.mubr.msk.f32.vlgmr.msra.gmra.mrb[80].mxu0 %vm540_vm1, %v6095_v31 }
 0x797   :  { %13922 = vmatpush3.xpose.msk.msra.mxu1 %vm540_vm1, %v6175_v29  ;;  %13927 = vmatpush3.msra.mxu0 %v6405_v53 }
 0x798   :  { %13923 = vmatprep.mubr.msk.f32.mxu1 %vm14835_vm0, %v17438_v12  ;;  %13931 = vmatprep.subr.mxu1 %v17438_v12 }
 0x799   :  { %13928 = vmatprep.mubr.msk.f32.mxu0 %vm14835_vm0, %v17438_v12  ;;  %13936 = vmatprep.subr.mxu0 %v17438_v12 }
 0x79a   :  { %13924 = vmatmul.mubr.msk.f32.vlgmr.msra.gmra.mrb[84].mxu1 %vm540_vm1, %v6173_v16 }
 0x79b   :  { %13932 = vmatpush3.msra.mxu1 %v6481_v50  ;;  %13933 = vmatprep.mubr.msk.f32.mxu1 %vm14835_vm0, %v17438_v12 }
 0x79c   :  { %13941 = vmatprep.subr.mxu1 %v17438_v12 }
 0x7ff   :  { %v16061_v2 = vpop.f32.mrb[54].mxu0 }
 0x800   :  { %v13790_v62 = vpop.f32.mrb[55].mxu0 }
 0x803   :  { %v16063_v34 = vpop.f32.mrb[58].mxu1 }
 0x804   :  { %v16065_v27 = vpop.f32.mrb[56].mxu0  ;;  %v13795_v36 = vpop.f32.mrb[59].mxu1 }
 0x805   :  { %v13800_v20 = vpop.f32.mrb[57].mxu0 }
 0x807   :  { %v16067_v1 = vpop.f32.mrb[60].mxu1 }
 0x808   :  { %v16069_v40 = vpop.f32.mrb[58].mxu0  ;;  %v13805_v58 = vpop.f32.mrb[61].mxu1 }
 0x809   :  { %v13810_v61 = vpop.f32.mrb[59].mxu0 }
 0x80b   :  { %v16071_v22 = vpop.f32.mrb[62].mxu1 }
 0x80c   :  { %v16073_v52 = vpop.f32.mrb[60].mxu0  ;;  %v13815_v9 = vpop.f32.mrb[63].mxu1 }
 0x80d   :  { %17463 = vst [vmem:[#allocation33_spill] sm:$0xff] %v16073_v52  ;;  %v13820_v18 = vpop.f32.mrb[61].mxu0 }
 0x80f   :  { %v16075_v42 = vpop.f32.mrb[64].mxu1 }
 0x810   :  { %17464 = vst [vmem:[#allocation34_spill] sm:$0xff] %v16075_v42  ;;  %v16077_v47 = vpop.f32.mrb[62].mxu0  ;;  %v13825_v15 = vpop.f32.mrb[65].mxu1 }
 0x811   :  { %17465 = vst [vmem:[#allocation35_spill] sm:$0xff] %v16077_v47  ;;  %v13830_v7 = vpop.f32.mrb[63].mxu0 }
 0x813   :  { %v16079_v5 = vpop.f32.mrb[66].mxu1 }
 0x814   :  { %17466 = vst [vmem:[#allocation36_spill] sm:$0xff] %v16079_v5  ;;  %v16081_v11 = vpop.f32.mrb[64].mxu0  ;;  %v13835_v10 = vpop.f32.mrb[67].mxu1 }
 0x815   :  { %17467 = vst [vmem:[#allocation37_spill] sm:$0xff] %v16081_v11  ;;  %v13840_v57 = vpop.f32.mrb[65].mxu0 }
 0x817   :  { %v16083_v14 = vpop.f32.mrb[68].mxu1 }
 0x818   :  { %17468 = vst [vmem:[#allocation38_spill] sm:$0xff] %v16083_v14  ;;  %v13845_v51 = vpop.f32.mrb[69].mxu1 }
 0x84d   :  { %v16085_v6 = vpop.f32.mrb[66].mxu0 }
 0x84e   :  { %17469 = vst [vmem:[#allocation39_spill] sm:$0xff] %v16085_v6  ;;  %v13850_v49 = vpop.f32.mrb[67].mxu0 }
 0x851   :  { %v16087_v54 = vpop.f32.mrb[70].mxu1  ;;  %v16089_v3 = vpop.f32.mrb[68].mxu0 }
 0x852   :  { %17470 = vst [vmem:[#allocation40_spill] sm:$0xff] %v16087_v54  ;;  %v13855_v8 = vpop.f32.mrb[71].mxu1  ;;  %v13860_v25 = vpop.f32.mrb[69].mxu0  ;;  %v6250_v38 = vsel %vm540_vm1, %v16089_v3, -inf }
 0x853   :  { %6251 = vmax.xlane.f32.xlu0 %v6250_v38 }
 0x855   :  { %v16093_v13 = vpop.f32.mrb[72].mxu1  ;;  %v16095_v35 = vpop.f32.mrb[70].mxu0 }
 0x856   :  { %v13865_v56 = vpop.f32.mrb[73].mxu1  ;;  %v13870_v33 = vpop.f32.mrb[71].mxu0  ;;  %v6253_v46 = vsel %vm540_vm1, %v16093_v13, -inf  ;;  %v6256_v44 = vsel %vm540_vm1, %v16095_v35, -inf }
 0x857   :  { %6254 = vmax.xlane.f32.xlu1 %v6253_v46  ;;  %6257 = vmax.xlane.f32.xlu0 %v6256_v44 }
 0x859   :  { %v16101_v24 = vpop.f32.mrb[74].mxu1  ;;  %v16103_v48 = vpop.f32.mrb[72].mxu0 }
 0x85a   :  { %v13875_v29 = vpop.f32.mrb[75].mxu1  ;;  %v13880_v31 = vpop.f32.mrb[73].mxu0  ;;  %v6259_v16 = vsel %vm540_vm1, %v16101_v24, -inf  ;;  %v6262_v53 = vsel %vm540_vm1, %v16103_v48, -inf }
 0x85b   :  { %6260 = vmax.xlane.f32.xlu0 %v6259_v16  ;;  %6263 = vmax.xlane.f32.xlu1 %v6262_v53 }
 0x85d   :  { %v16109_v50 = vpop.f32.mrb[76].mxu1  ;;  %v16111_v62 = vpop.f32.mrb[74].mxu0 }
 0x85e   :  { %v13885_v36 = vpop.f32.mrb[77].mxu1  ;;  %v13890_v20 = vpop.f32.mrb[75].mxu0  ;;  %v6265_v58 = vsel %vm540_vm1, %v16109_v50, -inf  ;;  %v6268_v61 = vsel %vm540_vm1, %v16111_v62, -inf }
 0x85f   :  { %6266 = vmax.xlane.f32.xlu0 %v6265_v58  ;;  %6269 = vmax.xlane.f32.xlu1 %v6268_v61  ;;  %v17471_v58 = vld [vmem:[#allocation13_spill] sm:$0xff]  ;;  %v17472_v61 = vld [vmem:[#allocation11_spill] sm:$0xff] }
 0x861   :  { %v16117_v9 = vpop.f32.mrb[78].mxu1  ;;  %v16119_v18 = vpop.f32.mrb[76].mxu0 }
 0x862   :  { %v13895_v15 = vpop.f32.mrb[79].mxu1  ;;  %v13900_v7 = vpop.f32.mrb[77].mxu0  ;;  %v6271_v10 = vsel %vm540_vm1, %v16117_v9, -inf  ;;  %v6274_v57 = vsel %vm540_vm1, %v16119_v18, -inf }
 0x863   :  { %6272 = vmax.xlane.f32.xlu0 %v6271_v10  ;;  %6275 = vmax.xlane.f32.xlu1 %v6274_v57  ;;  %v16157_v15 = vpop.permute.xlu0 %6556  ;;  %v16159_v7 = vpop.permute.xlu1 %6632 }
 0x865   :  { %v16125_v51 = vpop.f32.mrb[80].mxu1  ;;  %v16127_v49 = vpop.f32.mrb[78].mxu0 }
 0x866   :  { %v13905_v8 = vpop.f32.mrb[81].mxu1  ;;  %v13910_v25 = vpop.f32.mrb[79].mxu0  ;;  %v6277_v38 = vsel %vm540_vm1, %v16125_v51, -inf  ;;  %v6280_v56 = vsel %vm540_vm1, %v16127_v49, -inf }
 0x867   :  { %6278 = vmax.xlane.f32.xlu0 %v6277_v38  ;;  %6281 = vmax.xlane.f32.xlu1 %v6280_v56  ;;  %v16161_v10 = vpop.permute.xlu0 %6708  ;;  %v16163_v57 = vpop.permute.xlu1 %6784 }
 0x869   :  { %v16133_v33 = vpop.f32.mrb[82].mxu1  ;;  %v16135_v46 = vpop.f32.mrb[80].mxu0 }
 0x86a   :  { %v13915_v44 = vpop.f32.mrb[83].mxu1  ;;  %v13920_v29 = vpop.f32.mrb[81].mxu0  ;;  %v6283_v31 = vsel %vm540_vm1, %v16133_v33, -inf  ;;  %v6286_v16 = vsel %vm540_vm1, %v16135_v46, -inf }
 0x86b   :  { %6284 = vmax.xlane.f32.xlu0 %v6283_v31  ;;  %6287 = vmax.xlane.f32.xlu1 %v6286_v16  ;;  %v16165_v8 = vpop.permute.xlu0 %6860  ;;  %v16167_v25 = vpop.permute.xlu1 %6936 }
 0x86d   :  { %v16141_v53 = vpop.f32.mrb[84].mxu1 }
 0x86e   :  { %v13925_v36 = vpop.f32.mrb[85].mxu1  ;;  %v6289_v20 = vsel %vm540_vm1, %v16141_v53, -inf }
 0x86f   :  { %6290 = vmax.xlane.f32.xlu0 %v6289_v20  ;;  %v16169_v38 = vpop.permute.xlu0 %7012  ;;  %v16171_v56 = vpop.permute.xlu1 %7088 }
 0x873   :  { %v16173_v44 = vpop.permute.xlu0 %7164  ;;  %v16175_v29 = vpop.permute.xlu1 %7240 }
 0x87c   :  { %7392 = vrot.lane.b32.xlu1 %v15041_v43, %s14843_s1 }
 0x880   :  { %7548 = vrot.lane.b32.xlu1 %v14993_v17, %s14844_s29 }
 0x884   :  { %7546 = vrot.lane.b32.xlu1 %v17471_v58, %s14845_s30 }
 0x885   :  { %7316 = vrot.lane.b32.xlu0 %v15043_v45, %s14843_s1 }
 0x889   :  { %7470 = vrot.lane.b32.xlu0 %v14995_v19, %s14844_s29 }
 0x88d   :  { %7468 = vrot.lane.b32.xlu0 %v17472_v61, %s14845_s30 }
 0x8e0   :  { %v6252_v31 = vpop.xlane.xlu0 %6251 }
 0x8e1   :  { %v6292_v16 = vsub.f32 %v16089_v3, %v6252_v31 }
 0x8e3   :  { %v6306_v36 = vmul.f32 1.442695, %v6292_v16 }
 0x8e4   :  { %v6255_v20 = vpop.xlane.xlu1 %6254  ;;  %v6258_v58 = vpop.xlane.xlu0 %6257 }
 0x8e5   :  { %14534 = vpow2.f32 %v6306_v36  ;;  %v6293_v61 = vsub.f32 %v16093_v13, %v6255_v20  ;;  %v6294_v54 = vsub.f32 %v16095_v35, %v6258_v58 }
 0x8e7   :  { %v6308_v6 = vmul.f32 1.442695, %v6293_v61  ;;  %v6310_v14 = vmul.f32 1.442695, %v6294_v54 }
 0x8e8   :  { %v6261_v11 = vpop.xlane.xlu0 %6260  ;;  %v6264_v5 = vpop.xlane.xlu1 %6263 }
 0x8e9   :  { %14536 = vpow2.f32 %v6308_v6  ;;  %v6295_v47 = vsub.f32 %v16101_v24, %v6261_v11  ;;  %v6296_v42 = vsub.f32 %v16103_v48, %v6264_v5 }
 0x8ea   :  { %14538 = vpow2.f32 %v6310_v14 }
 0x8eb   :  { %v6312_v52 = vmul.f32 1.442695, %v6295_v47  ;;  %v6314_v3 = vmul.f32 1.442695, %v6296_v42 }
 0x8ec   :  { %v6267_v31 = vpop.xlane.xlu0 %6266  ;;  %v6270_v16 = vpop.xlane.xlu1 %6269 }
 0x8ed   :  { %14540 = vpow2.f32 %v6312_v52  ;;  %v6297_v36 = vsub.f32 %v16109_v50, %v6267_v31  ;;  %v6298_v13 = vsub.f32 %v16111_v62, %v6270_v16 }
 0x8ee   :  { %14542 = vpow2.f32 %v6314_v3 }
 0x8ef   :  { %v16184_v35 = vpop.eup %14534  ;;  %v6316_v54 = vmul.f32 1.442695, %v6297_v36  ;;  %v6318_v20 = vmul.f32 1.442695, %v6298_v13 }
 0x8f0   :  { %v6273_v6 = vpop.xlane.xlu0 %6272  ;;  %v6276_v58 = vpop.xlane.xlu1 %6275  ;;  %v6334_v5 = vsel %vm540_vm1, %v16184_v35, 0.0 }
 0x8f1   :  { %14544 = vpow2.f32 %v6316_v54  ;;  %v6299_v42 = vsub.f32 %v16117_v9, %v6273_v6  ;;  %v6300_v47 = vsub.f32 %v16119_v18, %v6276_v58  ;;  %6335 = vadd.xlane.f32.xlu1 %v6334_v5 }
 0x8f2   :  { %14546 = vpow2.f32 %v6318_v20 }
 0x8f3   :  { %v16190_v52 = vpop.eup %14536  ;;  %v6320_v11 = vmul.f32 1.442695, %v6299_v42  ;;  %v6322_v14 = vmul.f32 1.442695, %v6300_v47 }
 0x8f4   :  { %v16192_v24 = vpop.eup %14538  ;;  %v6279_v48 = vpop.xlane.xlu0 %6278  ;;  %v6337_v62 = vsel %vm540_vm1, %v16190_v52, 0.0 }
 0x8f5   :  { %v6282_v50 = vpop.xlane.xlu1 %6281  ;;  %14548 = vpow2.f32 %v6320_v11  ;;  %v6301_v61 = vsub.f32 %v16125_v51, %v6279_v48  ;;  %6338 = vadd.xlane.f32.xlu0 %v6337_v62  ;;  %v6340_v18 = vsel %vm540_vm1, %v16192_v24, 0.0 }
 0x8f6   :  { %v6302_v9 = vsub.f32 %v16127_v49, %v6282_v50  ;;  %14550 = vpow2.f32 %v6322_v14  ;;  %6341 = vadd.xlane.f32.xlu1 %v6340_v18 }
 0x8f7   :  { %v16200_v3 = vpop.eup %14540  ;;  %v6324_v31 = vmul.f32 1.442695, %v6301_v61 }
 0x8f8   :  { %v6326_v16 = vmul.f32 1.442695, %v6302_v9  ;;  %v16202_v36 = vpop.eup %14542  ;;  %v6285_v13 = vpop.xlane.xlu0 %6284  ;;  %v6343_v54 = vsel %vm540_vm1, %v16200_v3, 0.0 }
 0x8f9   :  { %14552 = vpow2.f32 %v6324_v31  ;;  %v6303_v51 = vsub.f32 %v16133_v33, %v6285_v13  ;;  %6344 = vadd.xlane.f32.xlu0 %v6343_v54  ;;  %v6346_v49 = vsel %vm540_vm1, %v16202_v36, 0.0  ;;  %v17473_v31 = vld [vmem:[#allocation14_spill] sm:$0xff]  ;;  %v6288_v13 = vpop.xlane.xlu1 %6287 }
 0x8fa   :  { %14554 = vpow2.f32 %v6326_v16  ;;  %6347 = vadd.xlane.f32.xlu1 %v6346_v49  ;;  %v17474_v16 = vld [vmem:[#allocation12_spill] sm:$0xff]  ;;  %v6304_v54 = vsub.f32 %v16135_v46, %v6288_v13 }
 0x8fb   :  { %v16209_v20 = vpop.eup %14544  ;;  %v6328_v6 = vmul.f32 1.442695, %v6303_v51 }
 0x8fc   :  { %v16211_v58 = vpop.eup %14546  ;;  %v6349_v5 = vsel %vm540_vm1, %v16209_v20, 0.0  ;;  %v6291_v51 = vpop.xlane.xlu0 %6290  ;;  %v6330_v49 = vmul.f32 1.442695, %v6304_v54 }
 0x8fd   :  { %14556 = vpow2.f32 %v6328_v6  ;;  %6350 = vadd.xlane.f32.xlu0 %v6349_v5  ;;  %v6352_v42 = vsel %vm540_vm1, %v16211_v58, 0.0  ;;  %v6305_v6 = vsub.f32 %v16141_v53, %v6291_v51 }
 0x8fe   :  { %6353 = vadd.xlane.f32.xlu1 %v6352_v42  ;;  %14558 = vpow2.f32 %v6330_v49  ;;  %v17475_v42 = vld [vmem:[#allocation17_spill] sm:$0xff] }
 0x8ff   :  { %v16217_v33 = vpop.eup %14548  ;;  %v6332_v5 = vmul.f32 1.442695, %v6305_v6 }
 0x900   :  { %v16219_v47 = vpop.eup %14550  ;;  %v6355_v11 = vsel %vm540_vm1, %v16217_v33, 0.0 }
 0x901   :  { %6356 = vadd.xlane.f32.xlu0 %v6355_v11  ;;  %v6358_v14 = vsel %vm540_vm1, %v16219_v47, 0.0  ;;  %14560 = vpow2.f32 %v6332_v5  ;;  %v16283_v11 = vpop.permute.xlu1 %7392 }
 0x902   :  { %6359 = vadd.xlane.f32.xlu1 %v6358_v14  ;;  %v16285_v14 = vpop.permute.xlu0 %7316 }
 0x903   :  { %v16225_v48 = vpop.eup %14552 }
 0x904   :  { %v16227_v50 = vpop.eup %14554  ;;  %v6361_v62 = vsel %vm540_vm1, %v16225_v48, 0.0 }
 0x905   :  { %6362 = vadd.xlane.f32.xlu0 %v6361_v62  ;;  %v6364_v61 = vsel %vm540_vm1, %v16227_v50, 0.0 }
 0x906   :  { %6365 = vadd.xlane.f32.xlu1 %v6364_v61  ;;  %v16289_v62 = vpop.permute.xlu0 %7470 }
 0x907   :  { %v16233_v9 = vpop.eup %14556 }
 0x908   :  { %v6367_v18 = vsel %vm540_vm1, %v16233_v9, 0.0 }
 0x909   :  { %6368 = vadd.xlane.f32.xlu0 %v6367_v18 }
 0x917   :  { %7704 = vrot.lane.b32.xlu1 %v15001_v21, %s14844_s29 }
 0x91b   :  { %7702 = vrot.lane.b32.xlu1 %v17473_v31, %s14845_s30 }
 0x91f   :  { %7860 = vrot.lane.b32.xlu1 %v15009_v26, %s14844_s29  ;;  %7626 = vrot.lane.b32.xlu0 %v15003_v23, %s14844_s29 }
 0x923   :  { %7624 = vrot.lane.b32.xlu0 %v17474_v16, %s14845_s30 }
 0x927   :  { %7782 = vrot.lane.b32.xlu0 %v15011_v28, %s14844_s29 }
 0x92b   :  { %7780 = vrot.lane.b32.xlu0 %v15111_v55, %s14845_s30  ;;  %v16261_v55 = vpop.eup %14558 }
 0x92c   :  { %v6370_v46 = vsel %vm540_vm1, %v16261_v55, 0.0  ;;  %v16267_v53 = vpop.eup %14560 }
 0x92f   :  { %7938 = vrot.lane.b32.xlu0 %v15019_v32, %s14844_s29 }
 0x933   :  { %7936 = vrot.lane.b32.xlu0 %v15129_v59, %s14845_s30  ;;  %v6373_v59 = vsel %vm540_vm1, %v16267_v53, 0.0 }
 0x937   :  { %8094 = vrot.lane.b32.xlu0 %v15027_v37, %s14844_s29 }
 0x93b   :  { %8250 = vrot.lane.b32.xlu0 %v15035_v41, %s14844_s29 }
 0x93f   :  { %8406 = vrot.lane.b32.xlu0 %v15043_v45, %s14844_s29 }
 0x943   :  { %6371 = vadd.xlane.f32.xlu1 %v6370_v46 }
 0x947   :  { %6374 = vadd.xlane.f32.xlu1 %v6373_v59 }
 0x958   :  { %7858 = vrot.lane.b32.xlu1 %v15132_v60, %s14845_s30  ;;  %v16287_v60 = vpop.permute.xlu1 %7548 }
 0x95c   :  { %8016 = vrot.lane.b32.xlu1 %v15017_v30, %s14844_s29  ;;  %v16291_v61 = vpop.permute.xlu1 %7546 }
 0x960   :  { %8014 = vrot.lane.b32.xlu1 %v15150_v0, %s14845_s30  ;;  %v16293_v0 = vpop.permute.xlu0 %7468 }
 0x964   :  { %8092 = vrot.lane.b32.xlu1 %v15147_v63, %s14845_s30 }
 0x968   :  { %8248 = vrot.lane.b32.xlu1 %v15168_v4, %s14845_s30 }
 0x96c   :  { %8404 = vrot.lane.b32.xlu1 %v17475_v42, %s14845_s30 }
 0x97e   :  { %v6336_v18 = vpop.xlane.xlu1 %6335 }
 0x97f   :  { %14562 = vrcp.f32 %v6336_v18 }
 0x982   :  { %v6339_v63 = vpop.xlane.xlu0 %6338 }
 0x983   :  { %14564 = vrcp.f32 %v6339_v63  ;;  %v6342_v4 = vpop.xlane.xlu1 %6341 }
 0x984   :  { %14566 = vrcp.f32 %v6342_v4 }
 0x986   :  { %v6345_v31 = vpop.xlane.xlu0 %6344 }
 0x987   :  { %14568 = vrcp.f32 %v6345_v31  ;;  %v6348_v16 = vpop.xlane.xlu1 %6347 }
 0x988   :  { %14570 = vrcp.f32 %v6348_v16 }
 0x989   :  { %v14563_v13 = vpop.eup %14562 }
 0x98a   :  { %v6351_v54 = vpop.xlane.xlu0 %6350  ;;  %v6390_v51 = vmul.f32 %v14563_v13, %v16184_v35 }
 0x98b   :  { %14572 = vrcp.f32 %v6351_v54  ;;  %v6354_v49 = vpop.xlane.xlu1 %6353 }
 0x98c   :  { %14574 = vrcp.f32 %v6354_v49  ;;  %13929 = vmatmul.mubr.msk.f32.vlgmr.msra.gmra.mrb[82].mxu0 %vm540_vm1, %v6390_v51 }
 0x98d   :  { %v14565_v6 = vpop.eup %14564  ;;  %13937 = vmatpush3.msra.mxu0 %v16157_v15  ;;  %13938 = vmatprep.mubr.msk.f32.mxu0 %vm14835_vm0, %v17438_v12 }
 0x98e   :  { %v14567_v5 = vpop.eup %14566  ;;  %v6357_v46 = vpop.xlane.xlu0 %6356  ;;  %13946 = vmatprep.subr.mxu0 %v17438_v12  ;;  %v6391_v59 = vmul.f32 %v14565_v6, %v16190_v52 }
 0x98f   :  { %14576 = vrcp.f32 %v6357_v46  ;;  %v6360_v42 = vpop.xlane.xlu1 %6359  ;;  %v6392_v35 = vmul.f32 %v14567_v5, %v16192_v24 }
 0x990   :  { %14578 = vrcp.f32 %v6360_v42  ;;  %13934 = vmatmul.mubr.msk.f32.vlgmr.msra.gmra.mrb[86].mxu1 %vm540_vm1, %v6391_v59 }
 0x991   :  { %v14569_v18 = vpop.eup %14568  ;;  %13939 = vmatmul.mubr.msk.f32.vlgmr.msra.gmra.mrb[84].mxu0 %vm540_vm1, %v6392_v35  ;;  %13942 = vmatpush3.msra.mxu1 %v16159_v7 }
 0x992   :  { %v14571_v15 = vpop.eup %14570  ;;  %13947 = vmatpush3.msra.mxu0 %v16161_v10  ;;  %v6363_v63 = vpop.xlane.xlu0 %6362  ;;  %13943 = vmatprep.mubr.msk.f32.mxu1 %vm14835_vm0, %v17438_v12  ;;  %v6393_v52 = vmul.f32 %v14569_v18, %v16200_v3 }
 0x993   :  { %14580 = vrcp.f32 %v6363_v63  ;;  %v6366_v4 = vpop.xlane.xlu1 %6365  ;;  %13948 = vmatprep.mubr.msk.f32.mxu0 %vm14835_vm0, %v17438_v12  ;;  %13951 = vmatprep.subr.mxu1 %v17438_v12  ;;  %v6394_v24 = vmul.f32 %v14571_v15, %v16202_v36 }
 0x994   :  { %14582 = vrcp.f32 %v6366_v4  ;;  %13956 = vmatprep.subr.mxu0 %v17438_v12  ;;  %13944 = vmatmul.mubr.msk.f32.vlgmr.msra.gmra.mrb[88].mxu1 %vm540_vm1, %v6393_v52 }
 0x995   :  { %v14573_v7 = vpop.eup %14572  ;;  %13949 = vmatmul.mubr.msk.f32.vlgmr.msra.gmra.mrb[86].mxu0 %vm540_vm1, %v6394_v24  ;;  %13952 = vmatpush3.msra.mxu1 %v16163_v57 }
 0x996   :  { %v14575_v10 = vpop.eup %14574  ;;  %13957 = vmatpush3.msra.mxu0 %v16165_v8  ;;  %v6369_v3 = vpop.xlane.xlu0 %6368  ;;  %13953 = vmatprep.mubr.msk.f32.mxu1 %vm14835_vm0, %v17438_v12  ;;  %v6395_v31 = vmul.f32 %v14573_v7, %v16209_v20 }
 0x997   :  { %14584 = vrcp.f32 %v6369_v3  ;;  %13958 = vmatprep.mubr.msk.f32.mxu0 %vm14835_vm0, %v17438_v12  ;;  %13961 = vmatprep.subr.mxu1 %v17438_v12  ;;  %v6396_v36 = vmul.f32 %v14575_v10, %v16211_v58 }
 0x998   :  { %13966 = vmatprep.subr.mxu0 %v17438_v12  ;;  %13954 = vmatmul.mubr.msk.f32.vlgmr.msra.gmra.mrb[90].mxu1 %vm540_vm1, %v6395_v31 }
 0x999   :  { %v14577_v57 = vpop.eup %14576  ;;  %13959 = vmatmul.mubr.msk.f32.vlgmr.msra.gmra.mrb[88].mxu0 %vm540_vm1, %v6396_v36  ;;  %13962 = vmatpush3.msra.mxu1 %v16167_v25 }
 0x99a   :  { %v14579_v8 = vpop.eup %14578  ;;  %13967 = vmatpush3.msra.mxu0 %v16169_v38  ;;  %13963 = vmatprep.mubr.msk.f32.mxu1 %vm14835_vm0, %v17438_v12  ;;  %v6397_v20 = vmul.f32 %v14577_v57, %v16217_v33 }
 0x99b   :  { %13968 = vmatprep.mubr.msk.f32.mxu0 %vm14835_vm0, %v17438_v12  ;;  %13971 = vmatprep.subr.mxu1 %v17438_v12  ;;  %v6398_v58 = vmul.f32 %v14579_v8, %v16219_v47 }
 0x99c   :  { %13976 = vmatprep.subr.mxu0 %v17438_v12  ;;  %13964 = vmatmul.mubr.msk.f32.vlgmr.msra.gmra.mrb[92].mxu1 %vm540_vm1, %v6397_v20 }
 0x99d   :  { %v14581_v25 = vpop.eup %14580  ;;  %13969 = vmatmul.mubr.msk.f32.vlgmr.msra.gmra.mrb[90].mxu0 %vm540_vm1, %v6398_v58  ;;  %13972 = vmatpush3.msra.mxu1 %v16171_v56 }
 0x99e   :  { %v14583_v38 = vpop.eup %14582  ;;  %13977 = vmatpush3.msra.mxu0 %v16173_v44  ;;  %13973 = vmatprep.mubr.msk.f32.mxu1 %vm14835_vm0, %v17438_v12  ;;  %v6399_v33 = vmul.f32 %v14581_v25, %v16225_v48  ;;  %v7627_v48 = vpop.permute.xlu0 %7626 }
 0x99f   :  { %13978 = vmatprep.mubr.msk.f32.mxu0 %vm14835_vm0, %v17438_v12  ;;  %13981 = vmatprep.subr.mxu1 %v17438_v12  ;;  %v6400_v47 = vmul.f32 %v14583_v38, %v16227_v50 }
 0x9a0   :  { %13986 = vmatprep.subr.mxu0 %v17438_v12  ;;  %13974 = vmatmul.mubr.msk.f32.vlgmr.msra.gmra.mrb[94].mxu1 %vm540_vm1, %v6399_v33 }
 0x9a1   :  { %v14585_v56 = vpop.eup %14584  ;;  %13979 = vmatmul.mubr.msk.f32.vlgmr.msra.gmra.mrb[92].mxu0 %vm540_vm1, %v6400_v47  ;;  %13982 = vmatpush3.msra.mxu1 %v16175_v29  ;;  %v7705_v29 = vpop.permute.xlu1 %7704 }
 0x9a2   :  { %13987 = vmatpush3.msra.mxu0 %v16285_v14  ;;  %13983 = vmatprep.mubr.msk.f32.mxu1 %vm14835_vm0, %v17438_v12  ;;  %v6401_v44 = vmul.f32 %v14585_v56, %v16233_v9  ;;  %v7625_v9 = vpop.permute.xlu0 %7624 }
 0x9a3   :  { %13991 = vmatprep.subr.mxu1 %v17438_v12  ;;  %13988 = vmatprep.mubr.msk.f32.mxu0 %vm14835_vm0, %v17438_v12 }
 0x9a4   :  { %13984 = vmatmul.mubr.msk.f32.vlgmr.msra.gmra.mrb[96].mxu1 %vm540_vm1, %v6401_v44  ;;  %13996 = vmatprep.subr.mxu0 %v17438_v12 }
 0x9a5   :  { %13992 = vmatpush3.msra.mxu1 %v16283_v11  ;;  %13993 = vmatprep.mubr.msk.f32.mxu1 %vm14835_vm0, %v17438_v12  ;;  %v7703_v50 = vpop.permute.xlu1 %7702 }
 0x9a6   :  { %14001 = vmatprep.subr.mxu1 %v17438_v12  ;;  %v7783_v13 = vpop.permute.xlu0 %7782 }
 0x9a9   :  { %v7861_v14 = vpop.permute.xlu1 %7860 }
 0x9aa   :  { %v7781_v51 = vpop.permute.xlu0 %7780 }
 0x9ae   :  { %v7939_v5 = vpop.permute.xlu0 %7938 }
 0x9d0   :  { %v6372_v16 = vpop.xlane.xlu1 %6371 }
 0x9d1   :  { %14586 = vrcp.f32 %v6372_v16 }
 0x9d4   :  { %v6375_v54 = vpop.xlane.xlu1 %6374 }
 0x9d5   :  { %14588 = vrcp.f32 %v6375_v54 }
 0x9d8   :  { %v7859_v6 = vpop.permute.xlu1 %7858 }
 0x9db   :  { %v14587_v49 = vpop.eup %14586 }
 0x9dc   :  { %v6402_v11 = vmul.f32 %v14587_v49, %v16261_v55  ;;  %v8017_v42 = vpop.permute.xlu1 %8016  ;;  %v7937_v55 = vpop.permute.xlu0 %7936 }
 0x9de   :  { %13989 = vmatmul.mubr.msk.f32.vlgmr.msra.gmra.mrb[94].mxu0 %vm540_vm1, %v6402_v11 }
 0x9df   :  { %v14589_v46 = vpop.eup %14588  ;;  %13997 = vmatpush3.xpose.msk.msra.mxu0 %vm540_vm1, %v16289_v62  ;;  %13998 = vmatprep.mubr.msk.f32.mxu0 %vm14835_vm0, %v17438_v12 }
 0x9e0   :  { %14006 = vmatprep.subr.mxu0 %v17438_v12  ;;  %v6403_v59 = vmul.f32 %v14589_v46, %v16267_v53  ;;  %v8015_v53 = vpop.permute.xlu1 %8014 }
 0x9e2   :  { %13994 = vmatmul.mubr.msk.f32.vlgmr.msra.gmra.mrb[98].mxu1 %vm540_vm1, %v6403_v59  ;;  %13999 = vmatmul.mubr.msk.f32.vlgmr.msra.gmra.mrb[96].mxu0 %vm540_vm1, %v16293_v0 }
 0x9e3   :  { %14002 = vmatpush3.xpose.msk.msra.mxu1 %vm540_vm1, %v16287_v60  ;;  %14007 = vmatpush3.xpose.msk.msra.mxu0 %vm540_vm1, %v7627_v48  ;;  %v8095_v60 = vpop.permute.xlu0 %8094 }
 0x9e4   :  { %14003 = vmatprep.mubr.msk.f32.mxu1 %vm14835_vm0, %v17438_v12  ;;  %14008 = vmatprep.mubr.msk.f32.mxu0 %vm14835_vm0, %v17438_v12  ;;  %v8093_v62 = vpop.permute.xlu1 %8092 }
 0x9e5   :  { %14011 = vmatprep.subr.mxu1 %v17438_v12  ;;  %14016 = vmatprep.subr.mxu0 %v17438_v12 }
 0x9e6   :  { %14004 = vmatmul.mubr.msk.f32.vlgmr.msra.gmra.mrb[100].mxu1 %vm540_vm1, %v16291_v61  ;;  %14009 = vmatmul.mubr.msk.f32.vlgmr.msra.gmra.mrb[98].mxu0 %vm540_vm1, %v7625_v9 }
 0x9e7   :  { %14012 = vmatpush3.xpose.msk.msra.mxu1 %vm540_vm1, %v7705_v29  ;;  %14017 = vmatpush3.xpose.msk.msra.mxu0 %vm540_vm1, %v7783_v13  ;;  %v8251_v61 = vpop.permute.xlu0 %8250 }
 0x9e8   :  { %14013 = vmatprep.mubr.msk.f32.mxu1 %vm14835_vm0, %v17438_v12  ;;  %14018 = vmatprep.mubr.msk.f32.mxu0 %vm14835_vm0, %v17438_v12  ;;  %v8249_v0 = vpop.permute.xlu1 %8248 }
 0x9e9   :  { %14021 = vmatprep.subr.mxu1 %v17438_v12  ;;  %14026 = vmatprep.subr.mxu0 %v17438_v12 }
 0x9ea   :  { %14014 = vmatmul.mubr.msk.f32.vlgmr.msra.gmra.mrb[102].mxu1 %vm540_vm1, %v7703_v50  ;;  %14019 = vmatmul.mubr.msk.f32.vlgmr.msra.gmra.mrb[100].mxu0 %vm540_vm1, %v7781_v51 }
 0x9eb   :  { %14022 = vmatpush3.xpose.msk.msra.mxu1 %vm540_vm1, %v7861_v14  ;;  %14027 = vmatpush3.xpose.msk.msra.mxu0 %vm540_vm1, %v7939_v5  ;;  %v8407_v35 = vpop.permute.xlu0 %8406 }
 0x9ec   :  { %14023 = vmatprep.mubr.msk.f32.mxu1 %vm14835_vm0, %v17438_v12  ;;  %14028 = vmatprep.mubr.msk.f32.mxu0 %vm14835_vm0, %v17438_v12  ;;  %v8405_v18 = vpop.permute.xlu1 %8404 }
 0x9ed   :  { %14031 = vmatprep.subr.mxu1 %v17438_v12  ;;  %14036 = vmatprep.subr.mxu0 %v17438_v12 }
 0x9ee   :  { %14024 = vmatmul.mubr.msk.f32.vlgmr.msra.gmra.mrb[104].mxu1 %vm540_vm1, %v7859_v6  ;;  %14029 = vmatmul.mubr.msk.f32.vlgmr.msra.gmra.mrb[102].mxu0 %vm540_vm1, %v7937_v55 }
 0x9ef   :  { %14032 = vmatpush3.xpose.msk.msra.mxu1 %vm540_vm1, %v8017_v42  ;;  %14037 = vmatpush3.xpose.msk.msra.mxu0 %vm540_vm1, %v8095_v60 }
 0x9f0   :  { %14033 = vmatprep.mubr.msk.f32.mxu1 %vm14835_vm0, %v17438_v12  ;;  %14038 = vmatprep.mubr.msk.f32.mxu0 %vm14835_vm0, %v17438_v12 }
 0x9f1   :  { %14046 = vmatprep.subr.mxu0 %v17438_v12  ;;  %14041 = vmatprep.subr.mxu1 %v17438_v12 }
 0x9f2   :  { %14034 = vmatmul.mubr.msk.f32.vlgmr.msra.gmra.mrb[106].mxu1 %vm540_vm1, %v8015_v53  ;;  %14039 = vmatmul.mubr.msk.f32.vlgmr.msra.gmra.mrb[104].mxu0 %vm540_vm1, %v8093_v62 }
 0x9f3   :  { %14047 = vmatpush3.xpose.msk.msra.mxu0 %vm540_vm1, %v8251_v61  ;;  %14048 = vmatprep.mubr.msk.f32.mxu0 %vm14835_vm0, %v17438_v12 }
 0x9f4   :  { %14056 = vmatprep.subr.mxu0 %v17438_v12  ;;  %14043 = vmatprep.mubr.msk.f32.mxu1 %vm14835_vm0, %v17438_v12 }
 0x9f6   :  { %14049 = vmatmul.mubr.msk.f32.vlgmr.msra.gmra.mrb[106].mxu0 %vm540_vm1, %v8249_v0 }
 0x9f7   :  { %14057 = vmatpush3.xpose.msk.msra.mxu0 %vm540_vm1, %v8407_v35  ;;  %14058 = vmatprep.mubr.msk.f32.mxu0 %vm14835_vm0, %v17438_v12 }
 0x9f8   :  { %14066 = vmatprep.subr.mxu0 %v17438_v12 }
 0x9fa   :  { %14059 = vmatmul.mubr.msk.f32.vlgmr.msra.gmra.mrb[108].mxu0 %vm540_vm1, %v8405_v18 }
 0x9fb   :  { %14068 = vmatprep.mubr.msk.f32.mxu0 %vm14835_vm0, %v17438_v12 }
 0xa5f   :  { %v16434_v15 = vpop.f32.mrb[82].mxu0 }
 0xa60   :  { %v13930_v63 = vpop.f32.mrb[83].mxu0 }
 0xa63   :  { %v16436_v52 = vpop.f32.mrb[86].mxu1 }
 0xa64   :  { %v16438_v4 = vpop.f32.mrb[84].mxu0  ;;  %v13935_v24 = vpop.f32.mrb[87].mxu1 }
 0xa65   :  { %v13940_v7 = vpop.f32.mrb[85].mxu0 }
 0xa67   :  { %v16440_v10 = vpop.f32.mrb[88].mxu1 }
 0xa68   :  { %v16442_v3 = vpop.f32.mrb[86].mxu0  ;;  %v13945_v31 = vpop.f32.mrb[89].mxu1 }
 0xa69   :  { %v13950_v36 = vpop.f32.mrb[87].mxu0 }
 0xa6b   :  { %v16444_v57 = vpop.f32.mrb[90].mxu1 }
 0xa6c   :  { %v16446_v8 = vpop.f32.mrb[88].mxu0  ;;  %v13955_v20 = vpop.f32.mrb[91].mxu1 }
 0xa6d   :  { %v13960_v58 = vpop.f32.mrb[89].mxu0 }
 0xa6f   :  { %v16448_v25 = vpop.f32.mrb[92].mxu1 }
 0xa70   :  { %v16450_v38 = vpop.f32.mrb[90].mxu0  ;;  %v13965_v33 = vpop.f32.mrb[93].mxu1 }
 0xa71   :  { %v13970_v47 = vpop.f32.mrb[91].mxu0 }
 0xa73   :  { %v16452_v56 = vpop.f32.mrb[94].mxu1 }
 0xa74   :  { %v16454_v44 = vpop.f32.mrb[92].mxu0  ;;  %v13975_v29 = vpop.f32.mrb[95].mxu1 }
 0xa75   :  { %v13980_v48 = vpop.f32.mrb[93].mxu0 }
 0xa77   :  { %v16456_v50 = vpop.f32.mrb[96].mxu1 }
 0xa78   :  { %v13985_v9 = vpop.f32.mrb[97].mxu1 }
 0xab1   :  { %v16458_v14 = vpop.f32.mrb[94].mxu0 }
 0xab2   :  { %v13990_v16 = vpop.f32.mrb[95].mxu0 }
 0xab5   :  { %v16460_v13 = vpop.f32.mrb[98].mxu1  ;;  %v7542_v54 = vpop.f32.mrb[96].mxu0 }
 0xab6   :  { %v13995_v51 = vpop.f32.mrb[99].mxu1  ;;  %v14000_v49 = vpop.f32.mrb[97].mxu0  ;;  %v8560_v6 = vsel %vm540_vm1, %v7542_v54, -inf }
 0xab7   :  { %8561 = vmax.xlane.f32.xlu0 %v8560_v6  ;;  %v17476_v49 = vld [vmem:[#allocation15_spill] sm:$0xff]  ;;  %v17477_v6 = vld [vmem:[#allocation16_spill] sm:$0xff] }
 0xab9   :  { %v7620_v11 = vpop.f32.mrb[100].mxu1  ;;  %v7698_v5 = vpop.f32.mrb[98].mxu0 }
 0xaba   :  { %v14005_v46 = vpop.f32.mrb[101].mxu1  ;;  %v14010_v59 = vpop.f32.mrb[99].mxu0  ;;  %v8563_v42 = vsel %vm540_vm1, %v7620_v11, -inf  ;;  %v8566_v55 = vsel %vm540_vm1, %v7698_v5, -inf }
 0xabb   :  { %8564 = vmax.xlane.f32.xlu1 %v8563_v42  ;;  %8567 = vmax.xlane.f32.xlu0 %v8566_v55  ;;  %v17478_v46 = vld [vmem:[#allocation18_spill] sm:$0xff] }
 0xabc   :  { %v17479_v59 = vld [vmem:[#allocation10_spill] sm:$0xff] }
 0xabd   :  { %v7776_v53 = vpop.f32.mrb[102].mxu1  ;;  %v7854_v60 = vpop.f32.mrb[100].mxu0 }
 0xabe   :  { %v14015_v62 = vpop.f32.mrb[103].mxu1  ;;  %v14020_v61 = vpop.f32.mrb[101].mxu0  ;;  %v8569_v0 = vsel %vm540_vm1, %v7776_v53, -inf  ;;  %v8572_v35 = vsel %vm540_vm1, %v7854_v60, -inf }
 0xabf   :  { %8570 = vmax.xlane.f32.xlu0 %v8569_v0  ;;  %8573 = vmax.xlane.f32.xlu1 %v8572_v35 }
 0xac1   :  { %v7932_v18 = vpop.f32.mrb[104].mxu1  ;;  %v8010_v63 = vpop.f32.mrb[102].mxu0 }
 0xac2   :  { %v14025_v24 = vpop.f32.mrb[105].mxu1  ;;  %v14030_v7 = vpop.f32.mrb[103].mxu0  ;;  %v8575_v31 = vsel %vm540_vm1, %v7932_v18, -inf  ;;  %v8578_v36 = vsel %vm540_vm1, %v8010_v63, -inf }
 0xac3   :  { %8576 = vmax.xlane.f32.xlu0 %v8575_v31  ;;  %8579 = vmax.xlane.f32.xlu1 %v8578_v36 }
 0xac5   :  { %v8088_v20 = vpop.f32.mrb[106].mxu1  ;;  %v16469_v58 = vpop.f32.mrb[104].mxu0 }
 0xac6   :  { %v14035_v33 = vpop.f32.mrb[107].mxu1  ;;  %v14040_v47 = vpop.f32.mrb[105].mxu0  ;;  %v8581_v29 = vsel %vm540_vm1, %v8088_v20, -inf }
 0xac7   :  { %8582 = vmax.xlane.f32.xlu0 %v8581_v29 }
 0xac9   :  { %v16472_v48 = vpop.f32.mrb[106].mxu0 }
 0xaca   :  { %v14050_v9 = vpop.f32.mrb[107].mxu0 }
 0xacd   :  { %v16474_v16 = vpop.f32.mrb[108].mxu0 }
 0xace   :  { %v14060_v51 = vpop.f32.mrb[109].mxu0 }
 0xad4   :  { %8170 = vrot.lane.b32.xlu1 %v17476_v49, %s14845_s30 }
 0xad8   :  { %8326 = vrot.lane.b32.xlu1 %v17477_v6, %s14845_s30 }
 0xadc   :  { %8482 = vrot.lane.b32.xlu1 %v17478_v46, %s14845_s30 }
 0xadd   :  { %8172 = vrot.lane.b32.xlu0 %v17479_v59, %s14844_s29 }
 0xae0   :  { %8790 = vrot.lane.b32.xlu1 %v14993_v17, %s14846_s3 }
 0xae1   :  { %8328 = vrot.lane.b32.xlu0 %v15033_v39, %s14844_s29 }
 0xae4   :  { %8942 = vrot.lane.b32.xlu1 %v15001_v21, %s14846_s3 }
 0xae5   :  { %8484 = vrot.lane.b32.xlu0 %v15041_v43, %s14844_s29 }
 0xae8   :  { %9094 = vrot.lane.b32.xlu1 %v15009_v26, %s14846_s3 }
 0xae9   :  { %8714 = vrot.lane.b32.xlu0 %v14995_v19, %s14846_s3 }
 0xaed   :  { %8866 = vrot.lane.b32.xlu0 %v15003_v23, %s14846_s3 }
 0xaf1   :  { %9018 = vrot.lane.b32.xlu0 %v15011_v28, %s14846_s3 }
 0xb44   :  { %v8562_v17 = vpop.xlane.xlu0 %8561 }
 0xb45   :  { %v8602_v42 = vsub.f32 %v7542_v54, %v8562_v17 }
 0xb47   :  { %v8616_v55 = vmul.f32 1.442695, %v8602_v42 }
 0xb48   :  { %v8565_v62 = vpop.xlane.xlu1 %8564  ;;  %v8568_v21 = vpop.xlane.xlu0 %8567 }
 0xb49   :  { %14590 = vpow2.f32 %v8616_v55  ;;  %v8603_v61 = vsub.f32 %v7620_v11, %v8565_v62  ;;  %v8604_v0 = vsub.f32 %v7698_v5, %v8568_v21 }
 0xb4b   :  { %v8618_v35 = vmul.f32 1.442695, %v8603_v61  ;;  %v8620_v24 = vmul.f32 1.442695, %v8604_v0 }
 0xb4c   :  { %v8571_v26 = vpop.xlane.xlu0 %8570  ;;  %v8574_v7 = vpop.xlane.xlu1 %8573 }
 0xb4d   :  { %14592 = vpow2.f32 %v8618_v35  ;;  %v8605_v19 = vsub.f32 %v7776_v53, %v8571_v26  ;;  %v8606_v31 = vsub.f32 %v7854_v60, %v8574_v7 }
 0xb4e   :  { %14594 = vpow2.f32 %v8620_v24 }
 0xb4f   :  { %v8622_v23 = vmul.f32 1.442695, %v8605_v19  ;;  %v8624_v36 = vmul.f32 1.442695, %v8606_v31 }
 0xb50   :  { %v8577_v33 = vpop.xlane.xlu0 %8576  ;;  %v8580_v28 = vpop.xlane.xlu1 %8579 }
 0xb51   :  { %14596 = vpow2.f32 %v8622_v23  ;;  %v8607_v54 = vsub.f32 %v7932_v18, %v8577_v33  ;;  %v8608_v47 = vsub.f32 %v8010_v63, %v8580_v28  ;;  %v8584_v28 = vsel %vm540_vm1, %v16469_v58, -inf }
 0xb52   :  { %14598 = vpow2.f32 %v8624_v36 }
 0xb53   :  { %v16500_v29 = vpop.eup %14590  ;;  %v8626_v11 = vmul.f32 1.442695, %v8607_v54  ;;  %v8628_v5 = vmul.f32 1.442695, %v8608_v47  ;;  %v8596_v54 = vsel %vm540_vm1, %v16474_v16, -inf  ;;  %v8590_v47 = vsel %vm540_vm1, %v16472_v48, -inf }
 0xb54   :  { %v8583_v9 = vpop.xlane.xlu0 %8582  ;;  %v8171_v51 = vpop.permute.xlu1 %8170  ;;  %v8644_v49 = vsel %vm540_vm1, %v16500_v29, 0.0 }
 0xb55   :  { %14600 = vpow2.f32 %v8626_v11  ;;  %v8609_v53 = vsub.f32 %v8088_v20, %v8583_v9  ;;  %8645 = vadd.xlane.f32.xlu1 %v8644_v49 }
 0xb56   :  { %14602 = vpow2.f32 %v8628_v5 }
 0xb57   :  { %v16504_v60 = vpop.eup %14592  ;;  %v8630_v6 = vmul.f32 1.442695, %v8609_v53 }
 0xb58   :  { %v16506_v46 = vpop.eup %14594  ;;  %v8173_v18 = vpop.permute.xlu0 %8172  ;;  %v8647_v17 = vsel %vm540_vm1, %v16504_v60, 0.0 }
 0xb59   :  { %v8327_v63 = vpop.permute.xlu1 %8326  ;;  %14604 = vpow2.f32 %v8630_v6  ;;  %8648 = vadd.xlane.f32.xlu0 %v8647_v17  ;;  %14042 = vmatpush3.xpose.msk.msra.mxu1 %vm540_vm1, %v8173_v18  ;;  %v8650_v42 = vsel %vm540_vm1, %v16506_v46, 0.0 }
 0xb5a   :  { %8651 = vadd.xlane.f32.xlu1 %v8650_v42  ;;  %14051 = vmatprep.subr.mxu1 %v17438_v12 }
 0xb5b   :  { %v16514_v20 = vpop.eup %14596 }
 0xb5c   :  { %v16516_v55 = vpop.eup %14598  ;;  %v8329_v62 = vpop.permute.xlu0 %8328  ;;  %14044 = vmatmul.mubr.msk.f32.vlgmr.msra.gmra.mrb[108].mxu1 %vm540_vm1, %v8171_v51  ;;  %v8653_v21 = vsel %vm540_vm1, %v16514_v20, 0.0 }
 0xb5d   :  { %8654 = vadd.xlane.f32.xlu0 %v8653_v21  ;;  %v8656_v61 = vsel %vm540_vm1, %v16516_v55, 0.0  ;;  %14052 = vmatpush3.xpose.msk.msra.mxu1 %vm540_vm1, %v8329_v62  ;;  %v8483_v0 = vpop.permute.xlu1 %8482 }
 0xb5e   :  { %8657 = vadd.xlane.f32.xlu1 %v8656_v61  ;;  %14053 = vmatprep.mubr.msk.f32.mxu1 %vm14835_vm0, %v17438_v12 }
 0xb5f   :  { %v16526_v35 = vpop.eup %14600  ;;  %14061 = vmatprep.subr.mxu1 %v17438_v12 }
 0xb60   :  { %v16529_v24 = vpop.eup %14602  ;;  %v8485_v26 = vpop.permute.xlu0 %8484  ;;  %14054 = vmatmul.mubr.msk.f32.vlgmr.msra.gmra.mrb[110].mxu1 %vm540_vm1, %v8327_v63  ;;  %v8659_v7 = vsel %vm540_vm1, %v16526_v35, 0.0 }
 0xb61   :  { %8660 = vadd.xlane.f32.xlu0 %v8659_v7  ;;  %v8662_v19 = vsel %vm540_vm1, %v16529_v24, 0.0  ;;  %14062 = vmatpush3.xpose.msk.msra.mxu1 %vm540_vm1, %v8485_v26  ;;  %v8791_v23 = vpop.permute.xlu1 %8790 }
 0xb62   :  { %8663 = vadd.xlane.f32.xlu1 %v8662_v19  ;;  %14063 = vmatprep.mubr.msk.f32.mxu1 %vm14835_vm0, %v17438_v12 }
 0xb63   :  { %v16539_v31 = vpop.eup %14604  ;;  %14071 = vmatprep.subr.mxu1 %v17438_v12 }
 0xb64   :  { %v8715_v36 = vpop.permute.xlu0 %8714  ;;  %14064 = vmatmul.mubr.msk.f32.vlgmr.msra.gmra.mrb[112].mxu1 %vm540_vm1, %v8483_v0  ;;  %v8665_v33 = vsel %vm540_vm1, %v16539_v31, 0.0 }
 0xb65   :  { %14067 = vmatpush3.msra.mxu0 %v8715_v36  ;;  %14072 = vmatpush3.msra.mxu1 %v8791_v23 }
 0xb66   :  { %8666 = vadd.xlane.f32.xlu1 %v8665_v33  ;;  %14076 = vmatprep.subr.mxu0 %v17438_v12  ;;  %v17481_v33 = vld [vmem:[#allocation34_spill] sm:$0xff] }
 0xb67   :  { %14073 = vmatprep.mubr.msk.f32.mxu1 %vm14835_vm0, %v17438_v12  ;;  %14081 = vmatprep.subr.mxu1 %v17438_v12 }
 0xb77   :  { %9246 = vrot.lane.b32.xlu1 %v15017_v30, %s14846_s3  ;;  %9170 = vrot.lane.b32.xlu0 %v15019_v32, %s14846_s3  ;;  %v17480_v30 = vld [vmem:[#allocation33_spill] sm:$0xff]  ;;  %v8943_v32 = vpop.permute.xlu1 %8942 }
 0xb96   :  { %8585 = vmax.xlane.f32.xlu0 %v8584_v28 }
 0xb9a   :  { %8597 = vmax.xlane.f32.xlu0 %v8596_v54 }
 0xb9b   :  { %8591 = vmax.xlane.f32.xlu1 %v8590_v47 }
 0xbac   :  { %9322 = vrot.lane.b32.xlu1 %v15027_v37, %s14846_s3  ;;  %v8867_v37 = vpop.permute.xlu0 %8866 }
 0xbb0   :  { %9626 = vrot.lane.b32.xlu1 %v15043_v45, %s14846_s3  ;;  %9474 = vrot.lane.b32.xlu0 %v15035_v41, %s14846_s3  ;;  %v9095_v41 = vpop.permute.xlu1 %9094  ;;  %v9019_v45 = vpop.permute.xlu0 %9018 }
 0xbb4   :  { %9792 = vrot.lane.b32.xlu1 %v16061_v2, %s14832_s20  ;;  %9794 = vrot.lane.b32.xlu0 %v16063_v34, %s14832_s20 }
 0xbb8   :  { %9848 = vrot.lane.b32.xlu1 %v16434_v15, %s14847_s4  ;;  %9850 = vrot.lane.b32.xlu0 %v16436_v52, %s14847_s4 }
 0xbbc   :  { %9796 = vrot.lane.b32.xlu1 %v16065_v27, %s14832_s20  ;;  %9798 = vrot.lane.b32.xlu0 %v16067_v1, %s14832_s20 }
 0xbc0   :  { %9852 = vrot.lane.b32.xlu1 %v16438_v4, %s14847_s4  ;;  %9854 = vrot.lane.b32.xlu0 %v16440_v10, %s14847_s4 }
 0xbc4   :  { %9800 = vrot.lane.b32.xlu1 %v16069_v40, %s14832_s20  ;;  %9802 = vrot.lane.b32.xlu0 %v16071_v22, %s14832_s20 }
 0xbc8   :  { %9856 = vrot.lane.b32.xlu1 %v16442_v3, %s14847_s4  ;;  %9858 = vrot.lane.b32.xlu0 %v16444_v57, %s14847_s4 }
 0xbcc   :  { %9804 = vrot.lane.b32.xlu1 %v17480_v30, %s14832_s20 }
 0xbd0   :  { %9860 = vrot.lane.b32.xlu1 %v16446_v8, %s14847_s4 }
 0xbe2   :  { %v8646_v2 = vpop.xlane.xlu1 %8645 }
 0xbe3   :  { %14606 = vrcp.f32 %v8646_v2 }
 0xbe6   :  { %v8649_v34 = vpop.xlane.xlu0 %8648 }
 0xbe7   :  { %14608 = vrcp.f32 %v8649_v34  ;;  %v8652_v27 = vpop.xlane.xlu1 %8651 }
 0xbe8   :  { %14610 = vrcp.f32 %v8652_v27 }
 0xbea   :  { %v8655_v1 = vpop.xlane.xlu0 %8654 }
 0xbeb   :  { %14612 = vrcp.f32 %v8655_v1  ;;  %v8658_v40 = vpop.xlane.xlu1 %8657 }
 0xbec   :  { %14614 = vrcp.f32 %v8658_v40 }
 0xbed   :  { %v14607_v22 = vpop.eup %14606 }
 0xbee   :  { %v8661_v15 = vpop.xlane.xlu0 %8660  ;;  %v8700_v52 = vmul.f32 %v14607_v22, %v16500_v29 }
 0xbef   :  { %14616 = vrcp.f32 %v8661_v15  ;;  %v8664_v4 = vpop.xlane.xlu1 %8663 }
 0xbf0   :  { %14618 = vrcp.f32 %v8664_v4  ;;  %14069 = vmatmul.mubr.msk.f32.vlgmr.msra.gmra.mrb[110].mxu0 %vm540_vm1, %v8700_v52 }
 0xbf1   :  { %v14609_v10 = vpop.eup %14608  ;;  %14077 = vmatpush3.msra.mxu0 %v8867_v37  ;;  %14078 = vmatprep.mubr.msk.f32.mxu0 %vm14835_vm0, %v17438_v12 }
 0xbf2   :  { %v14611_v3 = vpop.eup %14610  ;;  %14086 = vmatprep.subr.mxu0 %v17438_v12  ;;  %v8701_v57 = vmul.f32 %v14609_v10, %v16504_v60  ;;  %v9171_v53 = vpop.permute.xlu0 %9170 }
 0xbf3   :  { %v8667_v8 = vpop.xlane.xlu1 %8666  ;;  %v8702_v11 = vmul.f32 %v14611_v3, %v16506_v46 }
 0xbf4   :  { %14620 = vrcp.f32 %v8667_v8  ;;  %14074 = vmatmul.mubr.msk.f32.vlgmr.msra.gmra.mrb[114].mxu1 %vm540_vm1, %v8701_v57 }
 0xbf5   :  { %v14613_v29 = vpop.eup %14612  ;;  %14079 = vmatmul.mubr.msk.f32.vlgmr.msra.gmra.mrb[112].mxu0 %vm540_vm1, %v8702_v11  ;;  %14082 = vmatpush3.msra.mxu1 %v8943_v32 }
 0xbf6   :  { %v14615_v5 = vpop.eup %14614  ;;  %14087 = vmatpush3.msra.mxu0 %v9019_v45  ;;  %14083 = vmatprep.mubr.msk.f32.mxu1 %vm14835_vm0, %v17438_v12  ;;  %v8703_v9 = vmul.f32 %v14613_v29, %v16514_v20 }
 0xbf7   :  { %14088 = vmatprep.mubr.msk.f32.mxu0 %vm14835_vm0, %v17438_v12  ;;  %14091 = vmatprep.subr.mxu1 %v17438_v12  ;;  %v8704_v51 = vmul.f32 %v14615_v5, %v16516_v55  ;;  %v9247_v18 = vpop.permute.xlu1 %9246 }
 0xbf8   :  { %14096 = vmatprep.subr.mxu0 %v17438_v12  ;;  %14084 = vmatmul.mubr.msk.f32.vlgmr.msra.gmra.mrb[116].mxu1 %vm540_vm1, %v8703_v9 }
 0xbf9   :  { %v14617_v49 = vpop.eup %14616  ;;  %14089 = vmatmul.mubr.msk.f32.vlgmr.msra.gmra.mrb[114].mxu0 %vm540_vm1, %v8704_v51  ;;  %14092 = vmatpush3.msra.mxu1 %v9095_v41 }
 0xbfa   :  { %v14619_v60 = vpop.eup %14618  ;;  %14097 = vmatpush3.msra.mxu0 %v9171_v53  ;;  %14093 = vmatprep.mubr.msk.f32.mxu1 %vm14835_vm0, %v17438_v12  ;;  %v8705_v6 = vmul.f32 %v14617_v49, %v16526_v35 }
 0xbfb   :  { %14098 = vmatprep.mubr.msk.f32.mxu0 %vm14835_vm0, %v17438_v12  ;;  %14101 = vmatprep.subr.mxu1 %v17438_v12  ;;  %v8706_v46 = vmul.f32 %v14619_v60, %v16529_v24 }
 0xbfc   :  { %14094 = vmatmul.mubr.msk.f32.vlgmr.msra.gmra.mrb[118].mxu1 %vm540_vm1, %v8705_v6  ;;  %14106 = vmatprep.subr.mxu0 %v17438_v12 }
 0xbfd   :  { %14099 = vmatmul.mubr.msk.f32.vlgmr.msra.gmra.mrb[116].mxu0 %vm540_vm1, %v8706_v46  ;;  %14102 = vmatpush3.msra.mxu1 %v9247_v18 }
 0xbfe   :  { %v14621_v63 = vpop.eup %14620  ;;  %14103 = vmatprep.mubr.msk.f32.mxu1 %vm14835_vm0, %v17438_v12  ;;  %14108 = vmatprep.mubr.msk.f32.mxu0 %vm14835_vm0, %v17438_v12 }
 0xbff   :  { %v8707_v17 = vmul.f32 %v14621_v63, %v16539_v31  ;;  %14111 = vmatprep.subr.mxu1 %v17438_v12 }
 0xc01   :  { %14104 = vmatmul.mubr.msk.f32.vlgmr.msra.gmra.mrb[120].mxu1 %vm540_vm1, %v8707_v17 }
 0xc02   :  { %14113 = vmatprep.mubr.msk.f32.mxu1 %vm14835_vm0, %v17438_v12 }
 0xc23   :  { %v8586_v42 = vpop.xlane.xlu0 %8585 }
 0xc24   :  { %v8610_v20 = vsub.f32 %v16469_v58, %v8586_v42  ;;  %v37_v42 = vld [vmem:[#allocation2 + $0x58] sm:$0xff] }
 0xc26   :  { %v8632_v55 = vmul.f32 1.442695, %v8610_v20  ;;  %v38_v20 = vld [vmem:[#allocation2 + $0x60] sm:$0xff] }
 0xc27   :  { %v8598_v28 = vpop.xlane.xlu0 %8597 }
 0xc28   :  { %14622 = vpow2.f32 %v8632_v55  ;;  %v8592_v62 = vpop.xlane.xlu1 %8591  ;;  %v8614_v54 = vsub.f32 %v16474_v16, %v8598_v28  ;;  %v39_v28 = vld [vmem:[#allocation2 + $0x68] sm:$0xff] }
 0xc29   :  { %v8612_v21 = vsub.f32 %v16472_v48, %v8592_v62 }
 0xc2a   :  { %v8640_v47 = vmul.f32 1.442695, %v8614_v54  ;;  %v40_v54 = vld [vmem:[#allocation2 + $0x70] sm:$0xff] }
 0xc2b   :  { %v8636_v61 = vmul.f32 1.442695, %v8612_v21  ;;  %v9475_v45 = vpop.permute.xlu0 %9474 }
 0xc2c   :  { %v9323_v0 = vpop.permute.xlu1 %9322 }
 0xc2d   :  { %14624 = vpow2.f32 %v8636_v61  ;;  %14107 = vmatpush3.msra.mxu0 %v9323_v0 }
 0xc2e   :  { %14116 = vmatprep.subr.mxu0 %v17438_v12  ;;  %14626 = vpow2.f32 %v8640_v47 }
 0xc2f   :  { %v16634_v35 = vpop.f32.mrb[108].mxu1  ;;  %v16658_v34 = vpop.permute.xlu0 %9794 }
 0xc30   :  { %v14045_v24 = vpop.f32.mrb[109].mxu1  ;;  %v9627_v37 = vpop.permute.xlu1 %9626 }
 0xc31   :  { %v14356_v24 = vpack.c.bf16 %v38_v20, %v37_v42 }
 0xc32   :  { %v14623_v26 = vpop.eup %14622 }
 0xc33   :  { %v16636_v7 = vpop.f32.mrb[110].mxu1  ;;  %v8668_v19 = vsel %vm540_vm1, %v14623_v26, 0.0  ;;  %v16662_v27 = vpop.permute.xlu0 %9850 }
 0xc34   :  { %v14055_v58 = vpop.f32.mrb[111].mxu1  ;;  %8669 = vadd.xlane.f32.xlu0 %v8668_v19  ;;  %v16654_v41 = vpop.permute.xlu1 %9792 }
 0xc37   :  { %v16639_v31 = vpop.eup %14624  ;;  %v16641_v23 = vpop.f32.mrb[112].mxu1 }
 0xc38   :  { %v14065_v48 = vpop.f32.mrb[113].mxu1  ;;  %v8674_v36 = vsel %vm540_vm1, %v16639_v31, 0.0  ;;  %v16648_v30 = vpop.eup %14626 }
 0xc39   :  { %8675 = vadd.xlane.f32.xlu1 %v8674_v36  ;;  %v8680_v32 = vsel %vm540_vm1, %v16648_v30, 0.0  ;;  %v16656_v2 = vpop.permute.xlu1 %9848  ;;  %v16666_v40 = vpop.permute.xlu0 %9798  ;;  %v8593_v48 = vsel %vm540_vm1, %v16636_v7, -inf }
 0xc3d   :  { %v16660_v16 = vpop.permute.xlu1 %9796  ;;  %v16670_v15 = vpop.permute.xlu0 %9854 }
 0xc41   :  { %v16664_v1 = vpop.permute.xlu1 %9852  ;;  %v16674_v52 = vpop.permute.xlu0 %9802 }
 0xc45   :  { %v16668_v22 = vpop.permute.xlu1 %9800  ;;  %v16678_v10 = vpop.permute.xlu0 %9858 }
 0xc4a   :  { %9806 = vrot.lane.b32.xlu0 %v17481_v33, %s14832_s20  ;;  %v8599_v33 = vsel %vm540_vm1, %v16641_v23, -inf }
 0xc69   :  { %8681 = vadd.xlane.f32.xlu0 %v8680_v32 }
 0xc7f   :  { %9862 = vrot.lane.b32.xlu0 %v16448_v25, %s14847_s4  ;;  %v16672_v25 = vpop.permute.xlu1 %9856 }
 0xc83   :  { %v16676_v4 = vpop.permute.xlu1 %9804 }
 0xc87   :  { %v16680_v57 = vpop.permute.xlu1 %9860 }
 0xcc1   :  { %v8670_v3 = vpop.xlane.xlu0 %8669 }
 0xcc2   :  { %14628 = vrcp.f32 %v8670_v3 }
 0xcc3   :  { %v8786_v8 = vpop.f32.mrb[110].mxu0 }
 0xcc4   :  { %9904 = vrot.lane.b32.xlu1 %v8786_v8, %s14848_s5  ;;  %v14070_v11 = vpop.f32.mrb[111].mxu0 }
 0xcc5   :  { %v9807_v58 = vpop.permute.xlu0 %9806 }
 0xcc6   :  { %v8676_v29 = vpop.xlane.xlu1 %8675 }
 0xcc7   :  { %14630 = vrcp.f32 %v8676_v29  ;;  %v8862_v5 = vpop.f32.mrb[114].mxu1 }
 0xcc8   :  { %v8938_v9 = vpop.f32.mrb[112].mxu0  ;;  %v14075_v51 = vpop.f32.mrb[115].mxu1  ;;  %9906 = vrot.lane.b32.xlu0 %v8862_v5, %s14848_s5 }
 0xcc9   :  { %9908 = vrot.lane.b32.xlu1 %v8938_v9, %s14848_s5  ;;  %v14080_v49 = vpop.f32.mrb[113].mxu0 }
 0xcca   :  { %v17484_v49 = vld [vmem:[#allocation21_spill] sm:$0xff] }
 0xccb   :  { %v9014_v53 = vpop.f32.mrb[116].mxu1 }
 0xccc   :  { %v14629_v60 = vpop.eup %14628  ;;  %v9090_v6 = vpop.f32.mrb[114].mxu0  ;;  %9910 = vrot.lane.b32.xlu0 %v9014_v53, %s14848_s5 }
 0xccd   :  { %v14085_v46 = vpop.f32.mrb[117].mxu1  ;;  %9912 = vrot.lane.b32.xlu1 %v9090_v6, %s14848_s5  ;;  %v14090_v18 = vpop.f32.mrb[115].mxu0  ;;  %v8708_v63 = vmul.f32 %v14629_v60, %v14623_v26 }
 0xccf   :  { %v9166_v17 = vpop.f32.mrb[118].mxu1  ;;  %14109 = vmatmul.mubr.msk.f32.vlgmr.msra.gmra.mrb[118].mxu0 %vm540_vm1, %v8708_v63 }
 0xcd0   :  { %v9242_v55 = vpop.f32.mrb[116].mxu0  ;;  %14117 = vmatpush3.msra.mxu0 %v9475_v45  ;;  %v14095_v62 = vpop.f32.mrb[119].mxu1  ;;  %9914 = vrot.lane.b32.xlu0 %v9166_v17, %s14848_s5  ;;  %v17482_v45 = vld [vmem:[#allocation19_spill] sm:$0xff] }
 0xcd1   :  { %v14631_v21 = vpop.eup %14630  ;;  %9916 = vrot.lane.b32.xlu1 %v9242_v55, %s14848_s5  ;;  %v14100_v61 = vpop.f32.mrb[117].mxu0  ;;  %14118 = vmatprep.mubr.msk.f32.mxu0 %vm14835_vm0, %v17438_v12  ;;  %v9946_v3 = vsel %vm540_vm1, %v17482_v45, %v16654_v41  ;;  %v9948_v41 = vsel %vm540_vm1, %v17484_v49, %v16660_v16 }
 0xcd2   :  { %14126 = vmatprep.subr.mxu0 %v17438_v12  ;;  %v8710_v0 = vmul.f32 %v14631_v21, %v16639_v31  ;;  %v8587_v31 = vsel %vm540_vm1, %v16634_v35, -inf  ;;  %v9961_v8 = vsel %vm9960_vm3, %v9946_v3, %v16656_v2  ;;  %v9963_v2 = vsel %vm9960_vm3, %v9948_v41, %v16664_v1 }
 0xcd4   :  { %v9318_v26 = vpop.f32.mrb[120].mxu1  ;;  %14119 = vmatmul.mubr.msk.f32.vlgmr.msra.gmra.mrb[120].mxu0 %vm540_vm1, %v8710_v0 }
 0xcd5   :  { %14127 = vmatpush3.msra.mxu0 %v9627_v37  ;;  %v14105_v19 = vpop.f32.mrb[121].mxu1  ;;  %9918 = vrot.lane.b32.xlu0 %v9318_v26, %s14848_s5  ;;  %v14360_v37 = vpack.c.bf16 %v40_v54, %v39_v28 }
 0xcd6   :  { %14128 = vmatprep.mubr.msk.f32.mxu0 %vm14835_vm0, %v17438_v12  ;;  %14357 = vmatprep.subr.bf16.mxu0 %v14356_v24 }
 0xcf4   :  { %8594 = vmax.xlane.f32.xlu0 %v8593_v48 }
 0xcf5   :  { %8588 = vmax.xlane.f32.xlu1 %v8587_v31 }
 0xcf6   :  { %v8682_v36 = vpop.xlane.xlu0 %8681 }
 0xcf7   :  { %14632 = vrcp.f32 %v8682_v36 }
 0xcf8   :  { %8600 = vmax.xlane.f32.xlu0 %v8599_v33 }
 0xcfa   :  { %v9863_v11 = vpop.permute.xlu0 %9862 }
 0xd01   :  { %v14633_v47 = vpop.eup %14632 }
 0xd02   :  { %v8712_v32 = vmul.f32 %v14633_v47, %v16648_v30  ;;  %v17483_v30 = vld [vmem:[#allocation20_spill] sm:$0xff] }
 0xd03   :  { %v9947_v9 = vsel %vm540_vm1, %v17483_v30, %v16658_v34  ;;  %v17485_v34 = vld [vmem:[#allocation22_spill] sm:$0xff]  ;;  %v17490_v30 = vld [vmem:[#allocation35_spill] sm:$0xff] }
 0xd04   :  { %14129 = vmatmul.mubr.msk.f32.vlgmr.msra.gmra.mrb[122].mxu0 %vm540_vm1, %v8712_v32  ;;  %v9962_v51 = vsel %vm9960_vm3, %v9947_v9, %v16662_v27  ;;  %v9949_v18 = vsel %vm540_vm1, %v17485_v34, %v16666_v40  ;;  %v17486_v27 = vld [vmem:[#allocation23_spill] sm:$0xff]  ;;  %v17487_v40 = vld [vmem:[#allocation24_spill] sm:$0xff] }
 0xd05   :  { %14359 = vmatpush3.bf16.msra.mxu0 %v14356_v24  ;;  %v9964_v16 = vsel %vm9960_vm3, %v9949_v18, %v16670_v15  ;;  %v9950_v1 = vsel %vm540_vm1, %v17486_v27, %v16668_v22  ;;  %v9951_v62 = vsel %vm540_vm1, %v17487_v40, %v16674_v52  ;;  %v17488_v15 = vld [vmem:[#allocation25_spill] sm:$0xff]  ;;  %v17489_v52 = vld [vmem:[#allocation26_spill] sm:$0xff]  ;;  %v17491_v9 = vld [vmem:[#allocation36_spill] sm:$0xff] }
 0xd06   :  { %14361 = vmatprep.subr.bf16.mxu0 %v14360_v37  ;;  %v9965_v17 = vsel %vm9960_vm3, %v9950_v1, %v16672_v25  ;;  %v9966_v22 = vsel %vm9960_vm3, %v9951_v62, %v16678_v10  ;;  %v9952_v25 = vsel %vm540_vm1, %v17488_v15, %v16676_v4  ;;  %v9953_v10 = vsel %vm540_vm1, %v17489_v52, %v9807_v58  ;;  %v42_v40 = vld [vmem:[#allocation2 + $0x80] sm:$0xff]  ;;  %v44_v52 = vld [vmem:[#allocation2 + $0x90] sm:$0xff] }
 0xd07   :  { %v9967_v61 = vsel %vm9960_vm3, %v9952_v25, %v16680_v57  ;;  %v9968_v19 = vsel %vm9960_vm3, %v9953_v10, %v9863_v11 }
 0xd09   :  { %14363 = vmatpush3.bf16.msra.mxu0 %v14360_v37 }
 0xd36   :  { %v9905_v29 = vpop.permute.xlu1 %9904 }
 0xd37   :  { %v9976_v5 = vsel %vm9975_vm2, %v9961_v8, %v9905_v29 }
 0xd38   :  { %14144 = vmatprep.mubr.msk.f32.mxu0 %vm345_vm15, %v9976_v5 }
 0xd3a   :  { %v9907_v53 = vpop.permute.xlu0 %9906 }
 0xd3b   :  { %v9977_v60 = vsel %vm9975_vm2, %v9962_v51, %v9907_v53  ;;  %v9909_v6 = vpop.permute.xlu1 %9908  ;;  %v17492_v51 = vld [vmem:[#allocation37_spill] sm:$0xff] }
 0xd3c   :  { %v9978_v46 = vsel %vm9975_vm2, %v9963_v2, %v9909_v6  ;;  %14145 = vmatmul.mubr.msk.f32.vlgmr.msra.gmra.mrb[124].mxu0 %vm345_vm15, %v9977_v60 }
 0xd3d   :  { %14147 = vmatprep.mubr.msk.f32.mxu0 %vm345_vm15, %v9978_v46 }
 0xd3e   :  { %v9911_v63 = vpop.permute.xlu0 %9910 }
 0xd3f   :  { %v9979_v42 = vsel %vm9975_vm2, %v9964_v16, %v9911_v63  ;;  %v9913_v20 = vpop.permute.xlu1 %9912 }
 0xd40   :  { %v9980_v55 = vsel %vm9975_vm2, %v9965_v17, %v9913_v20  ;;  %14148 = vmatmul.mubr.msk.f32.gmra.mrb[126].mxu0 %vm345_vm15, %v9979_v42  ;;  %v17496_v42 = vld [vmem:[#allocation9_spill] sm:$0xff] }
 0xd41   :  { %14150 = vmatprep.mubr.msk.f32.mxu0 %vm345_vm15, %v9980_v55  ;;  %v9992_v20 = vsub.s32 1, %v17496_v42  ;;  %v41_v55 = vld [vmem:[#allocation2 + $0x78] sm:$0xff] }
 0xd42   :  { %v9915_v21 = vpop.permute.xlu0 %9914 }
 0xd43   :  { %v9981_v0 = vsel %vm9975_vm2, %v9966_v22, %v9915_v21  ;;  %v9917_v24 = vpop.permute.xlu1 %9916  ;;  %v17497_v22 = vld [vmem:[#allocation29_spill] sm:$0xff]  ;;  %v14364_v21 = vpack.c.bf16 %v42_v40, %v41_v55  ;;  %v17500_v55 = vld [vmem:[#allocation28_spill] sm:$0xff] }
 0xd44   :  { %v9982_v26 = vsel %vm9975_vm2, %v9967_v61, %v9917_v24  ;;  %14151 = vmatmul.mubr.msk.f32.gmra.mrb[128].mxu0 %vm345_vm15, %v9981_v0  ;;  %v16824_v0 = vld [vmem:[#allocation2 + $0x118] sm:$0xff] }
 0xd45   :  { %14153 = vmatprep.mubr.msk.f32.mxu0 %vm345_vm15, %v9982_v26  ;;  %v16829_v24 = vrot.slane %v16824_v0, %v9992_v20  ;;  %v43_v26 = vld [vmem:[#allocation2 + $0x88] sm:$0xff] }
 0xd47   :  { %v9919_v48 = vpop.permute.xlu0 %9918 }
 0xd48   :  { %v9983_v4 = vsel %vm9975_vm2, %v9968_v19, %v9919_v48 }
 0xd49   :  { %14154 = vmatmul.mubr.msk.f32.gmra.mrb[130].mxu0 %vm345_vm15, %v9983_v4 }
 0xd81   :  { %v8595_v57 = vpop.xlane.xlu0 %8594 }
 0xd82   :  { %v8613_v31 = vsub.f32 %v16636_v7, %v8595_v57  ;;  %v8589_v36 = vpop.xlane.xlu1 %8588  ;;  %v14368_v57 = vpack.c.bf16 %v44_v52, %v43_v26  ;;  %v17501_v26 = vld [vmem:[#allocation30_spill] sm:$0xff] }
 0xd83   :  { %v8611_v33 = vsub.f32 %v16634_v35, %v8589_v36 }
 0xd84   :  { %v8638_v28 = vmul.f32 1.442695, %v8613_v31 }
 0xd85   :  { %v8634_v54 = vmul.f32 1.442695, %v8611_v33  ;;  %v8601_v47 = vpop.xlane.xlu0 %8600  ;;  %v17498_v33 = vld [vmem:[#allocation31_spill] sm:$0xff] }
 0xd86   :  { %14634 = vpow2.f32 %v8638_v28  ;;  %v8615_v32 = vsub.f32 %v16641_v23, %v8601_v47 }
 0xd87   :  { %14636 = vpow2.f32 %v8634_v54 }
 0xd88   :  { %v8642_v58 = vmul.f32 1.442695, %v8615_v32 }
 0xd8a   :  { %14638 = vpow2.f32 %v8642_v58 }
 0xd90   :  { %v16763_v37 = vpop.eup %14634 }
 0xd91   :  { %v14637_v45 = vpop.eup %14636  ;;  %v8677_v3 = vsel %vm540_vm1, %v16763_v37, 0.0 }
 0xd92   :  { %8678 = vadd.xlane.f32.xlu0 %v8677_v3  ;;  %v8671_v7 = vsel %vm540_vm1, %v14637_v45, 0.0 }
 0xd93   :  { %8672 = vadd.xlane.f32.xlu1 %v8671_v7 }
 0xd94   :  { %v16768_v35 = vpop.eup %14638 }
 0xd95   :  { %v8683_v8 = vsel %vm540_vm1, %v16768_v35, 0.0 }
 0xd97   :  { %8684 = vadd.xlane.f32.xlu1 %v8683_v8 }
 0xda2   :  { %v9394_v23 = vpop.f32.mrb[118].mxu0 }
 0xda3   :  { %v14110_v11 = vpop.f32.mrb[119].mxu0 }
 0xda7   :  { %v9546_v29 = vpop.f32.mrb[120].mxu0 }
 0xda8   :  { %9398 = vrot.lane.b32.xlu0 %v17479_v59, %s14846_s3  ;;  %9550 = vrot.lane.b32.xlu1 %v15033_v39, %s14846_s3  ;;  %v14120_v5 = vpop.f32.mrb[121].mxu0  ;;  %v17493_v39 = vld [vmem:[#allocation38_spill] sm:$0xff] }
 0xdac   :  { %9808 = vrot.lane.b32.xlu0 %v17490_v30, %s14832_s20  ;;  %9702 = vrot.lane.b32.xlu1 %v15041_v43, %s14846_s3  ;;  %v17494_v43 = vld [vmem:[#allocation39_spill] sm:$0xff]  ;;  %v45_v30 = vld [vmem:[#allocation2 + $0x98] sm:$0xff] }
 0xdb0   :  { %9864 = vrot.lane.b32.xlu0 %v16450_v38, %s14847_s4  ;;  %9810 = vrot.lane.b32.xlu1 %v17491_v9, %s14832_s20  ;;  %v17495_v38 = vld [vmem:[#allocation40_spill] sm:$0xff]  ;;  %v46_v9 = vld [vmem:[#allocation2 + $0xa0] sm:$0xff] }
 0xdb4   :  { %9812 = vrot.lane.b32.xlu0 %v17492_v51, %s14832_s20  ;;  %9866 = vrot.lane.b32.xlu1 %v16452_v56, %s14847_s4  ;;  %v14372_v51 = vpack.c.bf16 %v46_v9, %v45_v30 }
 0xdb6   :  { %14373 = vmatprep.subr.bf16.mxu0 %v14372_v51 }
 0xdb7   :  { %14375 = vmatpush3.bf16.msra.mxu0 %v14372_v51  ;;  %v10354_v51 = vsub.s32 3, %v17496_v42 }
 0xdb8   :  { %9868 = vrot.lane.b32.xlu0 %v16454_v44, %s14847_s4  ;;  %9814 = vrot.lane.b32.xlu1 %v17493_v39, %s14832_s20  ;;  %v47_v39 = vld [vmem:[#allocation2 + $0xa8] sm:$0xff] }
 0xdbc   :  { %9816 = vrot.lane.b32.xlu0 %v17494_v43, %s14832_s20  ;;  %9870 = vrot.lane.b32.xlu1 %v16456_v50, %s14847_s4  ;;  %v48_v43 = vld [vmem:[#allocation2 + $0xb0] sm:$0xff] }
 0xdc0   :  { %9872 = vrot.lane.b32.xlu0 %v16458_v14, %s14847_s4  ;;  %9818 = vrot.lane.b32.xlu1 %v17495_v38, %s14832_s20  ;;  %v14376_v38 = vpack.c.bf16 %v48_v43, %v47_v39 }
 0xdc2   :  { %14377 = vmatprep.subr.bf16.mxu0 %v14376_v38 }
 0xdc3   :  { %14379 = vmatpush3.bf16.msra.mxu0 %v14376_v38 }
 0xdc4   :  { %9874 = vrot.lane.b32.xlu1 %v16460_v13, %s14847_s4  ;;  %9920 = vrot.lane.b32.xlu0 %v9394_v23, %s14848_s5 }
 0xdc5   :  { %14264 = vmatprep.subr.mxu0 %v17438_v12 }
 0xdc8   :  { %9924 = vrot.lane.b32.xlu0 %v9546_v29, %s14848_s5 }
 0xdd7   :  { %v9698_v56 = vpop.f32.mrb[122].mxu0 }
 0xdd8   :  { %9928 = vrot.lane.b32.xlu0 %v9698_v56, %s14848_s5  ;;  %v14130_v44 = vpop.f32.mrb[123].mxu0 }
 0xe0f   :  { %v14146_v59 = vpop.f32.mrb[124].mxu0 }
 0xe10   :  { %v10102_v49 = vpop.f32.mrb[125].mxu0  ;;  %v10108_v47 = vadd.f32 %v14146_v59, %v16829_v24 }
 0xe11   :  { %v10103_v31 = vadd.f32 %v10102_v49, %v16829_v24 }
 0xe13   :  { %v16805_v50 = vpop.f32.mrb[126].mxu0 }
 0xe14   :  { %v10112_v41 = vpop.f32.mrb[127].mxu0 }
 0xe15   :  { %v10113_v58 = vadd.f32 %v10112_v41, %v16829_v24 }
 0xe17   :  { %v16807_v14 = vpop.f32.mrb[128].mxu0 }
 0xe18   :  { %v16809_v53 = vpop.f32.mrb[129].mxu0  ;;  %v10128_v11 = vadd.f32 %v16807_v14, %v16829_v24 }
 0xe19   :  { %v10123_v23 = vadd.f32 %v16809_v53, %v16829_v24 }
 0xe1c   :  { %v16811_v2 = vpop.f32.mrb[130].mxu0 }
 0xe1d   :  { %v16813_v13 = vpop.f32.mrb[131].mxu0  ;;  %v10138_v5 = vadd.f32 %v16811_v2, %v16829_v24 }
 0xe1e   :  { %v10133_v29 = vadd.f32 %v16813_v13, %v16829_v24 }
 0xe1f   :  { %v8679_v60 = vpop.xlane.xlu0 %8678 }
 0xe20   :  { %v8673_v6 = vpop.xlane.xlu1 %8672 }
 0xe21   :  { %14640 = vrcp.f32 %v8673_v6 }
 0xe22   :  { %14642 = vrcp.f32 %v8679_v60 }
 0xe23   :  { %v9399_v46 = vpop.permute.xlu0 %9398 }
 0xe24   :  { %14112 = vmatpush3.msra.mxu1 %v9399_v46  ;;  %v8685_v34 = vpop.xlane.xlu1 %8684 }
 0xe25   :  { %14121 = vmatprep.subr.mxu1 %v17438_v12  ;;  %14644 = vrcp.f32 %v8685_v34 }
 0xe27   :  { %v9809_v18 = vpop.permute.xlu0 %9808 }
 0xe28   :  { %v9551_v1 = vpop.permute.xlu1 %9550 }
 0xe2b   :  { %v14641_v16 = vpop.eup %14640  ;;  %v9865_v27 = vpop.permute.xlu0 %9864 }
 0xe2c   :  { %v8709_v63 = vmul.f32 %v14641_v16, %v14637_v45  ;;  %v14643_v17 = vpop.eup %14642  ;;  %v9703_v10 = vpop.permute.xlu1 %9702 }
 0xe2d   :  { %v8711_v25 = vmul.f32 %v14643_v17, %v16763_v37  ;;  %v17499_v37 = vld [vmem:[#allocation27_spill] sm:$0xff] }
 0xe2e   :  { %14114 = vmatmul.mubr.msk.f32.vlgmr.msra.gmra.mrb[122].mxu1 %vm540_vm1, %v8709_v63  ;;  %v9954_v45 = vsel %vm540_vm1, %v17499_v37, %v9809_v18 }
 0xe2f   :  { %14122 = vmatpush3.msra.mxu1 %v9551_v1  ;;  %v9813_v62 = vpop.permute.xlu0 %9812  ;;  %14123 = vmatprep.mubr.msk.f32.mxu1 %vm14835_vm0, %v17438_v12  ;;  %v14645_v61 = vpop.eup %14644  ;;  %v9969_v3 = vsel %vm9960_vm3, %v9954_v45, %v9865_v27 }
 0xe30   :  { %v9956_v15 = vsel %vm540_vm1, %v17497_v22, %v9813_v62  ;;  %14131 = vmatprep.subr.mxu1 %v17438_v12  ;;  %v8713_v4 = vmul.f32 %v14645_v61, %v16768_v35  ;;  %v10118_v35 = vadd.f32 %v16805_v50, %v16829_v24  ;;  %v9811_v18 = vpop.permute.xlu1 %9810 }
 0xe31   :  { %v9955_v40 = vsel %vm540_vm1, %v17500_v55, %v9811_v18 }
 0xe32   :  { %14124 = vmatmul.mubr.msk.f32.vlgmr.msra.gmra.mrb[124].mxu1 %vm540_vm1, %v8711_v25  ;;  %v10173_v25 = vsub.s32 2, %v17496_v42 }
 0xe33   :  { %14132 = vmatpush3.msra.mxu1 %v9703_v10  ;;  %v9869_v19 = vpop.permute.xlu0 %9868  ;;  %14133 = vmatprep.mubr.msk.f32.mxu1 %vm14835_vm0, %v17438_v12 }
 0xe34   :  { %v16835_v48 = vsel %vm9960_vm3, %v9956_v15, %v9869_v19  ;;  %14365 = vmatprep.subr.bf16.mxu1 %v14364_v21  ;;  %v9867_v16 = vpop.permute.xlu1 %9866 }
 0xe35   :  { %v9970_v22 = vsel %vm9960_vm3, %v9955_v40, %v9867_v16 }
 0xe36   :  { %14134 = vmatmul.mubr.msk.f32.vlgmr.msra.gmra.mrb[126].mxu1 %vm540_vm1, %v8713_v4 }
 0xe37   :  { %14367 = vmatpush3.bf16.msra.mxu1 %v14364_v21  ;;  %v9817_v36 = vpop.permute.xlu0 %9816  ;;  %14173 = vmatprep.mubr.msk.f32.mxu1 %vm345_vm15, %v10103_v31 }
 0xe38   :  { %v9958_v28 = vsel %vm540_vm1, %v17498_v33, %v9817_v36  ;;  %14369 = vmatprep.subr.bf16.mxu1 %v14368_v57  ;;  %v9815_v27 = vpop.permute.xlu1 %9814  ;;  %v17502_v36 = vld [vmem:[#allocation32_spill] sm:$0xff] }
 0xe39   :  { %v9957_v52 = vsel %vm540_vm1, %v17501_v26, %v9815_v27 }
 0xe3b   :  { %14371 = vmatpush3.bf16.msra.mxu1 %v14368_v57  ;;  %v9873_v54 = vpop.permute.xlu0 %9872  ;;  %v16889_v57 = vrot.slane %v16824_v0, %v10173_v25 }
 0xe3c   :  { %v16845_v32 = vsel %vm9960_vm3, %v9958_v28, %v9873_v54  ;;  %v9871_v1 = vpop.permute.xlu1 %9870 }
 0xe3d   :  { %v9972_v19 = vsel %vm9960_vm3, %v9957_v52, %v9871_v1 }
 0xe3e   :  { %14174 = vmatmul.mubr.msk.f32.vlgmr.msra.gmra.mrb[128].mxu1 %vm345_vm15, %v10108_v47 }
 0xe3f   :  { %14176 = vmatprep.mubr.msk.f32.mxu1 %vm345_vm15, %v10113_v58  ;;  %v9921_v7 = vpop.permute.xlu0 %9920 }
 0xe40   :  { %v9984_v8 = vsel %vm9975_vm2, %v9969_v3, %v9921_v7  ;;  %v9819_v63 = vpop.permute.xlu1 %9818 }
 0xe41   :  { %14156 = vmatprep.mubr.msk.f32.mxu0 %vm345_vm15, %v9984_v8  ;;  %v9959_v33 = vsel %vm540_vm1, %v17502_v36, %v9819_v63 }
 0xe42   :  { %14177 = vmatmul.mubr.msk.f32.gmra.mrb[130].mxu1 %vm345_vm15, %v10118_v35 }
 0xe43   :  { %14179 = vmatprep.mubr.msk.f32.mxu1 %vm345_vm15, %v10123_v23  ;;  %v9925_v62 = vpop.permute.xlu0 %9924 }
 0xe44   :  { %v9875_v17 = vpop.permute.xlu1 %9874  ;;  %v9986_v61 = vsel %vm9975_vm2, %v16835_v48, %v9925_v62 }
 0xe45   :  { %v9974_v28 = vsel %vm9960_vm3, %v9959_v33, %v9875_v17 }
 0xe46   :  { %14180 = vmatmul.mubr.msk.f32.gmra.mrb[132].mxu1 %vm345_vm15, %v10128_v11 }
 0xe47   :  { %14182 = vmatprep.mubr.msk.f32.mxu1 %vm345_vm15, %v10133_v29 }
 0xe4a   :  { %14183 = vmatmul.mubr.msk.f32.gmra.mrb[134].mxu1 %vm345_vm15, %v10138_v5  ;;  %v9929_v10 = vpop.permute.xlu0 %9928 }
 0xe4b   :  { %v9988_v48 = vsel %vm9975_vm2, %v16845_v32, %v9929_v10 }
 0xf01   :  { %v9470_v56 = vpop.f32.mrb[122].mxu1 }
 0xf02   :  { %9922 = vrot.lane.b32.xlu1 %v9470_v56, %s14848_s5  ;;  %v14115_v44 = vpop.f32.mrb[123].mxu1 }
 0xf03   :  { %v16951_v44 = vrot.slane %v16824_v0, %v10354_v51  ;;  %v10609_v51 = vsub.s32 5, %v17496_v42 }
 0xf05   :  { %v9622_v59 = vpop.f32.mrb[124].mxu1 }
 0xf06   :  { %9926 = vrot.lane.b32.xlu1 %v9622_v59, %s14848_s5  ;;  %v14125_v49 = vpop.f32.mrb[125].mxu1 }
 0xf09   :  { %v9774_v50 = vpop.f32.mrb[126].mxu1 }
 0xf0a   :  { %9930 = vrot.lane.b32.xlu1 %v9774_v50, %s14848_s5  ;;  %v14135_v41 = vpop.f32.mrb[127].mxu1 }
 0xf11   :  { %v14175_v14 = vpop.f32.mrb[128].mxu1 }
 0xf12   :  { %v10283_v53 = vpop.f32.mrb[129].mxu1  ;;  %v16907_v32 = vadd.f32 %v14175_v14, %v16889_v57 }
 0xf13   :  { %v16900_v47 = vadd.f32 %v10283_v53, %v16889_v57 }
 0xf15   :  { %v14178_v2 = vpop.f32.mrb[130].mxu1 }
 0xf16   :  { %v10293_v13 = vpop.f32.mrb[131].mxu1  ;;  %v16917_v45 = vadd.f32 %v14178_v2, %v16889_v57 }
 0xf17   :  { %v16910_v37 = vadd.f32 %v10293_v13, %v16889_v57 }
 0xf19   :  { %v14181_v60 = vpop.f32.mrb[132].mxu1 }
 0xf1a   :  { %v10303_v6 = vpop.f32.mrb[133].mxu1  ;;  %v16927_v7 = vadd.f32 %v14181_v60, %v16889_v57 }
 0xf1b   :  { %v16920_v3 = vadd.f32 %v10303_v6, %v16889_v57  ;;  %v10549_v6 = vsub.s32 4, %v17496_v42 }
 0xf1d   :  { %v14184_v46 = vpop.f32.mrb[134].mxu1  ;;  %v16967_v27 = vrot.slane %v16824_v0, %v10549_v6 }
 0xf1e   :  { %v10313_v34 = vpop.f32.mrb[135].mxu1  ;;  %v16937_v8 = vadd.f32 %v14184_v46, %v16889_v57 }
 0xf1f   :  { %v16930_v35 = vadd.f32 %v10313_v34, %v16889_v57 }
 0xf74   :  { %v9923_v15 = vpop.permute.xlu1 %9922 }
 0xf75   :  { %v9985_v21 = vsel %vm9975_vm2, %v9970_v22, %v9923_v15 }
 0xf76   :  { %14157 = vmatmul.mubr.msk.f32.gmra.mrb[132].mxu0 %vm345_vm15, %v9985_v21 }
 0xf77   :  { %14159 = vmatprep.mubr.msk.f32.mxu0 %vm345_vm15, %v9986_v61 }
 0xf78   :  { %v9927_v4 = vpop.permute.xlu1 %9926 }
 0xf79   :  { %v9987_v31 = vsel %vm9975_vm2, %v9972_v19, %v9927_v4 }
 0xf7a   :  { %14160 = vmatmul.mubr.msk.f32.gmra.mrb[134].mxu0 %vm345_vm15, %v9987_v31 }
 0xf7b   :  { %14162 = vmatprep.mubr.msk.f32.mxu0 %vm345_vm15, %v9988_v48 }
 0xf7c   :  { %v9931_v54 = vpop.permute.xlu1 %9930 }
 0xf7d   :  { %v9989_v58 = vsel %vm9975_vm2, %v9974_v28, %v9931_v54 }
 0xf7e   :  { %14163 = vmatmul.mubr.msk.f32.gmra.mrb[136].mxu0 %vm345_vm15, %v9989_v58 }
 0xf7f   :  { %14202 = vmatprep.mubr.msk.f32.mxu0 %vm345_vm15, %v16900_v47 }
 0xf82   :  { %14203 = vmatmul.mubr.msk.f32.vlgmr.msra.gmra.mrb[138].mxu0 %vm345_vm15, %v16907_v32 }
 0xf83   :  { %14205 = vmatprep.mubr.msk.f32.mxu0 %vm345_vm15, %v16910_v37 }
 0xf86   :  { %14206 = vmatmul.mubr.msk.f32.gmra.mrb[140].mxu0 %vm345_vm15, %v16917_v45 }
 0xf87   :  { %14208 = vmatprep.mubr.msk.f32.mxu0 %vm345_vm15, %v16920_v3 }
 0xf8a   :  { %14209 = vmatmul.mubr.msk.f32.gmra.mrb[142].mxu0 %vm345_vm15, %v16927_v7 }
 0xf8b   :  { %14211 = vmatprep.mubr.msk.f32.mxu0 %vm345_vm15, %v16930_v35 }
 0xf8e   :  { %14212 = vmatmul.mubr.msk.f32.gmra.mrb[144].mxu0 %vm345_vm15, %v16937_v8 }
0x1049   :  { %v14158_v23 = vpop.f32.mrb[132].mxu0 }
0x104a   :  { %v10142_v11 = vpop.f32.mrb[133].mxu0  ;;  %v10148_v5 = vadd.f32 %v14158_v23, %v16829_v24 }
0x104b   :  { %v10143_v29 = vadd.f32 %v10142_v11, %v16829_v24 }
0x104d   :  { %v14161_v30 = vpop.f32.mrb[134].mxu0  ;;  %14185 = vmatprep.mubr.msk.f32.mxu1 %vm345_vm15, %v10143_v29 }
0x104e   :  { %v10152_v9 = vpop.f32.mrb[135].mxu0  ;;  %14186 = vmatmul.mubr.msk.f32.gmra.mrb[136].mxu1 %vm345_vm15, %v10148_v5  ;;  %v10158_v43 = vadd.f32 %v14161_v30, %v16829_v24 }
0x104f   :  { %v10153_v39 = vadd.f32 %v10152_v9, %v16829_v24 }
0x1051   :  { %v14164_v38 = vpop.f32.mrb[136].mxu0  ;;  %14188 = vmatprep.mubr.msk.f32.mxu1 %vm345_vm15, %v10153_v39  ;;  %v16989_v39 = vrot.slane %v16824_v0, %v10609_v51 }
0x1052   :  { %v10162_v56 = vpop.f32.mrb[137].mxu0  ;;  %14189 = vmatmul.mubr.msk.f32.gmra.mrb[138].mxu1 %vm345_vm15, %v10158_v43  ;;  %v10168_v49 = vadd.f32 %v14164_v38, %v16829_v24 }
0x1053   :  { %v10163_v59 = vadd.f32 %v10162_v56, %v16829_v24 }
0x1055   :  { %14191 = vmatprep.mubr.msk.f32.mxu1 %vm345_vm15, %v10163_v59  ;;  %v14204_v50 = vpop.f32.mrb[138].mxu0 }
0x1056   :  { %v10470_v41 = vadd.f32 %v14204_v50, %v16951_v44  ;;  %14192 = vmatmul.mubr.msk.f32.gmra.mrb[140].mxu1 %vm345_vm15, %v10168_v49  ;;  %v10464_v14 = vpop.f32.mrb[139].mxu0 }
0x1057   :  { %v10465_v53 = vadd.f32 %v10464_v14, %v16951_v44  ;;  %14231 = vmatprep.mubr.msk.f32.mxu1 %vm14835_vm0, %v17438_v12 }
0x1058   :  { %14646 = vtanh.f32 %v10470_v41 }
0x1059   :  { %14648 = vtanh.f32 %v10465_v53  ;;  %v14207_v2 = vpop.f32.mrb[140].mxu0 }
0x105a   :  { %v10480_v13 = vadd.f32 %v14207_v2, %v16951_v44  ;;  %v10474_v60 = vpop.f32.mrb[141].mxu0 }
0x105b   :  { %v10475_v24 = vadd.f32 %v10474_v60, %v16951_v44 }
0x105c   :  { %14650 = vtanh.f32 %v10480_v13 }
0x105d   :  { %14652 = vtanh.f32 %v10475_v24  ;;  %v14210_v46 = vpop.f32.mrb[142].mxu0 }
0x105e   :  { %v10490_v34 = vadd.f32 %v14210_v46, %v16951_v44  ;;  %v10484_v18 = vpop.f32.mrb[143].mxu0 }
0x105f   :  { %v10485_v16 = vadd.f32 %v10484_v18, %v16951_v44 }
0x1060   :  { %14654 = vtanh.f32 %v10490_v34 }
0x1061   :  { %14656 = vtanh.f32 %v10485_v16  ;;  %v14213_v1 = vpop.f32.mrb[144].mxu0 }
0x1062   :  { %v14647_v63 = vpop.eup %14646  ;;  %v10500_v17 = vadd.f32 %v14213_v1, %v16951_v44  ;;  %v10494_v55 = vpop.f32.mrb[145].mxu0 }
0x1063   :  { %v14649_v40 = vpop.eup %14648  ;;  %v10495_v62 = vadd.f32 %v10494_v55, %v16951_v44  ;;  %v10552_v22 = vmul.f32 %v14647_v63, %v16967_v27 }
0x1064   :  { %14658 = vtanh.f32 %v10500_v17  ;;  %v10551_v15 = vmul.f32 %v14649_v40, %v16967_v27 }
0x1065   :  { %14660 = vtanh.f32 %v10495_v62  ;;  %v10568_v21 = vsel %vm9960_vm3, %v10552_v22, 0.0 }
0x1066   :  { %v14651_v61 = vpop.eup %14650  ;;  %10569 = vadd.xlane.f32.xlu1 %v10568_v21  ;;  %v10565_v26 = vsel %vm9960_vm3, %v10551_v15, 0.0 }
0x1067   :  { %v14653_v52 = vpop.eup %14652  ;;  %10566 = vadd.xlane.f32.xlu0 %v10565_v26  ;;  %v10554_v10 = vmul.f32 %v14651_v61, %v16967_v27 }
0x1068   :  { %v10553_v31 = vmul.f32 %v14653_v52, %v16967_v27 }
0x1069   :  { %v10574_v19 = vsel %vm9960_vm3, %v10554_v10, 0.0 }
0x106a   :  { %v14655_v4 = vpop.eup %14654  ;;  %v10571_v54 = vsel %vm9960_vm3, %v10553_v31, 0.0 }
0x106b   :  { %v14657_v48 = vpop.eup %14656  ;;  %10575 = vadd.xlane.f32.xlu0 %v10574_v19  ;;  %v10556_v58 = vmul.f32 %v14655_v4, %v16967_v27 }
0x106c   :  { %v10555_v36 = vmul.f32 %v14657_v48, %v16967_v27 }
0x106d   :  { %v10580_v5 = vsel %vm9960_vm3, %v10556_v58, 0.0 }
0x106e   :  { %v14659_v33 = vpop.eup %14658  ;;  %v10577_v28 = vsel %vm9960_vm3, %v10555_v36, 0.0 }
0x106f   :  { %v14661_v23 = vpop.eup %14660  ;;  %10578 = vadd.xlane.f32.xlu1 %v10577_v28  ;;  %10572 = vadd.xlane.f32.xlu0 %v10571_v54  ;;  %v10558_v30 = vmul.f32 %v14659_v33, %v16967_v27 }
0x1070   :  { %v10557_v11 = vmul.f32 %v14661_v23, %v16967_v27 }
0x1071   :  { %v10586_v9 = vsel %vm9960_vm3, %v10558_v30, 0.0 }
0x1072   :  { %v10583_v29 = vsel %vm9960_vm3, %v10557_v11, 0.0 }
0x1073   :  { %10584 = vadd.xlane.f32.xlu1 %v10583_v29  ;;  %10581 = vadd.xlane.f32.xlu0 %v10580_v5 }
0x1077   :  { %10587 = vadd.xlane.f32.xlu0 %v10586_v9 }
0x10f3   :  { %v10570_v43 = vpop.xlane.xlu1 %10569 }
0x10f4   :  { %v10612_v38 = vadd.f32 %v16989_v39, %v10570_v43  ;;  %v10567_v56 = vpop.xlane.xlu0 %10566 }
0x10f5   :  { %v10611_v59 = vadd.f32 %v16989_v39, %v10567_v56 }
0x10f6   :  { %v10633_v49 = vsel %vm10625_vm4, %v10612_v38, -inf }
0x10f7   :  { %v10634_v50 = vrot.slane %v10633_v49, 4  ;;  %v10626_v41 = vsel %vm10625_vm4, %v10611_v59, -inf }
0x10f8   :  { %v10627_v14 = vrot.slane %v10626_v41, 4  ;;  %v10576_v53 = vpop.xlane.xlu0 %10575 }
0x10f9   :  { %v10635_v2 = vmax.f32 %v10633_v49, %v10634_v50  ;;  %v10614_v13 = vadd.f32 %v16989_v39, %v10576_v53 }
0x10fa   :  { %v10628_v60 = vmax.f32 %v10626_v41, %v10627_v14 }
0x10fb   :  { %v10636_v0 = vrot.slane %v10635_v2, 2  ;;  %v10647_v24 = vsel %vm10625_vm4, %v10614_v13, -inf }
0x10fc   :  { %v10629_v6 = vrot.slane %v10628_v60, 2  ;;  %v10648_v46 = vrot.slane %v10647_v24, 4  ;;  %v10579_v34 = vpop.xlane.xlu1 %10578  ;;  %v10573_v18 = vpop.xlane.xlu0 %10572 }
0x10fd   :  { %v10637_v16 = vmax.f32 %v10635_v2, %v10636_v0  ;;  %v10615_v1 = vadd.f32 %v16989_v39, %v10579_v34  ;;  %v10613_v63 = vadd.f32 %v16989_v39, %v10573_v18 }
0x10fe   :  { %v10630_v17 = vmax.f32 %v10628_v60, %v10629_v6  ;;  %v10649_v55 = vmax.f32 %v10647_v24, %v10648_v46 }
0x10ff   :  { %v10638_v40 = vrot.slane %v10637_v16, 1  ;;  %v10654_v62 = vsel %vm10625_vm4, %v10615_v1, -inf  ;;  %v10640_v22 = vsel %vm10625_vm4, %v10613_v63, -inf }
0x1100   :  { %v10631_v15 = vrot.slane %v10630_v17, 1  ;;  %v10650_v21 = vrot.slane %v10649_v55, 2  ;;  %v10655_v61 = vrot.slane %v10654_v62, 4  ;;  %v10641_v26 = vrot.slane %v10640_v22, 4  ;;  %v10585_v52 = vpop.xlane.xlu1 %10584  ;;  %v10582_v10 = vpop.xlane.xlu0 %10581 }
0x1101   :  { %v10639_v19 = vmax.f32 %v10637_v16, %v10638_v40  ;;  %v10617_v4 = vadd.f32 %v16989_v39, %v10585_v52  ;;  %v10616_v31 = vadd.f32 %v16989_v39, %v10582_v10 }
0x1102   :  { %v10632_v48 = vmax.f32 %v10630_v17, %v10631_v15  ;;  %v10651_v36 = vmax.f32 %v10649_v55, %v10650_v21  ;;  %v10656_v33 = vmax.f32 %v10654_v62, %v10655_v61  ;;  %v10642_v28 = vmax.f32 %v10640_v22, %v10641_v26 }
0x1103   :  { %v10725_v54 = vsub.f32 %v10612_v38, %v10639_v19  ;;  %v10668_v58 = vsel %vm10625_vm4, %v10617_v4, -inf  ;;  %v10661_v23 = vsel %vm10625_vm4, %v10616_v31, -inf }
0x1104   :  { %v10724_v11 = vsub.f32 %v10611_v59, %v10632_v48  ;;  %v10652_v29 = vrot.slane %v10651_v36, 1  ;;  %v10657_v5 = vrot.slane %v10656_v33, 2  ;;  %v10643_v30 = vrot.slane %v10642_v28, 2  ;;  %v10588_v9 = vpop.xlane.xlu0 %10587 }
0x1105   :  { %v10740_v51 = vmul.f32 1.442695, %v10725_v54  ;;  %v10669_v43 = vrot.slane %v10668_v58, 4  ;;  %v10662_v56 = vrot.slane %v10661_v23, 4  ;;  %v10618_v49 = vadd.f32 %v16989_v39, %v10588_v9 }
0x1106   :  { %v10738_v50 = vmul.f32 1.442695, %v10724_v11  ;;  %v10653_v41 = vmax.f32 %v10651_v36, %v10652_v29  ;;  %v10658_v14 = vmax.f32 %v10656_v33, %v10657_v5  ;;  %v10644_v53 = vmax.f32 %v10642_v28, %v10643_v30 }
0x1107   :  { %14662 = vpow2.f32 %v10740_v51  ;;  %v10670_v38 = vmax.f32 %v10668_v58, %v10669_v43  ;;  %v10663_v2 = vmax.f32 %v10661_v23, %v10662_v56  ;;  %v10675_v60 = vsel %vm10625_vm4, %v10618_v49, -inf }
0x1108   :  { %14664 = vpow2.f32 %v10738_v50  ;;  %v10727_v59 = vsub.f32 %v10614_v13, %v10653_v41  ;;  %v10659_v0 = vrot.slane %v10658_v14, 1  ;;  %v10645_v24 = vrot.slane %v10644_v53, 1 }
0x1109   :  { %v10671_v6 = vrot.slane %v10670_v38, 2  ;;  %v10664_v46 = vrot.slane %v10663_v2, 2  ;;  %v10676_v34 = vrot.slane %v10675_v60, 4 }
0x110a   :  { %v10744_v18 = vmul.f32 1.442695, %v10727_v59  ;;  %v10660_v16 = vmax.f32 %v10658_v14, %v10659_v0  ;;  %v10646_v17 = vmax.f32 %v10644_v53, %v10645_v24 }
0x110b   :  { %v10672_v55 = vmax.f32 %v10670_v38, %v10671_v6  ;;  %v10665_v40 = vmax.f32 %v10663_v2, %v10664_v46  ;;  %v10677_v62 = vmax.f32 %v10675_v60, %v10676_v34 }
0x110c   :  { %14666 = vpow2.f32 %v10744_v18  ;;  %v10728_v22 = vsub.f32 %v10615_v1, %v10660_v16  ;;  %v10726_v15 = vsub.f32 %v10613_v63, %v10646_v17 }
0x110d   :  { %v10673_v21 = vrot.slane %v10672_v55, 1  ;;  %v10666_v61 = vrot.slane %v10665_v40, 1  ;;  %v10678_v26 = vrot.slane %v10677_v62, 2 }
0x110e   :  { %v10746_v52 = vmul.f32 1.442695, %v10728_v22  ;;  %v10742_v10 = vmul.f32 1.442695, %v10726_v15 }
0x110f   :  { %v10674_v13 = vmax.f32 %v10672_v55, %v10673_v21  ;;  %v10667_v19 = vmax.f32 %v10665_v40, %v10666_v61  ;;  %v10679_v48 = vmax.f32 %v10677_v62, %v10678_v26 }
0x1110   :  { %14668 = vpow2.f32 %v10746_v52 }
0x1111   :  { %v17007_v36 = vpop.eup %14662  ;;  %14670 = vpow2.f32 %v10742_v10  ;;  %v10730_v33 = vsub.f32 %v10617_v4, %v10674_v13  ;;  %v10729_v28 = vsub.f32 %v10616_v31, %v10667_v19  ;;  %v10680_v54 = vrot.slane %v10679_v48, 1 }
0x1112   :  { %v17009_v58 = vpop.eup %14664  ;;  %v10773_v1 = vsel %vm10625_vm4, %v17007_v36, 0.0 }
0x1113   :  { %v10774_v63 = vrot.slane %v10773_v1, 4  ;;  %v10766_v23 = vsel %vm10625_vm4, %v17009_v58, 0.0  ;;  %v10750_v11 = vmul.f32 1.442695, %v10730_v33  ;;  %v10748_v29 = vmul.f32 1.442695, %v10729_v28 }
0x1114   :  { %v10767_v5 = vrot.slane %v10766_v23, 4  ;;  %v10681_v30 = vmax.f32 %v10679_v48, %v10680_v54 }
0x1115   :  { %v10775_v9 = vadd.f32 %v10774_v63, %v10773_v1  ;;  %14672 = vpow2.f32 %v10750_v11 }
0x1116   :  { %v17015_v51 = vpop.eup %14666  ;;  %v10768_v4 = vadd.f32 %v10767_v5, %v10766_v23  ;;  %14674 = vpow2.f32 %v10748_v29  ;;  %v10731_v31 = vsub.f32 %v10618_v49, %v10681_v30 }
0x1117   :  { %v10776_v43 = vrot.slane %v10775_v9, 2  ;;  %v10787_v56 = vsel %vm10625_vm4, %v17015_v51, 0.0 }
0x1118   :  { %v10769_v50 = vrot.slane %v10768_v4, 2  ;;  %v10788_v41 = vrot.slane %v10787_v56, 4  ;;  %v10752_v14 = vmul.f32 1.442695, %v10731_v31 }
0x1119   :  { %v10777_v53 = vadd.f32 %v10776_v43, %v10775_v9 }
0x111a   :  { %v17019_v38 = vpop.eup %14668  ;;  %v10770_v2 = vadd.f32 %v10769_v50, %v10768_v4  ;;  %v10789_v60 = vadd.f32 %v10788_v41, %v10787_v56  ;;  %14676 = vpow2.f32 %v10752_v14 }
0x111b   :  { %v17021_v59 = vpop.eup %14670  ;;  %v10778_v0 = vrot.slane %v10777_v53, 1  ;;  %v10794_v24 = vsel %vm10625_vm4, %v17019_v38, 0.0 }
0x111c   :  { %v10771_v49 = vrot.slane %v10770_v2, 1  ;;  %v10790_v6 = vrot.slane %v10789_v60, 2  ;;  %v10795_v46 = vrot.slane %v10794_v24, 4  ;;  %v10780_v34 = vsel %vm10625_vm4, %v17021_v59, 0.0 }
0x111d   :  { %v10781_v18 = vrot.slane %v10780_v34, 4  ;;  %v10779_v16 = vadd.f32 %v10778_v0, %v10777_v53 }
0x111e   :  { %v10791_v17 = vadd.f32 %v10790_v6, %v10789_v60  ;;  %v10796_v55 = vadd.f32 %v10795_v46, %v10794_v24  ;;  %v10772_v40 = vadd.f32 %v10771_v49, %v10770_v2 }
0x111f   :  { %v17027_v62 = vpop.eup %14672  ;;  %v10782_v22 = vadd.f32 %v10781_v18, %v10780_v34  ;;  %14678 = vrcp.f32 %v10779_v16 }
0x1120   :  { %v17029_v15 = vpop.eup %14674  ;;  %v10792_v21 = vrot.slane %v10791_v17, 1  ;;  %v10797_v61 = vrot.slane %v10796_v55, 2  ;;  %v10808_v26 = vsel %vm10625_vm4, %v17027_v62, 0.0  ;;  %14680 = vrcp.f32 %v10772_v40 }
0x1121   :  { %v10783_v52 = vrot.slane %v10782_v22, 2  ;;  %v10809_v10 = vrot.slane %v10808_v26, 4  ;;  %v10801_v13 = vsel %vm10625_vm4, %v17029_v15, 0.0  ;;  %v14187_v19 = vpop.f32.mrb[136].mxu1 }
0x1122   :  { %v10798_v48 = vadd.f32 %v10797_v61, %v10796_v55  ;;  %v10802_v33 = vrot.slane %v10801_v13, 4  ;;  %v10323_v28 = vpop.f32.mrb[137].mxu1  ;;  %v10793_v54 = vadd.f32 %v10792_v21, %v10791_v17  ;;  %v17041_v30 = vadd.f32 %v14187_v19, %v16889_v57 }
0x1123   :  { %v10784_v1 = vadd.f32 %v10783_v52, %v10782_v22  ;;  %v10810_v63 = vadd.f32 %v10809_v10, %v10808_v26  ;;  %v17036_v23 = vadd.f32 %v10323_v28, %v16889_v57 }
0x1124   :  { %v17038_v11 = vpop.eup %14676  ;;  %v10799_v29 = vrot.slane %v10798_v48, 1  ;;  %v10803_v5 = vadd.f32 %v10802_v33, %v10801_v13  ;;  %14682 = vrcp.f32 %v10793_v54 }
0x1125   :  { %v10785_v9 = vrot.slane %v10784_v1, 1  ;;  %v10811_v4 = vrot.slane %v10810_v63, 2  ;;  %v10815_v31 = vsel %vm10625_vm4, %v17038_v11, 0.0  ;;  %v14190_v43 = vpop.f32.mrb[138].mxu1  ;;  %14214 = vmatprep.mubr.msk.f32.mxu0 %vm345_vm15, %v17036_v23 }
0x1126   :  { %v10804_v56 = vrot.slane %v10803_v5, 2  ;;  %v10816_v50 = vrot.slane %v10815_v31, 4  ;;  %v10333_v41 = vpop.f32.mrb[139].mxu1  ;;  %14215 = vmatmul.mubr.msk.f32.gmra.mrb[146].mxu0 %vm345_vm15, %v17041_v30  ;;  %v10800_v14 = vadd.f32 %v10799_v29, %v10798_v48  ;;  %v17053_v49 = vadd.f32 %v14190_v43, %v16889_v57  ;;  %v52_v43 = vld [vmem:[#allocation2 + $0xd0] sm:$0xff] }
0x1127   :  { %v10812_v53 = vadd.f32 %v10811_v4, %v10810_v63  ;;  %v17050_v2 = vadd.f32 %v10333_v41, %v16889_v57  ;;  %v10786_v60 = vadd.f32 %v10785_v9, %v10784_v1  ;;  %v49_v9 = vld [vmem:[#allocation2 + $0xb8] sm:$0xff]  ;;  %v50_v4 = vld [vmem:[#allocation2 + $0xc0] sm:$0xff] }
0x1128   :  { %v10805_v0 = vadd.f32 %v10804_v56, %v10803_v5  ;;  %v10817_v24 = vadd.f32 %v10816_v50, %v10815_v31  ;;  %14684 = vrcp.f32 %v10800_v14  ;;  %v14381_v31 = vpack.c.bf16 %v50_v4, %v49_v9 }
0x1129   :  { %v14679_v6 = vpop.eup %14678  ;;  %v10813_v46 = vrot.slane %v10812_v53, 1  ;;  %v14193_v34 = vpop.f32.mrb[140].mxu1  ;;  %14217 = vmatprep.mubr.msk.f32.mxu0 %vm345_vm15, %v17050_v2  ;;  %14686 = vrcp.f32 %v10786_v60 }
0x112a   :  { %v14681_v18 = vpop.eup %14680  ;;  %v10806_v16 = vrot.slane %v10805_v0, 1  ;;  %v10818_v17 = vrot.slane %v10817_v24, 2  ;;  %v10343_v55 = vpop.f32.mrb[141].mxu1  ;;  %14218 = vmatmul.mubr.msk.f32.gmra.mrb[148].mxu0 %vm345_vm15, %v17053_v49  ;;  %v10879_v40 = vmul.f32 %v14679_v6, %v17007_v36  ;;  %v17065_v52 = vadd.f32 %v14193_v34, %v16889_v57 }
0x112b   :  { %v17061_v22 = vadd.f32 %v10343_v55, %v16889_v57  ;;  %v10878_v21 = vmul.f32 %v14681_v18, %v17009_v58  ;;  %v10814_v61 = vadd.f32 %v10813_v46, %v10812_v53 }
0x112c   :  { %v10819_v26 = vadd.f32 %v10818_v17, %v10817_v24  ;;  %10899 = vperm.xlu0 %14420, %v10879_v40   ;;  %v10807_v10 = vadd.f32 %v10806_v16, %v10805_v0 }
0x112d   :  { %14220 = vmatprep.mubr.msk.f32.mxu0 %vm345_vm15, %v17061_v22  ;;  %10894 = vperm.xlu1 %14421, %v10878_v21   ;;  %14688 = vrcp.f32 %v10814_v61 }
0x112e   :  { %v14683_v13 = vpop.eup %14682  ;;  %v10820_v19 = vrot.slane %v10819_v26, 1  ;;  %14221 = vmatmul.mubr.msk.f32.gmra.mrb[150].mxu0 %vm345_vm15, %v17065_v52  ;;  %14690 = vrcp.f32 %v10807_v10 }
0x112f   :  { %v10881_v36 = vmul.f32 %v14683_v13, %v17015_v51  ;;  %14266 = vmatprep.mubr.msk.f32.mxu0 %vm14835_vm0, %v17438_v12 }
0x1130   :  { %v10821_v57 = vadd.f32 %v10820_v19, %v10819_v26 }
0x1131   :  { %10909 = vperm.xlu1 %14421, %v10881_v36  }
0x1132   :  { %v14685_v58 = vpop.eup %14684  ;;  %14692 = vrcp.f32 %v10821_v57 }
0x1133   :  { %v14687_v48 = vpop.eup %14686  ;;  %v10882_v33 = vmul.f32 %v14685_v58, %v17019_v38  ;;  %v14849_v38 = vmov 0.0|0.0  }
0x1134   :  { %v10880_v28 = vmul.f32 %v14687_v48, %v17021_v59  ;;  %14380 = vmatprep.subr.bf16.mxu1 %v14849_v38  ;;  %v51_v59 = vld [vmem:[#allocation2 + $0xc8] sm:$0xff] }
0x1135   :  { %10914 = vperm.xlu0 %14420, %v10882_v33   ;;  %14382 = vmatpush3.bf16.msra.mxu1 %v14381_v31 }
0x1136   :  { %10904 = vperm.xlu1 %14421, %v10880_v28   ;;  %14383 = vmatprep.subr.bf16.mxu1 %v14849_v38 }
0x1137   :  { %v14689_v54 = vpop.eup %14688 }
0x1138   :  { %v14691_v1 = vpop.eup %14690  ;;  %v10884_v63 = vmul.f32 %v14689_v54, %v17027_v62  ;;  %v14384_v62 = vpack.c.bf16 %v52_v43, %v51_v59 }
0x1139   :  { %v10883_v51 = vmul.f32 %v14691_v1, %v17029_v15 }
0x113a   :  { %10924 = vperm.xlu0 %14420, %v10884_v63   ;;  %14385 = vmatpush3.bf16.msra.mxu1 %v14384_v62 }
0x113b   :  { %10919 = vperm.xlu1 %14421, %v10883_v51   ;;  %14234 = vmatprep.subr.mxu1 %v17438_v12 }
0x113c   :  { %v14693_v29 = vpop.eup %14692 }
0x113d   :  { %v10885_v5 = vmul.f32 %v14693_v29, %v17038_v11 }
0x113f   :  { %10929 = vperm.xlu1 %14421, %v10885_v5  }
0x11ab   :  { %v10900_v15 = vpop.permute.xlu0 %10899 }
0x11ac   :  { %v10963_v56 = vmul.f32 %v10900_v15, %v16907_v32  ;;  %v10895_v11 = vpop.permute.xlu1 %10894 }
0x11ad   :  { %v10962_v50 = vmul.f32 %v10895_v11, %v16900_v47 }
0x11ae   :  { %v10983_v41 = vsel %vm345_vm15, %v10963_v56, 0.0 }
0x11af   :  { %v10984_v14 = vrot.slane %v10983_v41, 4  ;;  %v10976_v53 = vsel %vm345_vm15, %v10962_v50, 0.0 }
0x11b0   :  { %v10977_v60 = vrot.slane %v10976_v53, 4  ;;  %v10910_v0 = vpop.permute.xlu1 %10909 }
0x11b1   :  { %v10985_v24 = vadd.f32 %v10984_v14, %v10983_v41  ;;  %v10965_v6 = vmul.f32 %v10910_v0, %v16917_v45 }
0x11b2   :  { %v10978_v46 = vadd.f32 %v10977_v60, %v10976_v53 }
0x11b3   :  { %v10986_v34 = vrot.slane %v10985_v24, 2  ;;  %v10997_v18 = vsel %vm345_vm15, %v10965_v6, 0.0 }
0x11b4   :  { %v10979_v16 = vrot.slane %v10978_v46, 2  ;;  %v10998_v17 = vrot.slane %v10997_v18, 4  ;;  %v10915_v32 = vpop.permute.xlu0 %10914 }
0x11b5   :  { %v10905_v55 = vpop.permute.xlu1 %10904  ;;  %v10966_v47 = vmul.f32 %v10915_v32, %v16920_v3  ;;  %v10987_v61 = vadd.f32 %v10986_v34, %v10985_v24 }
0x11b6   :  { %v10999_v40 = vadd.f32 %v10998_v17, %v10997_v18  ;;  %v10964_v21 = vmul.f32 %v10905_v55, %v16910_v37  ;;  %v10980_v10 = vadd.f32 %v10979_v16, %v10978_v46 }
0x11b7   :  { %v11004_v26 = vsel %vm345_vm15, %v10966_v47, 0.0  ;;  %v10988_v28 = vrot.slane %v10987_v61, 1 }
0x11b8   :  { %v11000_v13 = vrot.slane %v10999_v40, 2  ;;  %v10990_v45 = vsel %vm345_vm15, %v10964_v21, 0.0  ;;  %v11005_v19 = vrot.slane %v11004_v26, 4  ;;  %v10981_v1 = vrot.slane %v10980_v10, 1 }
0x11b9   :  { %v10991_v36 = vrot.slane %v10990_v45, 4  ;;  %v10925_v57 = vpop.permute.xlu0 %10924  ;;  %v10989_v15 = vadd.f32 %v10988_v28, %v10987_v61 }
0x11ba   :  { %v11006_v58 = vadd.f32 %v11005_v19, %v11004_v26  ;;  %v10920_v48 = vpop.permute.xlu1 %10919  ;;  %v10968_v33 = vmul.f32 %v10925_v57, %v16930_v35  ;;  %v11001_v37 = vadd.f32 %v11000_v13, %v10999_v40  ;;  %v10982_v56 = vadd.f32 %v10981_v1, %v10980_v10 }
0x11bb   :  { %v10992_v54 = vadd.f32 %v10991_v36, %v10990_v45  ;;  %v10967_v3 = vmul.f32 %v10920_v48, %v16927_v7  ;;  %v11076_v1 = vsub.s32 6, %v17496_v42 }
0x11bc   :  { %v11007_v63 = vrot.slane %v11006_v58, 2  ;;  %v11018_v51 = vsel %vm345_vm15, %v10968_v33, 0.0  ;;  %v11002_v7 = vrot.slane %v11001_v37, 1  ;;  %v11087_v46 = vsel %vm11086_vm5, %v10989_v15, %v10982_v56 }
0x11bd   :  { %v10993_v29 = vrot.slane %v10992_v54, 2  ;;  %v11011_v5 = vsel %vm345_vm15, %v10967_v3, 0.0  ;;  %v11019_v9 = vrot.slane %v11018_v51, 4 }
0x11be   :  { %v11008_v4 = vadd.f32 %v11007_v63, %v11006_v58  ;;  %v11012_v31 = vrot.slane %v11011_v5, 4  ;;  %v10930_v59 = vpop.permute.xlu1 %10929  ;;  %v11003_v34 = vadd.f32 %v11002_v7, %v11001_v37  ;;  %v17116_v37 = vld [vmem:[#allocation2 + $0x118] sm:$0xff] }
0x11bf   :  { %v10994_v43 = vadd.f32 %v10993_v29, %v10992_v54  ;;  %v11020_v62 = vadd.f32 %v11019_v9, %v11018_v51  ;;  %v10969_v35 = vmul.f32 %v10930_v59, %v16937_v8  ;;  %v11077_v63 = vrot.slane %v17116_v37, %v11076_v1 }
0x11c0   :  { %v11013_v11 = vadd.f32 %v11012_v31, %v11011_v5  ;;  %v11009_v41 = vrot.slane %v11008_v4, 1 }
0x11c1   :  { %v10995_v50 = vrot.slane %v10994_v43, 1  ;;  %v11021_v14 = vrot.slane %v11020_v62, 2  ;;  %v11025_v53 = vsel %vm345_vm15, %v10969_v35, 0.0 }
0x11c2   :  { %v11014_v60 = vrot.slane %v11013_v11, 2  ;;  %v11026_v0 = vrot.slane %v11025_v53, 4  ;;  %v11010_v17 = vadd.f32 %v11009_v41, %v11008_v4 }
0x11c3   :  { %v10996_v24 = vadd.f32 %v10995_v50, %v10994_v43  ;;  %v11022_v6 = vadd.f32 %v11021_v14, %v11020_v62 }
0x11c4   :  { %v11015_v8 = vadd.f32 %v11014_v60, %v11013_v11  ;;  %v11027_v18 = vadd.f32 %v11026_v0, %v11025_v53 }
0x11c5   :  { %v11089_v16 = vsel %vm11088_vm6, %v10996_v24, %v11087_v46  ;;  %v11023_v32 = vrot.slane %v11022_v6, 1 }
0x11c6   :  { %v11091_v55 = vsel %vm11090_vm7, %v11003_v34, %v11089_v16  ;;  %v11016_v47 = vrot.slane %v11015_v8, 1  ;;  %v11028_v40 = vrot.slane %v11027_v18, 2 }
0x11c7   :  { %v11093_v21 = vsel %vm11092_vm8, %v11010_v17, %v11091_v55  ;;  %v11024_v10 = vadd.f32 %v11023_v32, %v11022_v6 }
0x11c8   :  { %v11017_v61 = vadd.f32 %v11016_v47, %v11015_v8  ;;  %v11029_v26 = vadd.f32 %v11028_v40, %v11027_v18 }
0x11ca   :  { %v11095_v13 = vsel %vm11094_vm9, %v11017_v61, %v11093_v21  ;;  %v11030_v45 = vrot.slane %v11029_v26, 1 }
0x11cb   :  { %v11097_v36 = vsel %vm11096_vm10, %v11024_v10, %v11095_v13 }
0x11cc   :  { %v11031_v19 = vadd.f32 %v11030_v45, %v11029_v26 }
0x11ce   :  { %v11099_v57 = vsel %vm11098_vm11, %v11031_v19, %v11097_v36 }
0x11cf   :  { %14232 = vmatmul.mubr.msk.f32.vlgmr.msra.gmra.mrb[142].mxu1 %vm345_vm15, %v11099_v57 }
0x11d0   :  { %14236 = vmatprep.mubr.msk.f32.mxu1 %vm14835_vm0, %v17438_v12 }
0x11f9   :  { %v17103_v58 = vpop.f32.mrb[146].mxu0 }
0x11fa   :  { %v17105_v48 = vpop.f32.mrb[147].mxu0 }
0x11fd   :  { %v17107_v33 = vpop.f32.mrb[148].mxu0 }
0x11fe   :  { %v17109_v28 = vpop.f32.mrb[149].mxu0 }
0x1201   :  { %v17111_v54 = vpop.f32.mrb[150].mxu0 }
0x1202   :  { %v17113_v3 = vpop.f32.mrb[151].mxu0 }
0x12a2   :  { %v11168_v51 = vpop.f32.mrb[142].mxu1 }
0x12a3   :  { %v17119_v29 = vadd.f32 %v11168_v51, %v11077_v63  ;;  %v14233_v5 = vpop.f32.mrb[143].mxu1 }
0x12a5   :  { %11177 = vrot.lane.b32.xlu0 %v17119_v29, %s14836_s0  ;;  %v17125_v9 = vcombine.high %v17119_v29, %v17119_v29  ;;  %v17131_v31 = vmul.f32 0.35355338, %v17119_v29 }
0x12a7   :  { %11254 = vrot.lane.b32.xlu1 %v17125_v9, %s14836_s0  ;;  %v17140_v43 = vmul.f32 0.35355338, %v17125_v9 }
0x1317   :  { %v11178_v4 = vpop.permute.xlu0 %11177 }
0x1318   :  { %14235 = vmatpush3.xpose.msk.msra.mxu1 %vm540_vm1, %v11178_v4 }
0x1319   :  { %14239 = vmatprep.subr.mxu1 %v17438_v12  ;;  %v11255_v59 = vpop.permute.xlu1 %11254 }
0x131b   :  { %14237 = vmatmul.mubr.msk.f32.vlgmr.msra.gmra.mrb[144].mxu1 %vm540_vm1, %v17131_v31 }
0x131c   :  { %14240 = vmatpush3.xpose.msk.msra.mxu1 %vm540_vm1, %v11255_v59  ;;  %14241 = vmatprep.mubr.msk.f32.mxu1 %vm14835_vm0, %v17438_v12 }
0x131d   :  { %14244 = vmatprep.subr.mxu1 %v17438_v12 }
0x131f   :  { %14242 = vmatmul.mubr.msk.f32.vlgmr.msra.gmra.mrb[146].mxu1 %vm540_vm1, %v17140_v43 }
0x1320   :  { %14246 = vmatprep.mubr.msk.f32.mxu1 %vm14835_vm0, %v17438_v12 }
0x13ee   :  { %v11250_v62 = vpop.f32.mrb[144].mxu1 }
0x13ef   :  { %v14238_v35 = vpop.f32.mrb[145].mxu1  ;;  %v11332_v15 = vsel %vm11331_vm12, %v11250_v62, -inf }
0x13f0   :  { %11333 = vmax.xlane.f32.xlu0 %v11332_v15 }
0x13f2   :  { %v11327_v56 = vpop.f32.mrb[146].mxu1 }
0x13f3   :  { %v14243_v7 = vpop.f32.mrb[147].mxu1  ;;  %v11335_v11 = vsel %vm11331_vm12, %v11327_v56, -inf }
0x13f4   :  { %11336 = vmax.xlane.f32.xlu1 %v11335_v11 }
0x1405   :  { %11354 = vrot.lane.b32.xlu1 %v17119_v29, %s14837_s23 }
0x1409   :  { %11512 = vrot.lane.b32.xlu1 %v17119_v29, %s14838_s24 }
0x140d   :  { %11510 = vrot.lane.b32.xlu1 %v17131_v31, %s14839_s25 }
0x1411   :  { %11588 = vrot.lane.b32.xlu1 %v17140_v43, %s14839_s25 }
0x147d   :  { %v11334_v50 = vpop.xlane.xlu0 %11333 }
0x147e   :  { %v11338_v41 = vsub.f32 %v11250_v62, %v11334_v50 }
0x1480   :  { %v11340_v14 = vmul.f32 1.442695, %v11338_v41 }
0x1481   :  { %v11337_v53 = vpop.xlane.xlu1 %11336 }
0x1482   :  { %14694 = vpow2.f32 %v11340_v14  ;;  %v11339_v60 = vsub.f32 %v11327_v56, %v11337_v53 }
0x1484   :  { %v11342_v0 = vmul.f32 1.442695, %v11339_v60 }
0x1485   :  { %v11355_v24 = vpop.permute.xlu1 %11354 }
0x1486   :  { %14696 = vpow2.f32 %v11342_v0  ;;  %14245 = vmatpush3.msk.msra.mxu1 %vm11360_vm13, %v11355_v24 }
0x1487   :  { %14249 = vmatprep.subr.mxu1 %v17438_v12 }
0x1489   :  { %v11513_v40 = vpop.permute.xlu1 %11512 }
0x148c   :  { %v14695_v6 = vpop.eup %14694 }
0x148d   :  { %v11344_v46 = vsel %vm11331_vm12, %v14695_v6, 0.0  ;;  %v11511_v61 = vpop.permute.xlu1 %11510 }
0x148e   :  { %11345 = vadd.xlane.f32.xlu0 %v11344_v46 }
0x1490   :  { %v14697_v34 = vpop.eup %14696 }
0x1491   :  { %v11347_v8 = vsel %vm11331_vm12, %v14697_v34, 0.0  ;;  %v11589_v10 = vpop.permute.xlu1 %11588 }
0x1492   :  { %11348 = vadd.xlane.f32.xlu0 %v11347_v8 }
0x14a8   :  { %11433 = vrot.lane.b32.xlu0 %v17125_v9, %s14837_s23 }
0x14ac   :  { %11590 = vrot.lane.b32.xlu0 %v17125_v9, %s14838_s24 }
0x151b   :  { %v11346_v18 = vpop.xlane.xlu0 %11345 }
0x151c   :  { %14698 = vrcp.f32 %v11346_v18 }
0x151f   :  { %v11349_v16 = vpop.xlane.xlu0 %11348 }
0x1520   :  { %14700 = vrcp.f32 %v11349_v16 }
0x1523   :  { %v11434_v55 = vpop.permute.xlu0 %11433 }
0x1526   :  { %v14699_v17 = vpop.eup %14698 }
0x1527   :  { %v11352_v32 = vmul.f32 %v14699_v17, %v14695_v6  ;;  %v11591_v26 = vpop.permute.xlu0 %11590 }
0x1529   :  { %14247 = vmatmul.mubr.msk.f32.vlgmr.msra.gmra.mrb[148].mxu1 %vm11356_vm14, %v11352_v32 }
0x152a   :  { %v14701_v47 = vpop.eup %14700  ;;  %14250 = vmatpush3.msk.msra.mxu1 %vm11360_vm13, %v11434_v55  ;;  %14251 = vmatprep.mubr.msk.f32.mxu1 %vm14835_vm0, %v17438_v12 }
0x152b   :  { %v11353_v21 = vmul.f32 %v14701_v47, %v14697_v34  ;;  %14254 = vmatprep.subr.mxu1 %v17438_v12 }
0x152d   :  { %14252 = vmatmul.mubr.msk.f32.vlgmr.msra.gmra.mrb[150].mxu1 %vm11356_vm14, %v11353_v21 }
0x152e   :  { %14256 = vmatprep.mubr.msk.f32.mxu1 %vm14835_vm0, %v17438_v12 }
0x1531   :  { %14255 = vmatpush3.xpose.msk.msra.mxu1 %vm540_vm1, %v11513_v40 }
0x1532   :  { %14259 = vmatprep.subr.mxu1 %v17438_v12 }
0x1534   :  { %14257 = vmatmul.mubr.msk.f32.vlgmr.msra.gmra.mrb[152].mxu1 %vm540_vm1, %v11511_v61 }
0x1535   :  { %14260 = vmatpush3.xpose.msk.msra.mxu1 %vm540_vm1, %v11591_v26  ;;  %14261 = vmatprep.mubr.msk.f32.mxu1 %vm14835_vm0, %v17438_v12 }
0x1536   :  { %14269 = vmatprep.subr.mxu1 %v17438_v12 }
0x1538   :  { %14262 = vmatmul.mubr.msk.f32.vlgmr.msra.gmra.mrb[154].mxu1 %vm540_vm1, %v11589_v10 }
0x1539   :  { %14271 = vmatprep.mubr.msk.f32.mxu1 %vm14835_vm0, %v17438_v12 }
0x15fc   :  { %v17183_v13 = vpop.f32.mrb[148].mxu1 }
0x15fd   :  { %v14248_v45 = vpop.f32.mrb[149].mxu1 }
0x1600   :  { %v17185_v19 = vpop.f32.mrb[150].mxu1 }
0x1601   :  { %v14253_v36 = vpop.f32.mrb[151].mxu1 }
0x1607   :  { %v11584_v57 = vpop.f32.mrb[152].mxu1 }
0x1608   :  { %v14258_v1 = vpop.f32.mrb[153].mxu1  ;;  %v11666_v63 = vsel %vm11331_vm12, %v11584_v57, -inf }
0x1609   :  { %11667 = vmax.xlane.f32.xlu0 %v11666_v63 }
0x160b   :  { %v11662_v51 = vpop.f32.mrb[154].mxu1 }
0x160c   :  { %v14263_v5 = vpop.f32.mrb[155].mxu1  ;;  %v11669_v4 = vsel %vm11331_vm12, %v11662_v51, -inf }
0x160d   :  { %11670 = vmax.xlane.f32.xlu1 %v11669_v4 }
0x161e   :  { %11688 = vrot.lane.b32.xlu1 %v17119_v29, %s14840_s26 }
0x161f   :  { %11765 = vrot.lane.b32.xlu0 %v17125_v9, %s14840_s26 }
0x1622   :  { %11844 = vrot.lane.b32.xlu1 %v17119_v29, %s14841_s27 }
0x1626   :  { %11922 = vrot.lane.b32.xlu1 %v17125_v9, %s14841_s27 }
0x162a   :  { %11920 = vrot.lane.b32.xlu1 %v17140_v43, %s14842_s28 }
0x1696   :  { %v11668_v59 = vpop.xlane.xlu0 %11667 }
0x1697   :  { %v11672_v62 = vsub.f32 %v11584_v57, %v11668_v59 }
0x1699   :  { %v11674_v35 = vmul.f32 1.442695, %v11672_v62 }
0x169a   :  { %v11766_v15 = vpop.permute.xlu0 %11765  ;;  %v11671_v56 = vpop.xlane.xlu1 %11670 }
0x169b   :  { %14702 = vpow2.f32 %v11674_v35  ;;  %v11673_v7 = vsub.f32 %v11662_v51, %v11671_v56  ;;  %14270 = vmatpush3.msk.msra.mxu1 %vm11360_vm13, %v11766_v15 }
0x169c   :  { %14279 = vmatprep.subr.mxu1 %v17438_v12 }
0x169d   :  { %v11676_v11 = vmul.f32 1.442695, %v11673_v7 }
0x169e   :  { %v11689_v50 = vpop.permute.xlu1 %11688 }
0x169f   :  { %14704 = vpow2.f32 %v11676_v11  ;;  %14265 = vmatpush3.msk.msra.mxu0 %vm11360_vm13, %v11689_v50 }
0x16a0   :  { %14274 = vmatprep.subr.mxu0 %v17438_v12 }
0x16a2   :  { %v11845_v6 = vpop.permute.xlu1 %11844 }
0x16a5   :  { %v14703_v41 = vpop.eup %14702 }
0x16a6   :  { %v11678_v14 = vsel %vm11331_vm12, %v14703_v41, 0.0  ;;  %v11923_v18 = vpop.permute.xlu1 %11922 }
0x16a7   :  { %11679 = vadd.xlane.f32.xlu0 %v11678_v14 }
0x16a9   :  { %v14705_v53 = vpop.eup %14704 }
0x16aa   :  { %v11681_v60 = vsel %vm11331_vm12, %v14705_v53, 0.0  ;;  %v11921_v32 = vpop.permute.xlu1 %11920 }
0x16ab   :  { %11682 = vadd.xlane.f32.xlu0 %v11681_v60 }
0x16c1   :  { %11842 = vrot.lane.b32.xlu0 %v17131_v31, %s14842_s28 }
0x1734   :  { %v11680_v0 = vpop.xlane.xlu0 %11679 }
0x1735   :  { %14706 = vrcp.f32 %v11680_v0 }
0x1738   :  { %v11683_v24 = vpop.xlane.xlu0 %11682 }
0x1739   :  { %14708 = vrcp.f32 %v11683_v24 }
0x173c   :  { %v11843_v17 = vpop.permute.xlu0 %11842 }
0x173f   :  { %v14707_v46 = vpop.eup %14706 }
0x1740   :  { %v11686_v34 = vmul.f32 %v14707_v46, %v14703_v41 }
0x1742   :  { %14267 = vmatmul.mubr.msk.f32.vlgmr.msra.gmra.mrb[152].mxu0 %vm11356_vm14, %v11686_v34 }
0x1743   :  { %v14709_v8 = vpop.eup %14708  ;;  %14275 = vmatpush3.xpose.msk.msra.mxu0 %vm540_vm1, %v11845_v6  ;;  %14276 = vmatprep.mubr.msk.f32.mxu0 %vm14835_vm0, %v17438_v12 }
0x1744   :  { %v11687_v16 = vmul.f32 %v14709_v8, %v14705_v53  ;;  %14284 = vmatprep.subr.mxu0 %v17438_v12 }
0x1746   :  { %14272 = vmatmul.mubr.msk.f32.vlgmr.msra.gmra.mrb[156].mxu1 %vm11356_vm14, %v11687_v16  ;;  %14277 = vmatmul.mubr.msk.f32.vlgmr.msra.gmra.mrb[154].mxu0 %vm540_vm1, %v11843_v17 }
0x1747   :  { %14280 = vmatpush3.xpose.msk.msra.mxu1 %vm540_vm1, %v11923_v18  ;;  %14281 = vmatprep.mubr.msk.f32.mxu1 %vm14835_vm0, %v17438_v12 }
0x1748   :  { %14289 = vmatprep.subr.mxu1 %v17438_v12  ;;  %14286 = vmatprep.mubr.msk.f32.mxu0 %vm14835_vm0, %v17438_v12 }
0x174a   :  { %14282 = vmatmul.mubr.msk.f32.vlgmr.msra.gmra.mrb[158].mxu1 %vm540_vm1, %v11921_v32 }
0x174b   :  { %14291 = vmatprep.mubr.msk.f32.mxu1 %vm14835_vm0, %v17438_v12 }
0x1815   :  { %v17223_v55 = vpop.f32.mrb[152].mxu0 }
0x1816   :  { %v14268_v47 = vpop.f32.mrb[153].mxu0 }
0x1819   :  { %v17225_v40 = vpop.f32.mrb[156].mxu1  ;;  %v11916_v21 = vpop.f32.mrb[154].mxu0 }
0x181a   :  { %v14273_v61 = vpop.f32.mrb[157].mxu1  ;;  %v14278_v26 = vpop.f32.mrb[155].mxu0  ;;  %v11998_v10 = vsel %vm11331_vm12, %v11916_v21, -inf }
0x181b   :  { %11999 = vmax.xlane.f32.xlu0 %v11998_v10 }
0x181d   :  { %v11994_v45 = vpop.f32.mrb[158].mxu1 }
0x181e   :  { %v14283_v36 = vpop.f32.mrb[159].mxu1  ;;  %v12001_v57 = vsel %vm11331_vm12, %v11994_v45, -inf }
0x181f   :  { %12002 = vmax.xlane.f32.xlu1 %v12001_v57 }
0x1830   :  { %12020 = vrot.lane.b32.xlu1 %v17119_v29, %s14843_s1 }
0x1831   :  { %12097 = vrot.lane.b32.xlu0 %v17125_v9, %s14843_s1 }
0x1834   :  { %12176 = vrot.lane.b32.xlu1 %v17119_v29, %s14844_s29 }
0x1838   :  { %12254 = vrot.lane.b32.xlu1 %v17125_v9, %s14844_s29 }
0x183c   :  { %12252 = vrot.lane.b32.xlu1 %v17140_v43, %s14845_s30 }
0x18a8   :  { %v12000_v1 = vpop.xlane.xlu0 %11999 }
0x18a9   :  { %v12004_v63 = vsub.f32 %v11916_v21, %v12000_v1 }
0x18ab   :  { %v12006_v51 = vmul.f32 1.442695, %v12004_v63 }
0x18ac   :  { %v12098_v5 = vpop.permute.xlu0 %12097  ;;  %v12003_v4 = vpop.xlane.xlu1 %12002 }
0x18ad   :  { %14710 = vpow2.f32 %v12006_v51  ;;  %v12005_v59 = vsub.f32 %v11994_v45, %v12003_v4  ;;  %14290 = vmatpush3.msk.msra.mxu1 %vm11360_vm13, %v12098_v5 }
0x18ae   :  { %14299 = vmatprep.subr.mxu1 %v17438_v12 }
0x18af   :  { %v12008_v62 = vmul.f32 1.442695, %v12005_v59 }
0x18b0   :  { %v12021_v35 = vpop.permute.xlu1 %12020 }
0x18b1   :  { %14712 = vpow2.f32 %v12008_v62  ;;  %14285 = vmatpush3.msk.msra.mxu0 %vm11360_vm13, %v12021_v35 }
0x18b2   :  { %14294 = vmatprep.subr.mxu0 %v17438_v12 }
0x18b4   :  { %v12177_v41 = vpop.permute.xlu1 %12176 }
0x18b7   :  { %v14711_v15 = vpop.eup %14710 }
0x18b8   :  { %v12010_v43 = vsel %vm11331_vm12, %v14711_v15, 0.0  ;;  %v12255_v0 = vpop.permute.xlu1 %12254 }
0x18b9   :  { %12011 = vadd.xlane.f32.xlu0 %v12010_v43  ;;  %v53_v43 = vld [vmem:[#allocation2 + $0xd8] sm:$0xff] }
0x18bb   :  { %v14713_v56 = vpop.eup %14712 }
0x18bc   :  { %v12013_v7 = vsel %vm11331_vm12, %v14713_v56, 0.0  ;;  %v12253_v6 = vpop.permute.xlu1 %12252 }
0x18bd   :  { %12014 = vadd.xlane.f32.xlu0 %v12013_v7 }
0x18d3   :  { %12174 = vrot.lane.b32.xlu0 %v17131_v31, %s14845_s30 }
0x1946   :  { %v12012_v11 = vpop.xlane.xlu0 %12011 }
0x1947   :  { %14714 = vrcp.f32 %v12012_v11  ;;  %v55_v11 = vld [vmem:[#allocation2 + $0xe8] sm:$0xff] }
0x194a   :  { %v12015_v50 = vpop.xlane.xlu0 %12014 }
0x194b   :  { %14716 = vrcp.f32 %v12015_v50  ;;  %v56_v50 = vld [vmem:[#allocation2 + $0xf0] sm:$0xff] }
0x194e   :  { %v12175_v31 = vpop.permute.xlu0 %12174 }
0x1951   :  { %v14715_v14 = vpop.eup %14714 }
0x1952   :  { %v12018_v53 = vmul.f32 %v14715_v14, %v14711_v15 }
0x1954   :  { %14287 = vmatmul.mubr.msk.f32.vlgmr.msra.gmra.mrb[156].mxu0 %vm11356_vm14, %v12018_v53 }
0x1955   :  { %v14717_v60 = vpop.eup %14716  ;;  %14295 = vmatpush3.xpose.msk.msra.mxu0 %vm540_vm1, %v12177_v41  ;;  %14296 = vmatprep.mubr.msk.f32.mxu0 %vm14835_vm0, %v17438_v12  ;;  %v14390_v41 = vpack.c.bf16 %v56_v50, %v55_v11  ;;  %v59_v50 = vld [vmem:[#allocation2 + $0x108] sm:$0xff] }
0x1956   :  { %v12019_v24 = vmul.f32 %v14717_v60, %v14713_v56  ;;  %14304 = vmatprep.subr.mxu0 %v17438_v12  ;;  %v54_v56 = vld [vmem:[#allocation2 + $0xe0] sm:$0xff] }
0x1957   :  { %v14387_v7 = vpack.c.bf16 %v54_v56, %v53_v43 }
0x1958   :  { %14292 = vmatmul.mubr.msk.f32.vlgmr.msra.gmra.mrb[160].mxu1 %vm11356_vm14, %v12019_v24  ;;  %14297 = vmatmul.mubr.msk.f32.vlgmr.msra.gmra.mrb[158].mxu0 %vm540_vm1, %v12175_v31  ;;  %v10510_v24 = vadd.f32 %v17103_v58, %v16951_v44  ;;  %v10530_v31 = vadd.f32 %v17111_v54, %v16951_v44 }
0x1959   :  { %14300 = vmatpush3.xpose.msk.msra.mxu1 %vm540_vm1, %v12255_v0  ;;  %14301 = vmatprep.mubr.msk.f32.mxu1 %vm14835_vm0, %v17438_v12 }
0x195a   :  { %14309 = vmatprep.subr.mxu1 %v17438_v12  ;;  %14306 = vmatprep.mubr.msk.f32.mxu0 %vm14835_vm0, %v17438_v12 }
0x195c   :  { %14302 = vmatmul.mubr.msk.f32.vlgmr.msra.gmra.mrb[162].mxu1 %vm540_vm1, %v12253_v6 }
0x195d   :  { %14311 = vmatprep.mubr.msk.f32.mxu1 %vm14835_vm0, %v17438_v12 }
0x1a27   :  { %v12093_v46 = vpop.f32.mrb[156].mxu0 }
0x1a28   :  { %v14288_v34 = vpop.f32.mrb[157].mxu0 }
0x1a2b   :  { %v12170_v8 = vpop.f32.mrb[160].mxu1  ;;  %v12248_v18 = vpop.f32.mrb[158].mxu0 }
0x1a2c   :  { %v14293_v16 = vpop.f32.mrb[161].mxu1  ;;  %v14298_v17 = vpop.f32.mrb[159].mxu0  ;;  %v12330_v32 = vsel %vm11331_vm12, %v12248_v18, -inf }
0x1a2d   :  { %12331 = vmax.xlane.f32.xlu0 %v12330_v32 }
0x1a2f   :  { %v12326_v47 = vpop.f32.mrb[162].mxu1 }
0x1a30   :  { %v14303_v21 = vpop.f32.mrb[163].mxu1  ;;  %v12333_v61 = vsel %vm11331_vm12, %v12326_v47, -inf }
0x1a31   :  { %12334 = vmax.xlane.f32.xlu1 %v12333_v61 }
0x1a42   :  { %12352 = vrot.lane.b32.xlu1 %v17119_v29, %s14846_s3 }
0x1a46   :  { %12508 = vrot.lane.b32.xlu1 %v17223_v55, %s14832_s20 }
0x1a4a   :  { %12510 = vrot.lane.b32.xlu1 %v17225_v40, %s14832_s20  ;;  %s14851_s20 = smov [#allocation5]  }
0x1a4b   :  { %s12852_s6 = sshll.u32 %s14851_s20, 4  ;;  %s12853_s6 = int_to_ptr.vmem [resolvable:$true] %s12852_s6 }
0x1a4c   :  { %s14804_s7 = scalar_lea.vmem %s12853_s6, 32  ;;  %p14809_p9 = scmp.lt.s32.totalorder %s12853_s6, %s12853_s6 }
0x1a4d   :  { %p14805_p8 = scmp.ne.s32.totalorder %s12853_s6, %s14804_s7  ;;  %p14810_p10 = scmp.lt.s32.totalorder %s14804_s7, %s14804_s7 }
0x1a4e   :  { %12518 = vrot.lane.b32.xlu1 %v12170_v8, %s14847_s4 }
0x1a4f   :  { %p14811_p11 = por %p14810_p10, %p14809_p9 }
0x1a51   :  { %p14812_p12 = pnand %p14811_p11, %p14805_p8 }
0x1aba   :  { %v12332_v26 = vpop.xlane.xlu0 %12331 }
0x1abb   :  { %v12336_v10 = vsub.f32 %v12248_v18, %v12332_v26  ;;  %v57_v26 = vld [vmem:[#allocation2 + $0xf8] sm:$0xff] }
0x1abd   :  { %v12338_v45 = vmul.f32 1.442695, %v12336_v10  ;;  %v58_v10 = vld [vmem:[#allocation2 + $0x100] sm:$0xff] }
0x1abe   :  { %v12335_v36 = vpop.xlane.xlu1 %12334 }
0x1abf   :  { %14718 = vpow2.f32 %v12338_v45  ;;  %v12337_v57 = vsub.f32 %v12326_v47, %v12335_v36  ;;  %v14393_v45 = vpack.c.bf16 %v58_v10, %v57_v26 }
0x1ac1   :  { %v12340_v1 = vmul.f32 1.442695, %v12337_v57 }
0x1ac2   :  { %v12353_v63 = vpop.permute.xlu1 %12352 }
0x1ac3   :  { %14720 = vpow2.f32 %v12340_v1  ;;  %14305 = vmatpush3.msk.msra.mxu0 %vm11360_vm13, %v12353_v63 }
0x1ac4   :  { %14386 = vmatprep.subr.bf16.mxu0 %v14849_v38 }
0x1ac6   :  { %v12509_v21 = vpop.permute.xlu1 %12508 }
0x1ac7   :  { %v12530_v63 = vsel %vm540_vm1, %v17183_v13, %v12509_v21 }
0x1ac9   :  { %v14719_v29 = vpop.eup %14718 }
0x1aca   :  { %v12342_v55 = vsel %vm11331_vm12, %v14719_v29, 0.0  ;;  %v12511_v61 = vpop.permute.xlu1 %12510 }
0x1acb   :  { %12343 = vadd.xlane.f32.xlu0 %v12342_v55 }
0x1acd   :  { %v14721_v40 = vpop.eup %14720 }
0x1ace   :  { %v12345_v51 = vsel %vm11331_vm12, %v14721_v40, 0.0  ;;  %v12519_v57 = vpop.permute.xlu1 %12518 }
0x1acf   :  { %12346 = vadd.xlane.f32.xlu0 %v12345_v51 }
0x1ae5   :  { %12429 = vrot.lane.b32.xlu0 %v17125_v9, %s14846_s3 }
0x1ae9   :  { %12516 = vrot.lane.b32.xlu0 %v12093_v46, %s14847_s4  ;;  %v10520_v46 = vadd.f32 %v17107_v33, %v16951_v44 }
0x1b58   :  { %v12344_v5 = vpop.xlane.xlu0 %12343 }
0x1b59   :  { %14722 = vrcp.f32 %v12344_v5 }
0x1b5c   :  { %v12347_v4 = vpop.xlane.xlu0 %12346 }
0x1b5d   :  { %14724 = vrcp.f32 %v12347_v4 }
0x1b60   :  { %v12430_v59 = vpop.permute.xlu0 %12429 }
0x1b61   :  { %14310 = vmatpush3.msk.msra.mxu1 %vm11360_vm13, %v12430_v59 }
0x1b62   :  { %14392 = vmatprep.subr.bf16.mxu1 %v14849_v38 }
0x1b63   :  { %v14723_v62 = vpop.eup %14722 }
0x1b64   :  { %v12350_v35 = vmul.f32 %v14723_v62, %v14719_v29  ;;  %v12517_v36 = vpop.permute.xlu0 %12516  ;;  %v12531_v29 = vsel %vm540_vm1, %v17185_v19, %v12511_v61  ;;  %vm12776_vm1 = vcmask 257024  }
0x1b65   :  { %v12533_v55 = vsel %vm9960_vm3, %v12531_v29, %v12519_v57 }
0x1b66   :  { %14307 = vmatmul.mubr.msk.f32.vlgmr.msra.gmra.mrb[160].mxu0 %vm11356_vm14, %v12350_v35 }
0x1b67   :  { %v14725_v15 = vpop.eup %14724  ;;  %14322 = vmatprep.mubr.msk.f32.mxu0 %vm14835_vm0, %v17438_v12  ;;  %14388 = vmatpush3.bf16.msra.mxu0 %v14387_v7 }
0x1b68   :  { %v12351_v9 = vmul.f32 %v14725_v15, %v14721_v40  ;;  %14389 = vmatprep.subr.bf16.mxu0 %v14849_v38  ;;  %v12532_v40 = vsel %vm9960_vm3, %v12530_v63, %v12517_v36 }
0x1b6a   :  { %14312 = vmatmul.mubr.msk.f32.vlgmr.msra.gmra.mrb[164].mxu1 %vm11356_vm14, %v12351_v9 }
0x1b6b   :  { %14333 = vmatprep.mubr.msk.f32.mxu1 %vm14835_vm0, %v17438_v12  ;;  %14391 = vmatpush3.bf16.msra.mxu0 %v14390_v41  ;;  %v10525_v12 = vadd.f32 %v17113_v3, %v16951_v44  ;;  %v60_v41 = vld [vmem:[#allocation2 + $0x110] sm:$0xff]  ;;  %vm12709_vm0 = vcmask 3072  }
0x1b6c   :  { %14394 = vmatpush3.bf16.msra.mxu1 %v14393_v45 }
0x1b6d   :  { %14726 = vtanh.f32 %v10525_v12  ;;  %14395 = vmatprep.subr.bf16.mxu1 %v14849_v38 }
0x1b6e   :  { %14728 = vtanh.f32 %v10510_v24 }
0x1b6f   :  { %14730 = vtanh.f32 %v10530_v31 }
0x1b70   :  { %14732 = vtanh.f32 %v10520_v46 }
0x1b77   :  { %v14727_v6 = vpop.eup %14726 }
0x1b78   :  { %v10563_v34 = vmul.f32 %v14727_v6, %v16967_v27  ;;  %v14729_v3 = vpop.eup %14728 }
0x1b79   :  { %v10560_v18 = vmul.f32 %v14729_v3, %v16967_v27  ;;  %v14731_v16 = vpop.eup %14730  ;;  %v12538_v3 = vsub.s32 7, %v17496_v42 }
0x1b7a   :  { %v10601_v8 = vsel %vm9960_vm3, %v10563_v34, 0.0  ;;  %v10564_v17 = vmul.f32 %v14731_v16, %v16967_v27  ;;  %v14733_v54 = vpop.eup %14732 }
0x1b7b   :  { %v10592_v58 = vsel %vm9960_vm3, %v10560_v18, 0.0  ;;  %v10562_v33 = vmul.f32 %v14733_v54, %v16967_v27  ;;  %v12539_v18 = vrot.slane %v17116_v37, %v12538_v3 }
0x1b7c   :  { %v10604_v32 = vsel %vm9960_vm3, %v10564_v17, 0.0 }
0x1b7d   :  { %v10598_v47 = vsel %vm9960_vm3, %v10562_v33, 0.0 }
0x1c39   :  { %v12425_v14 = vpop.f32.mrb[160].mxu0 }
0x1c3a   :  { %12524 = vrot.lane.b32.xlu0 %v12425_v14, %s14848_s5  ;;  %v14308_v53 = vpop.f32.mrb[161].mxu0  ;;  %v14396_v14 = vpack.c.bf16 %v60_v41, %v59_v50 }
0x1c3c   :  { %14397 = vmatpush3.bf16.msra.mxu1 %v14396_v14 }
0x1c3d   :  { %v12502_v60 = vpop.f32.mrb[164].mxu1 }
0x1c3e   :  { %12526 = vrot.lane.b32.xlu1 %v12502_v60, %s14848_s5  ;;  %v14313_v0 = vpop.f32.mrb[165].mxu1 }
0x1c59   :  { %10602 = vadd.xlane.f32.xlu0 %v10601_v8 }
0x1c62   :  { %10593 = vadd.xlane.f32.xlu1 %v10592_v58 }
0x1c66   :  { %10605 = vadd.xlane.f32.xlu1 %v10604_v32 }
0x1c6a   :  { %10599 = vadd.xlane.f32.xlu1 %v10598_v47 }
0x1cac   :  { %v12525_v1 = vpop.permute.xlu0 %12524 }
0x1cad   :  { %v12534_v5 = vsel %vm9975_vm2, %v12532_v40, %v12525_v1 }
0x1cb0   :  { %v12527_v51 = vpop.permute.xlu1 %12526 }
0x1cb1   :  { %v12535_v4 = vsel %vm9975_vm2, %v12533_v55, %v12527_v51  ;;  %vm12844_vm2 = vcmask 17408  }
0x1cb2   :  { %v12542_v59 = vcombine.low %v12534_v5, %v12535_v4 }
0x1cb4   :  { %14323 = vmatmul.mubr.msk.f32.vlgmr.msra.gmra.mrb[162].mxu0 %vm345_vm15, %v12542_v59 }
0x1ce6   :  { %v10603_v54 = vpop.xlane.xlu0 %10602 }
0x1ce7   :  { %v10623_v32 = vadd.f32 %v16989_v39, %v10603_v54 }
0x1ce9   :  { %v10710_v47 = vsel %vm10625_vm4, %v10623_v32, -inf }
0x1cea   :  { %v10711_v61 = vrot.slane %v10710_v47, 4 }
0x1cec   :  { %v10712_v10 = vmax.f32 %v10710_v47, %v10711_v61 }
0x1cee   :  { %v10713_v45 = vrot.slane %v10712_v10, 2 }
0x1cef   :  { %v10594_v38 = vpop.xlane.xlu1 %10593 }
0x1cf0   :  { %v10620_v62 = vadd.f32 %v16989_v39, %v10594_v38  ;;  %v10714_v57 = vmax.f32 %v10712_v10, %v10713_v45 }
0x1cf2   :  { %v10689_v13 = vsel %vm10625_vm4, %v10620_v62, -inf  ;;  %v10715_v63 = vrot.slane %v10714_v57, 1 }
0x1cf3   :  { %v10690_v35 = vrot.slane %v10689_v13, 4  ;;  %v10606_v33 = vpop.xlane.xlu1 %10605 }
0x1cf4   :  { %v10624_v21 = vadd.f32 %v16989_v39, %v10606_v33  ;;  %v10716_v55 = vmax.f32 %v10714_v57, %v10715_v63 }
0x1cf5   :  { %v10691_v15 = vmax.f32 %v10689_v13, %v10690_v35  ;;  %v17503_v13 = vsub.s32 0, %v17496_v42 }
0x1cf6   :  { %v10717_v26 = vsel %vm10625_vm4, %v10624_v21, -inf  ;;  %v10736_v51 = vsub.f32 %v10623_v32, %v10716_v55 }
0x1cf7   :  { %v10692_v19 = vrot.slane %v10691_v15, 2  ;;  %v10718_v37 = vrot.slane %v10717_v26, 4  ;;  %v10600_v10 = vpop.xlane.xlu1 %10599 }
0x1cf8   :  { %v10762_v4 = vmul.f32 1.442695, %v10736_v51 }
0x1cf9   :  { %v10693_v9 = vmax.f32 %v10691_v15, %v10692_v19  ;;  %v10719_v36 = vmax.f32 %v10717_v26, %v10718_v37  ;;  %v10515_v15 = vadd.f32 %v17109_v28, %v16951_v44 }
0x1cfb   :  { %v10694_v43 = vrot.slane %v10693_v9, 1  ;;  %v10720_v1 = vrot.slane %v10719_v36, 2 }
0x1cfd   :  { %v10695_v56 = vmax.f32 %v10693_v9, %v10694_v43  ;;  %v10721_v29 = vmax.f32 %v10719_v36, %v10720_v1 }
0x1cff   :  { %v10733_v7 = vsub.f32 %v10620_v62, %v10695_v56  ;;  %v10722_v40 = vrot.slane %v10721_v29, 1  ;;  %v62_v62 = vld [vmem:[#allocation2 + $0x120] sm:$0xff] }
0x1d00   :  { %v12618_v35 = vrot.slane %v62_v62, %v17503_v13 }
0x1d01   :  { %v10756_v11 = vmul.f32 1.442695, %v10733_v7  ;;  %v10723_v5 = vmax.f32 %v10721_v29, %v10722_v40  ;;  %v10505_v7 = vadd.f32 %v17105_v48, %v16951_v44  ;;  %v12704_v40 = vrot.slane %v62_v62, %v10173_v25 }
0x1d03   :  { %14734 = vpow2.f32 %v10756_v11  ;;  %v10737_v59 = vsub.f32 %v10624_v21, %v10723_v5 }
0x1d05   :  { %v10764_v38 = vmul.f32 1.442695, %v10737_v59 }
0x1d0d   :  { %v14735_v53 = vpop.eup %14734 }
0x1d0e   :  { %v10829_v60 = vsel %vm10625_vm4, %v14735_v53, 0.0 }
0x1d0f   :  { %v10830_v0 = vrot.slane %v10829_v60, 4 }
0x1d11   :  { %v10831_v12 = vadd.f32 %v10830_v0, %v10829_v60 }
0x1d13   :  { %v10832_v24 = vrot.slane %v10831_v12, 2 }
0x1d15   :  { %v10833_v31 = vadd.f32 %v10832_v24, %v10831_v12 }
0x1d17   :  { %v10834_v6 = vrot.slane %v10833_v31, 1 }
0x1d19   :  { %v10835_v46 = vadd.f32 %v10834_v6, %v10833_v31 }
0x1d1b   :  { %14736 = vrcp.f32 %v10835_v46 }
0x1d1c   :  { %14738 = vpow2.f32 %v10762_v4 }
0x1d1d   :  { %14740 = vpow2.f32 %v10764_v38 }
0x1d1e   :  { %14742 = vtanh.f32 %v10515_v15 }
0x1d25   :  { %v14737_v34 = vpop.eup %14736 }
0x1d26   :  { %v10887_v8 = vmul.f32 %v14737_v34, %v14735_v53  ;;  %v14739_v56 = vpop.eup %14738  ;;  %v12696_v53 = vrot.slane %v62_v62, %v9992_v20 }
0x1d27   :  { %v10850_v11 = vsel %vm10625_vm4, %v14739_v56, 0.0  ;;  %v14741_v50 = vpop.eup %14740 }
0x1d28   :  { %10939 = vperm.xlu1 %14421, %v10887_v8   ;;  %v10851_v41 = vrot.slane %v10850_v11, 4  ;;  %v10857_v14 = vsel %vm10625_vm4, %v14741_v50, 0.0  ;;  %v14743_v28 = vpop.eup %14742 }
0x1d29   :  { %v10858_v0 = vrot.slane %v10857_v14, 4  ;;  %v10561_v48 = vmul.f32 %v14743_v28, %v16967_v27 }
0x1d2a   :  { %v10852_v60 = vadd.f32 %v10851_v41, %v10850_v11 }
0x1d2b   :  { %v10859_v6 = vadd.f32 %v10858_v0, %v10857_v14  ;;  %v10595_v3 = vsel %vm9960_vm3, %v10561_v48, 0.0 }
0x1d2c   :  { %v10853_v31 = vrot.slane %v10852_v60, 2 }
0x1d2d   :  { %v10860_v8 = vrot.slane %v10859_v6, 2 }
0x1d2e   :  { %v10854_v34 = vadd.f32 %v10853_v31, %v10852_v60 }
0x1d30   :  { %v10855_v20 = vrot.slane %v10854_v34, 1 }
0x1d32   :  { %v10856_v32 = vadd.f32 %v10855_v20, %v10854_v34 }
0x1d87   :  { %v12611_v16 = vpop.f32.mrb[162].mxu0 }
0x1d88   :  { %v17321_v58 = vadd.f32 %v12611_v16, %v12539_v18  ;;  %v14324_v17 = vpop.f32.mrb[163].mxu0  ;;  %v10861_v16 = vadd.f32 %v10860_v8, %v10859_v6 }
0x1d8a   :  { %14334 = vmatmul.mubr.msk.f32.vlgmr.msra.gmra.mrb[166].mxu1 %vm345_vm15, %v17321_v58  ;;  %v10862_v54 = vrot.slane %v10861_v16, 1 }
0x1d8c   :  { %v10863_v33 = vadd.f32 %v10862_v54, %v10861_v16 }
0x1e5d   :  { %v12688_v19 = vpop.f32.mrb[166].mxu1 }
0x1e5e   :  { %v12689_v9 = vadd.f32 %v12688_v19, %v12618_v35  ;;  %v14335_v43 = vpop.f32.mrb[167].mxu1 }
0x1e60   :  { %14744 = vtanh.f32 %v12689_v9 }
0x1e61   :  { %14746 = vtanh.f32 %v10505_v7 }
0x1e62   :  { %14748 = vrcp.f32 %v10856_v32 }
0x1e63   :  { %14750 = vrcp.f32 %v10863_v33 }
0x1e6a   :  { %v14745_v12 = vpop.eup %14744 }
0x1e6b   :  { %v12697_v24 = vmul.f32 %v14745_v12, %v12696_v53  ;;  %v14747_v46 = vpop.eup %14746 }
0x1e6c   :  { %v10559_v18 = vmul.f32 %v14747_v46, %v16967_v27  ;;  %v14749_v47 = vpop.eup %14748  ;;  %v10622_v27 = vadd.f32 %v16989_v39, %v10600_v10 }
0x1e6d   :  { %v12698_v44 = vsel %vm9960_vm3, %v12697_v24, 0.0  ;;  %v10890_v21 = vmul.f32 %v14749_v47, %v14739_v56  ;;  %v14751_v61 = vpop.eup %14750 }
0x1e6e   :  { %12699 = vadd.xlane.f32.xlu0 %v12698_v44  ;;  %v10589_v17 = vsel %vm9960_vm3, %v10559_v18, 0.0  ;;  %v10891_v26 = vmul.f32 %v14751_v61, %v14741_v50  ;;  %v10703_v37 = vsel %vm10625_vm4, %v10622_v27, -inf }
0x1e6f   :  { %v10704_v45 = vrot.slane %v10703_v37, 4 }
0x1e71   :  { %v10705_v36 = vmax.f32 %v10703_v37, %v10704_v45 }
0x1e72   :  { %10596 = vadd.xlane.f32.xlu0 %v10595_v3 }
0x1e73   :  { %v10706_v57 = vrot.slane %v10705_v36, 2 }
0x1e75   :  { %v10707_v1 = vmax.f32 %v10705_v36, %v10706_v57 }
0x1e76   :  { %10590 = vadd.xlane.f32.xlu0 %v10589_v17 }
0x1e77   :  { %v10708_v63 = vrot.slane %v10707_v1, 1 }
0x1e79   :  { %v10709_v29 = vmax.f32 %v10707_v1, %v10708_v63 }
0x1e7b   :  { %v10735_v55 = vsub.f32 %v10622_v27, %v10709_v29 }
0x1e7d   :  { %v10760_v51 = vmul.f32 1.442695, %v10735_v55 }
0x1e7f   :  { %14752 = vpow2.f32 %v10760_v51 }
0x1e89   :  { %v17354_v31 = vpop.eup %14752 }
0x1e8c   :  { %10954 = vperm.xlu0 %14420, %v10890_v21  }
0x1e90   :  { %10959 = vperm.xlu0 %14420, %v10891_v26  }
0x1efb   :  { %v12700_v5 = vpop.xlane.xlu0 %12699 }
0x1efc   :  { %v12705_v4 = vadd.f32 %v12704_v40, %v12700_v5 }
0x1efe   :  { %v12707_v59 = vcombine.high %v12705_v4, %v12705_v4  ;;  %v12710_v38 = vsel %vm12709_vm0, %v12705_v4, -inf }
0x1eff   :  { %v12711_v13 = vrot.slane %v12710_v38, 4  ;;  %v10597_v35 = vpop.xlane.xlu0 %10596 }
0x1f00   :  { %v12717_v15 = vsel %vm12709_vm0, %v12707_v59, -inf  ;;  %v10621_v19 = vadd.f32 %v16989_v39, %v10597_v35 }
0x1f01   :  { %v12712_v9 = vmax.f32 %v12710_v38, %v12711_v13  ;;  %v12718_v43 = vrot.slane %v12717_v15, 4 }
0x1f02   :  { %v10696_v56 = vsel %vm10625_vm4, %v10621_v19, -inf }
0x1f03   :  { %v12713_v7 = vrot.slane %v12712_v9, 2  ;;  %v12719_v25 = vmax.f32 %v12717_v15, %v12718_v43  ;;  %v10697_v62 = vrot.slane %v10696_v56, 4  ;;  %v10591_v11 = vpop.xlane.xlu0 %10590 }
0x1f04   :  { %v10619_v50 = vadd.f32 %v16989_v39, %v10591_v11  ;;  %v10843_v39 = vsel %vm10625_vm4, %v17354_v31, 0.0 }
0x1f05   :  { %v12714_v41 = vmax.f32 %v12712_v9, %v12713_v7  ;;  %v12720_v14 = vrot.slane %v12719_v25, 2  ;;  %v10698_v53 = vmax.f32 %v10696_v56, %v10697_v62  ;;  %v10844_v21 = vrot.slane %v10843_v39, 4 }
0x1f06   :  { %v10682_v28 = vsel %vm10625_vm4, %v10619_v50, -inf }
0x1f07   :  { %v12715_v60 = vrot.slane %v12714_v41, 1  ;;  %v12721_v0 = vmax.f32 %v12719_v25, %v12720_v14  ;;  %v10699_v12 = vrot.slane %v10698_v53, 2  ;;  %v10683_v24 = vrot.slane %v10682_v28, 4 }
0x1f08   :  { %v10845_v27 = vadd.f32 %v10844_v21, %v10843_v39  ;;  %v10940_v21 = vpop.permute.xlu1 %10939 }
0x1f09   :  { %v12716_v6 = vmax.f32 %v12714_v41, %v12715_v60  ;;  %v12722_v44 = vrot.slane %v12721_v0, 1  ;;  %v10700_v48 = vmax.f32 %v10698_v53, %v10699_v12  ;;  %v10684_v46 = vmax.f32 %v10682_v28, %v10683_v24 }
0x1f0a   :  { %v10846_v45 = vrot.slane %v10845_v27, 2 }
0x1f0b   :  { %v12723_v34 = vmax.f32 %v12721_v0, %v12722_v44  ;;  %v12724_v8 = vsub.f32 %v12705_v4, %v12716_v6  ;;  %v10701_v3 = vrot.slane %v10700_v48, 1  ;;  %v10685_v18 = vrot.slane %v10684_v46, 2 }
0x1f0c   :  { %v10847_v29 = vadd.f32 %v10846_v45, %v10845_v27 }
0x1f0d   :  { %v12725_v20 = vsub.f32 %v12707_v59, %v12723_v34  ;;  %v12726_v16 = vmul.f32 1.442695, %v12724_v8  ;;  %v10702_v17 = vmax.f32 %v10700_v48, %v10701_v3  ;;  %v10686_v54 = vmax.f32 %v10684_v46, %v10685_v18 }
0x1f0e   :  { %v10848_v35 = vrot.slane %v10847_v29, 1 }
0x1f0f   :  { %14754 = vpow2.f32 %v12726_v16  ;;  %v12728_v32 = vmul.f32 1.442695, %v12725_v20  ;;  %v10734_v33 = vsub.f32 %v10621_v19, %v10702_v17  ;;  %v10687_v47 = vrot.slane %v10686_v54, 1 }
0x1f11   :  { %14756 = vpow2.f32 %v12728_v32  ;;  %v10758_v61 = vmul.f32 1.442695, %v10734_v33  ;;  %v10688_v26 = vmax.f32 %v10686_v54, %v10687_v47  ;;  %v10955_v32 = vpop.permute.xlu0 %10954  ;;  %v14850_v33 = vmov 839922192  }
0x1f12   :  { %v12756_v47 = vunpack.c.l.s4 %v14850_v33  ;;  %v10974_v27 = vmul.f32 %v10955_v32, %v17061_v22 }
0x1f13   :  { %14758 = vpow2.f32 %v10758_v61  ;;  %v10732_v10 = vsub.f32 %v10619_v50, %v10688_v26  ;;  %v10849_v50 = vadd.f32 %v10848_v35, %v10847_v29 }
0x1f14   :  { %v12757_v61 = vunpack.c.0.s8 %v12756_v47 }
0x1f15   :  { %v10754_v37 = vmul.f32 1.442695, %v10732_v10  ;;  %v10960_v26 = vpop.permute.xlu0 %10959  ;;  %v10971_v10 = vmul.f32 %v10940_v21, %v17041_v30 }
0x1f17   :  { %14760 = vpow2.f32 %v10754_v37  ;;  %v12760_v37 = vsub.s32 %v12757_v61, %v17496_v42  ;;  %v11039_v45 = vsel %vm345_vm15, %v10971_v10, 0.0 }
0x1f18   :  { %v11040_v29 = vrot.slane %v11039_v45, 4 }
0x1f19   :  { %v14755_v36 = vpop.eup %14754 }
0x1f1a   :  { %v12730_v57 = vsel %vm12709_vm0, %v14755_v36, 0.0 }
0x1f1b   :  { %v14757_v1 = vpop.eup %14756  ;;  %v12731_v63 = vrot.slane %v12730_v57, 4 }
0x1f1c   :  { %v12737_v55 = vsel %vm12709_vm0, %v14757_v1, 0.0 }
0x1f1d   :  { %v14759_v40 = vpop.eup %14758  ;;  %v12732_v51 = vadd.f32 %v12731_v63, %v12730_v57  ;;  %v12738_v5 = vrot.slane %v12737_v55, 4 }
0x1f1e   :  { %v10836_v4 = vsel %vm10625_vm4, %v14759_v40, 0.0 }
0x1f1f   :  { %v12733_v59 = vrot.slane %v12732_v51, 2  ;;  %v12739_v38 = vadd.f32 %v12738_v5, %v12737_v55  ;;  %v10837_v13 = vrot.slane %v10836_v4, 4 }
0x1f21   :  { %v14761_v15 = vpop.eup %14760  ;;  %v12734_v19 = vadd.f32 %v12733_v59, %v12732_v51  ;;  %v12740_v9 = vrot.slane %v12739_v38, 2  ;;  %v10838_v43 = vadd.f32 %v10837_v13, %v10836_v4 }
0x1f22   :  { %v10822_v56 = vsel %vm10625_vm4, %v14761_v15, 0.0 }
0x1f23   :  { %v12735_v7 = vrot.slane %v12734_v19, 1  ;;  %v12741_v25 = vadd.f32 %v12740_v9, %v12739_v38  ;;  %v10839_v62 = vrot.slane %v10838_v43, 2  ;;  %v10823_v11 = vrot.slane %v10822_v56, 4 }
0x1f24   :  { %v11041_v38 = vadd.f32 %v11040_v29, %v11039_v45 }
0x1f25   :  { %v12736_v41 = vadd.f32 %v12735_v7, %v12734_v19  ;;  %v12742_v14 = vrot.slane %v12741_v25, 1  ;;  %v10840_v53 = vadd.f32 %v10839_v62, %v10838_v43  ;;  %v10824_v28 = vadd.f32 %v10823_v11, %v10822_v56 }
0x1f27   :  { %v10841_v60 = vrot.slane %v10840_v53, 1  ;;  %v10825_v0 = vrot.slane %v10824_v28, 2  ;;  %14762 = vrcp.f32 %v12736_v41  ;;  %v12743_v12 = vadd.f32 %v12742_v14, %v12741_v25 }
0x1f28   :  { %14764 = vrcp.f32 %v10849_v50  ;;  %v12748_v25 = vcombine.high %v17321_v58, %v17321_v58 }
0x1f29   :  { %v10826_v24 = vadd.f32 %v10825_v0, %v10824_v28  ;;  %v10842_v6 = vadd.f32 %v10841_v60, %v10840_v53 }
0x1f2b   :  { %v10827_v44 = vrot.slane %v10826_v24, 1  ;;  %14766 = vrcp.f32 %v10842_v6 }
0x1f2c   :  { %14768 = vrcp.f32 %v12743_v12 }
0x1f2d   :  { %v10828_v48 = vadd.f32 %v10827_v44, %v10826_v24 }
0x1f2f   :  { %14770 = vrcp.f32 %v10828_v48 }
0x1f31   :  { %v14763_v46 = vpop.eup %14762 }
0x1f32   :  { %v12746_v34 = vmul.f32 %v14763_v46, %v14755_v36  ;;  %v14765_v8 = vpop.eup %14764  ;;  %v11060_v36 = vsel %vm345_vm15, %v10974_v27, 0.0 }
0x1f33   :  { %v10889_v18 = vmul.f32 %v14765_v8, %v17354_v31  ;;  %v10975_v31 = vmul.f32 %v10960_v26, %v17065_v52  ;;  %v11061_v55 = vrot.slane %v11060_v36, 4 }
0x1f34   :  { %12752 = vperm.xlu0 %14420, %v12746_v34  }
0x1f35   :  { %v14767_v3 = vpop.eup %14766  ;;  %v11062_v13 = vadd.f32 %v11061_v55, %v11060_v36 }
0x1f36   :  { %v10888_v39 = vmul.f32 %v14767_v3, %v14759_v40  ;;  %v14769_v20 = vpop.eup %14768 }
0x1f37   :  { %v12747_v16 = vmul.f32 %v14769_v20, %v14757_v1  ;;  %v11067_v1 = vsel %vm345_vm15, %v10975_v31, 0.0  ;;  %v11063_v14 = vrot.slane %v11062_v13, 2 }
0x1f38   :  { %10949 = vperm.xlu0 %14420, %v10889_v18   ;;  %10944 = vperm.xlu1 %14421, %v10888_v39   ;;  %v11068_v30 = vrot.slane %v11067_v1, 4 }
0x1f39   :  { %v14771_v17 = vpop.eup %14770  ;;  %v11064_v34 = vadd.f32 %v11063_v14, %v11062_v13 }
0x1f3a   :  { %v10886_v54 = vmul.f32 %v14771_v17, %v14761_v15  ;;  %v11069_v19 = vadd.f32 %v11068_v30, %v11067_v1 }
0x1f3b   :  { %v11065_v33 = vrot.slane %v11064_v34, 1 }
0x1f3c   :  { %12764 = vperm.xlu1 %14421, %v12747_v16   ;;  %v11070_v53 = vrot.slane %v11069_v19, 2 }
0x1f3d   :  { %v11066_v45 = vadd.f32 %v11065_v33, %v11064_v34 }
0x1f3e   :  { %v11071_v8 = vadd.f32 %v11070_v53, %v11069_v19  ;;  %v17504_v53 = vld [vmem:[#allocation8_spill] sm:$0xff] }
0x1f40   :  { %10934 = vperm.xlu1 %14421, %v10886_v54   ;;  %v11072_v47 = vrot.slane %v11071_v8, 1 }
0x1f42   :  { %v11073_v36 = vadd.f32 %v11072_v47, %v11071_v8 }
0x1fb3   :  { %v12753_v57 = vpop.permute.xlu0 %12752 }
0x1fb4   :  { %v12761_v63 = vrot.slane %v12753_v57, %v12760_v37 }
0x1fb6   :  { %v12774_v40 = vmul.f32 %v12761_v63, %v17321_v58 }
0x1fb7   :  { %v10945_v51 = vpop.permute.xlu1 %10944  ;;  %v10950_v22 = vpop.permute.xlu0 %10949 }
0x1fb8   :  { %v12777_v52 = vsel %vm12776_vm1, %v12774_v40, 0.0  ;;  %v10972_v5 = vmul.f32 %v10945_v51, %v17050_v2  ;;  %v10973_v4 = vmul.f32 %v10950_v22, %v17053_v49  ;;  %v11042_v49 = vrot.slane %v11041_v38, 2 }
0x1fb9   :  { %v12778_v59 = vrot.slane %v12777_v52, 4 }
0x1fba   :  { %v11046_v35 = vsel %vm345_vm15, %v10972_v5, 0.0  ;;  %v11053_v15 = vsel %vm345_vm15, %v10973_v4, 0.0  ;;  %v11043_v46 = vadd.f32 %v11042_v49, %v11041_v38 }
0x1fbb   :  { %v12779_v9 = vadd.f32 %v12778_v59, %v12777_v52  ;;  %v11047_v43 = vrot.slane %v11046_v35, 4  ;;  %v11054_v56 = vrot.slane %v11053_v15, 4  ;;  %v12765_v7 = vpop.permute.xlu1 %12764 }
0x1fbc   :  { %v12773_v62 = vrot.slane %v12765_v7, %v12760_v37  ;;  %v11044_v54 = vrot.slane %v11043_v46, 1 }
0x1fbd   :  { %v12780_v11 = vrot.slane %v12779_v9, 2  ;;  %v11048_v2 = vadd.f32 %v11047_v43, %v11046_v35  ;;  %v11055_v50 = vadd.f32 %v11054_v56, %v11053_v15 }
0x1fbe   :  { %v12775_v41 = vmul.f32 %v12773_v62, %v12748_v25  ;;  %v11045_v31 = vadd.f32 %v11044_v54, %v11043_v46 }
0x1fbf   :  { %v11049_v28 = vrot.slane %v11048_v2, 2  ;;  %v10935_v60 = vpop.permute.xlu1 %10934  ;;  %v12781_v0 = vadd.f32 %v12780_v11, %v12779_v9  ;;  %v11056_v44 = vrot.slane %v11055_v50, 2 }
0x1fc0   :  { %v12784_v12 = vsel %vm12776_vm1, %v12775_v41, 0.0  ;;  %v10970_v24 = vmul.f32 %v10935_v60, %v17036_v23 }
0x1fc1   :  { %v11050_v6 = vadd.f32 %v11049_v28, %v11048_v2  ;;  %v12785_v48 = vrot.slane %v12784_v12, 4  ;;  %v12782_v18 = vrot.slane %v12781_v0, 1  ;;  %v11057_v16 = vadd.f32 %v11056_v44, %v11055_v50 }
0x1fc2   :  { %v11032_v58 = vsel %vm345_vm15, %v10970_v24, 0.0  ;;  %vm12813_vm15 = vcmask 256000   ;;  %v12836_v28 = vsub.s32 %v17504_v53, %v17496_v42 }
0x1fc3   :  { %v12786_v3 = vadd.f32 %v12785_v48, %v12784_v12  ;;  %v11033_v39 = vrot.slane %v11032_v58, 4  ;;  %v11051_v20 = vrot.slane %v11050_v6, 1  ;;  %v12783_v23 = vadd.f32 %v12782_v18, %v12781_v0 }
0x1fc4   :  { %v11058_v10 = vrot.slane %v11057_v16, 1 }
0x1fc5   :  { %v12787_v17 = vrot.slane %v12786_v3, 2  ;;  %v11034_v32 = vadd.f32 %v11033_v39, %v11032_v58  ;;  %v11052_v26 = vadd.f32 %v11051_v20, %v11050_v6  ;;  %v12792_v63 = vmul.f32 %v12783_v23, %v11045_v31 }
0x1fc6   :  { %v11059_v29 = vadd.f32 %v11058_v10, %v11057_v16 }
0x1fc7   :  { %v12788_v21 = vadd.f32 %v12787_v17, %v12786_v3  ;;  %v11035_v61 = vrot.slane %v11034_v32, 2  ;;  %v12793_v55 = vmul.f32 %v12783_v23, %v11052_v26  ;;  %v12803_v59 = vrot.slane %v12792_v63, 7 }
0x1fc9   :  { %v12789_v27 = vrot.slane %v12788_v21, 1  ;;  %v11036_v37 = vadd.f32 %v11035_v61, %v11034_v32  ;;  %v12805_v38 = vrot.slane %v12793_v55, 6 }
0x1fcb   :  { %v12790_v57 = vadd.f32 %v12789_v27, %v12788_v21  ;;  %v11037_v1 = vrot.slane %v11036_v37, 1 }
0x1fcd   :  { %v12795_v40 = vmul.f32 %v12790_v57, %v11066_v45  ;;  %v12796_v30 = vmul.f32 %v12790_v57, %v11073_v36  ;;  %v11038_v51 = vadd.f32 %v11037_v1, %v11036_v37  ;;  %v12794_v22 = vmul.f32 %v12790_v57, %v11059_v29 }
0x1fcf   :  { %v12807_v52 = vrot.slane %v12795_v40, 7  ;;  %v12809_v5 = vrot.slane %v12796_v30, 6  ;;  %v12791_v4 = vmul.f32 %v12783_v23, %v11038_v51 }
0x1fd1   :  { %v12808_v13 = vsel %vm11086_vm5, %v12807_v52, %v12794_v22  ;;  %v12804_v35 = vsel %vm11086_vm5, %v12803_v59, %v12791_v4 }
0x1fd2   :  { %v12810_v15 = vsel %vm11088_vm6, %v12809_v5, %v12808_v13  ;;  %v12806_v19 = vsel %vm11088_vm6, %v12805_v38, %v12804_v35 }
0x1fd3   :  { %v12817_v9 = vsel %vm12813_vm15, %v12810_v15, 0.0  ;;  %v12814_v43 = vsel %vm12813_vm15, %v12806_v19, 0.0 }
0x1fd4   :  { %12818 = vadd.xlane.f32.xlu0 %v12817_v9  ;;  %12815 = vadd.xlane.f32.xlu1 %v12814_v43 }
0x2061   :  { %v12819_v56 = vpop.xlane.xlu0 %12818  ;;  %v12816_v7 = vpop.xlane.xlu1 %12815 }
0x2062   :  { %v12821_v25 = vsub.f32 0.0, %v12819_v56  ;;  %v12820_v62 = vsub.f32 0.0, %v12816_v7 }
0x2064   :  { %v12824_v11 = vmul.f32 1.442695, %v12821_v25  ;;  %v12822_v2 = vmul.f32 1.442695, %v12820_v62 }
0x2066   :  { %14772 = vpow2.f32 %v12824_v11 }
0x2067   :  { %14774 = vpow2.f32 %v12822_v2 }
0x2070   :  { %v14773_v50 = vpop.eup %14772 }
0x2071   :  { %v14775_v49 = vpop.eup %14774  ;;  %v12827_v41 = vadd.f32 1.0, %v14773_v50 }
0x2072   :  { %v12826_v14 = vadd.f32 1.0, %v14775_v49 }
0x2073   :  { %14776 = vrcp.f32 %v12827_v41 }
0x2074   :  { %14778 = vrcp.f32 %v12826_v14 }
0x207d   :  { %v14777_v60 = vpop.eup %14776 }
0x207e   :  { %v14779_v0 = vpop.eup %14778  ;;  %v12841_v12 = vrot.slane %v14777_v60, %v12836_v28 }
0x207f   :  { %v12837_v24 = vrot.slane %v14779_v0, %v12836_v28 }
0x2081   :  { %v12842_v6 = vsel %vm11086_vm5, %v12841_v12, %v12837_v24 }
0x2082   :  { %12845 = vst.msk [vmem:[#allocation5] sm:$0x3] %vm12844_vm2, %v12842_v6 }
0x2083   :  { %14815 = shalt.err (!%p14812_p12)
}
0x2084   :  { %s14816_s10 = scalar_lea.hbm %s17402_s2, 32 }
0x2085   :  { %p14817_p13 = scmp.ne.s32.totalorder %s17402_s2, %s14816_s10  ;;  %p14820_p0 = scmp.lt.u32.totalorder %s14816_s10, %s17402_s2 }
0x2087   :  { %p14822_p1 = pnand %p14820_p0, %p14817_p13 }
0x2089   :  { %14825 = shalt.err (!%p14822_p1)
}
0x208a   :  { %12855 = dma.vmem_to_hbm [thread:$0]  %s12853_s6, 32, %s17402_s2, [#allocation4]  }
0x208b   :  { %14828 = dma.done.wait [#allocation4], 32  }
0x208c   :  { %14829 = vsyncadd [#allocation4], 4294967264 }
0x208d   :  { %12859 = vsyncpa [#allocation3], 1 }
0x208e   :  { %12860 = vsyncpa [#allocation4], 1 }

</bundles_post_ra>
